<compile_context>
chip_gen: v5e
topology: v5e:2x2
jax: 0.10.0
libtpu: 0.0.40
codegen_flags: <defaults>
</compile_context>

<pallas_src>
import math

import jax
import jax.numpy as jnp
from jax.experimental import pallas as pl
from jax.experimental.pallas import tpu as pltpu

DIM = 512
N_LAYERS = 4
LR_MUL = 0.01
LRELU_SLOPE = 0.2
FUSED_SCALE = math.sqrt(2.0)   # fused_leaky_relu output scale (2 ** 0.5)
EPS = 1e-8


def mapper_kernel(x_ref, w_ref, b_ref, o_ref):
    # x_ref: (bm, 512) f32/input dtype
    # w_ref: (4, 512, 512) bf16 (pre-scaled, transposed, sqrt(2)-folded)
    # b_ref: (4, 1, 512)   f32  (lr_mul * sqrt(2) folded)
    # o_ref: (bm, 512)
    x = x_ref[...].astype(jnp.float32)

    # PixelNorm over dim=1 (the feature dim for a 2D latent input), in f32.
    x = x * jax.lax.rsqrt(jnp.mean(x * x, axis=1, keepdims=True) + EPS)

    # 4 x EqualLinear(512, 512) with fused leaky-relu (unrolled at trace time).
    # MXU operands in bf16, accumulation + epilogue in f32.
    for i in range(N_LAYERS):
        y = jnp.dot(x.astype(jnp.bfloat16), w_ref[i],
                    preferred_element_type=jnp.float32)
        y = y + b_ref[i]                                  # (1, 512) f32 broadcast
        x = jnp.where(y >= 0.0, y, LRELU_SLOPE * y)       # sqrt(2) already folded in

    o_ref[...] = x.astype(o_ref.dtype)


def prepare_params(weights, biases):
    """Fold EqualLinear runtime scaling into the parameters, once, off the hot path.

    weights: [4, 512(out), 512(in)] (PyTorch layout), biases: [4, 512].
    Returns w_eff [4, in, out] bf16 and b_eff [4, 1, out] f32, with
    scale = (1/sqrt(512)) * lr_mul and the fused_leaky_relu sqrt(2) folded in
    (leaky_relu is positively homogeneous, so sqrt(2)*lrelu(y+b) == lrelu(sqrt(2)y + sqrt(2)b)).
    """
    scale = (1.0 / math.sqrt(DIM)) * LR_MUL
    w_eff = (jnp.transpose(weights, (0, 2, 1)) * (scale * FUSED_SCALE)).astype(jnp.bfloat16)
    b_eff = (biases.astype(jnp.float32) * (LR_MUL * FUSED_SCALE)).reshape(N_LAYERS, 1, DIM)
    return w_eff, b_eff


def _pick_bm(B):
    # Tiny-B inference regime (StyleCLIP mappers typically see B ~ 1-64):
    # whole batch in one tile, no grid/pipeline overhead; weight-DMA bound.
    if B <= 256:
        return B
    # Large B: tile the batch. 256 rows fills the MXU M-dim on v6e/v7x (2 passes
    # on v5e's 128-high MXU) while keeping (weights + double-buffered in/out
    # tiles) under ~10 MiB, i.e. safe for v7x's 64 MiB VMEM and v5e's scoped
    # limit, and exposes >=2 parallel grid steps for v7x's two TensorCores.
    for t in (256, 512, 128, 64, 32, 16, 8):
        if B % t == 0:
            return t
    return B  # ragged batch: fall back to a single full-array tile


def single_mapper_forward(x, w_eff, b_eff, *, bm=None):
    """x: [B, 512]; w_eff/b_eff from prepare_params()."""
    B, D = x.shape
    assert D == DIM
    if bm is None:
        bm = _pick_bm(B)
    assert bm == B or (B % bm == 0), "batch tile must divide B (or equal B)"

    grid = (B // bm,) if bm != B else (1,)

    # Weight/bias blocks are grid-invariant (constant index_map): single-buffer
    # them so the pipeline doesn't allocate a second, never-used copy.
    w_spec = pl.BlockSpec((N_LAYERS, DIM, DIM), lambda i: (0, 0, 0),
                          pipeline_mode=pl.Buffered(1))
    b_spec = pl.BlockSpec((N_LAYERS, 1, DIM), lambda i: (0, 0, 0),
                          pipeline_mode=pl.Buffered(1))

    return pl.pallas_call(
        mapper_kernel,
        out_shape=jax.ShapeDtypeStruct((B, DIM), x.dtype),
        grid=grid,
        in_specs=[
            pl.BlockSpec((bm, DIM), lambda i: (i, 0)),   # batch tile (double-buffered)
            w_spec,                                      # all 4 weights resident, bf16
            b_spec,                                      # all 4 biases resident, f32
        ],
        out_specs=pl.BlockSpec((bm, DIM), lambda i: (i, 0)),
        compiler_params=pltpu.CompilerParams(
            dimension_semantics=("parallel",),
            vmem_limit_bytes=48 * 1024 * 1024,
        ),
    )(x, w_eff, b_eff)


def single_mapper_reference(x, weights, biases):
    """Pure-JAX f32 reference mirroring the PyTorch module exactly."""
    x = x.astype(jnp.float32)
    x = x * jax.lax.rsqrt(jnp.mean(x * x, axis=1, keepdims=True) + EPS)
    scale = (1.0 / math.sqrt(DIM)) * LR_MUL
    for i in range(N_LAYERS):
        y = x @ (weights[i] * scale).T
        y = y + biases[i] * LR_MUL
        y = jnp.where(y >= 0.0, y, LRELU_SLOPE * y) * FUSED_SCALE
        x = y
    return x


def single_mapper_reference_bf16(x, w_eff, b_eff):
    """Reference using the same bf16 operands / f32 accumulation as the kernel
    (tight check of the kernel logic itself)."""
    x = x.astype(jnp.float32)
    x = x * jax.lax.rsqrt(jnp.mean(x * x, axis=1, keepdims=True) + EPS)
    for i in range(N_LAYERS):
        y = jnp.dot(x.astype(jnp.bfloat16), w_eff[i],
                    preferred_element_type=jnp.float32)
        y = y + b_eff[i]
        x = jnp.where(y >= 0.0, y, LRELU_SLOPE * y)
    return x


if __name__ == "__main__":
    key = jax.random.PRNGKey(0)
    kx, kw, kb = jax.random.split(key, 3)

    B = 8
    x = jax.random.normal(kx, (B, DIM), dtype=jnp.float32)

    # EqualLinear init: weight = randn(out, in) / lr_mul ; bias nonzero here to
    # exercise the bias path (PyTorch init is zeros, but trained mappers aren't).
    weights = jax.random.normal(kw, (N_LAYERS, DIM, DIM), dtype=jnp.float32) / LR_MUL
    biases = jax.random.normal(kb, (N_LAYERS, DIM), dtype=jnp.float32)

    # Fold parameters once, outside the per-call path.
    w_eff, b_eff = prepare_params(weights, biases)

    out = single_mapper_forward(x, w_eff, b_eff)
    out = jax.block_until_ready(out)
    assert out.shape == (B, DIM)

    # Tight check against a reference that uses the same bf16 operands.
    ref_bf16 = jax.block_until_ready(single_mapper_reference_bf16(x, w_eff, b_eff))
    assert jnp.allclose(out, ref_bf16, rtol=1e-3, atol=1e-3), \
        "kernel mismatch vs bf16-operand reference"

    # Semantics check against the full-f32 PyTorch-style reference; tolerance
    # accounts for bf16 matmul operands (f32 accumulation) across 4 layers.
    ref_f32 = jax.block_until_ready(single_mapper_reference(x, weights, biases))
    assert jnp.allclose(out, ref_f32, rtol=5e-2, atol=5e-2), \
        "kernel drifted from f32 PyTorch semantics beyond bf16 tolerance"

    print("KERNEL_OK")
</pallas_src>

<mosaic_0001>
module attributes {stable_mosaic.version = 11 : i64} {
  func.func @mapper_kernel(%arg0: i32, %arg1: memref<8x512xf32, #tpu.memory_space<vmem>>, %arg2: memref<4x512x512xbf16, #tpu.memory_space<vmem>>, %arg3: memref<4x1x512xf32, #tpu.memory_space<vmem>>, %arg4: memref<8x512xf32, #tpu.memory_space<vmem>>) attributes {dimension_semantics = [#tpu.dimension_semantics<parallel>], iteration_bounds = array<i64: 1>, scalar_prefetch = 0 : i64, scratch_operands = 0 : i64, tpu.core_type = #tpu.core_type<tc>, window_params = [{transform_indices = @transform_0, window_bounds = array<i64: 8, 512>}, {pipeline_mode = #tpu.pipeline_mode<synchronous>, transform_indices = @transform_1, window_bounds = array<i64: 4, 512, 512>}, {pipeline_mode = #tpu.pipeline_mode<synchronous>, transform_indices = @transform_2, window_bounds = array<i64: 4, 1, 512>}, {transform_indices = @transform_3, window_bounds = array<i64: 8, 512>}]} {
    %c0 = arith.constant 0 : index
    %c0_0 = arith.constant 0 : index
    %0 = vector.load %arg1[%c0, %c0_0] : memref<8x512xf32, #tpu.memory_space<vmem>>, vector<8x512xf32>
    %1 = arith.mulf %0, %0 : vector<8x512xf32>
    %cst = arith.constant dense<0.000000e+00> : vector<8xf32>
    %2 = vector.multi_reduction <add>, %1, %cst [1] : vector<8x512xf32> to vector<8xf32>
    %3 = vector.shape_cast %2 : vector<8xf32> to vector<8x1xf32>
    %cst_1 = arith.constant 5.120000e+02 : f32
    %4 = vector.broadcast %cst_1 : f32 to vector<8x1xf32>
    %5 = arith.divf %3, %4 : vector<8x1xf32>
    %cst_2 = arith.constant 9.99999993E-9 : f32
    %6 = vector.broadcast %cst_2 : f32 to vector<8x1xf32>
    %7 = arith.addf %5, %6 : vector<8x1xf32>
    %8 = math.rsqrt %7 : vector<8x1xf32>
    %9 = vector.broadcast %8 : vector<8x1xf32> to vector<8x512xf32>
    %10 = arith.mulf %0, %9 : vector<8x512xf32>
    %11 = arith.truncf %10 : vector<8x512xf32> to vector<8x512xbf16>
    %c0_3 = arith.constant 0 : index
    %c0_4 = arith.constant 0 : index
    %c0_5 = arith.constant 0 : index
    %12 = vector.load %arg2[%c0_3, %c0_4, %c0_5] : memref<4x512x512xbf16, #tpu.memory_space<vmem>>, vector<1x512x512xbf16>
    %13 = vector.shape_cast %12 : vector<1x512x512xbf16> to vector<512x512xbf16>
    %cst_6 = arith.constant dense<0.000000e+00> : vector<8x512xf32>
    %14 = tpu.matmul %11, %13, %cst_6 {dimension_numbers = #tpu.dot_dimension_numbers<[1], [0], [0], [1], [0, 0, 1, 1], [], []>} : vector<8x512xbf16>, vector<512x512xbf16>, vector<8x512xf32> -> vector<8x512xf32>
    %c0_7 = arith.constant 0 : index
    %c0_8 = arith.constant 0 : index
    %c0_9 = arith.constant 0 : index
    %15 = vector.load %arg3[%c0_7, %c0_8, %c0_9] : memref<4x1x512xf32, #tpu.memory_space<vmem>>, vector<1x1x512xf32>
    %16 = vector.shape_cast %15 : vector<1x1x512xf32> to vector<1x512xf32>
    %17 = vector.broadcast %16 : vector<1x512xf32> to vector<8x512xf32>
    %18 = arith.addf %14, %17 : vector<8x512xf32>
    %cst_10 = arith.constant 0.000000e+00 : f32
    %19 = vector.broadcast %cst_10 : f32 to vector<8x512xf32>
    %20 = arith.cmpf oge, %18, %19 : vector<8x512xf32>
    %cst_11 = arith.constant 2.000000e-01 : f32
    %21 = vector.broadcast %cst_11 : f32 to vector<8x512xf32>
    %22 = arith.mulf %21, %18 : vector<8x512xf32>
    %23 = arith.select %20, %18, %22 : vector<8x512xi1>, vector<8x512xf32>
    %24 = arith.truncf %23 : vector<8x512xf32> to vector<8x512xbf16>
    %c1 = arith.constant 1 : index
    %c0_12 = arith.constant 0 : index
    %c0_13 = arith.constant 0 : index
    %25 = vector.load %arg2[%c1, %c0_12, %c0_13] : memref<4x512x512xbf16, #tpu.memory_space<vmem>>, vector<1x512x512xbf16>
    %26 = vector.shape_cast %25 : vector<1x512x512xbf16> to vector<512x512xbf16>
    %cst_14 = arith.constant dense<0.000000e+00> : vector<8x512xf32>
    %27 = tpu.matmul %24, %26, %cst_14 {dimension_numbers = #tpu.dot_dimension_numbers<[1], [0], [0], [1], [0, 0, 1, 1], [], []>} : vector<8x512xbf16>, vector<512x512xbf16>, vector<8x512xf32> -> vector<8x512xf32>
    %c1_15 = arith.constant 1 : index
    %c0_16 = arith.constant 0 : index
    %c0_17 = arith.constant 0 : index
    %28 = vector.load %arg3[%c1_15, %c0_16, %c0_17] : memref<4x1x512xf32, #tpu.memory_space<vmem>>, vector<1x1x512xf32>
    %29 = vector.shape_cast %28 : vector<1x1x512xf32> to vector<1x512xf32>
    %30 = vector.broadcast %29 : vector<1x512xf32> to vector<8x512xf32>
    %31 = arith.addf %27, %30 : vector<8x512xf32>
    %cst_18 = arith.constant 0.000000e+00 : f32
    %32 = vector.broadcast %cst_18 : f32 to vector<8x512xf32>
    %33 = arith.cmpf oge, %31, %32 : vector<8x512xf32>
    %cst_19 = arith.constant 2.000000e-01 : f32
    %34 = vector.broadcast %cst_19 : f32 to vector<8x512xf32>
    %35 = arith.mulf %34, %31 : vector<8x512xf32>
    %36 = arith.select %33, %31, %35 : vector<8x512xi1>, vector<8x512xf32>
    %37 = arith.truncf %36 : vector<8x512xf32> to vector<8x512xbf16>
    %c2 = arith.constant 2 : index
    %c0_20 = arith.constant 0 : index
    %c0_21 = arith.constant 0 : index
    %38 = vector.load %arg2[%c2, %c0_20, %c0_21] : memref<4x512x512xbf16, #tpu.memory_space<vmem>>, vector<1x512x512xbf16>
    %39 = vector.shape_cast %38 : vector<1x512x512xbf16> to vector<512x512xbf16>
    %cst_22 = arith.constant dense<0.000000e+00> : vector<8x512xf32>
    %40 = tpu.matmul %37, %39, %cst_22 {dimension_numbers = #tpu.dot_dimension_numbers<[1], [0], [0], [1], [0, 0, 1, 1], [], []>} : vector<8x512xbf16>, vector<512x512xbf16>, vector<8x512xf32> -> vector<8x512xf32>
    %c2_23 = arith.constant 2 : index
    %c0_24 = arith.constant 0 : index
    %c0_25 = arith.constant 0 : index
    %41 = vector.load %arg3[%c2_23, %c0_24, %c0_25] : memref<4x1x512xf32, #tpu.memory_space<vmem>>, vector<1x1x512xf32>
    %42 = vector.shape_cast %41 : vector<1x1x512xf32> to vector<1x512xf32>
    %43 = vector.broadcast %42 : vector<1x512xf32> to vector<8x512xf32>
    %44 = arith.addf %40, %43 : vector<8x512xf32>
    %cst_26 = arith.constant 0.000000e+00 : f32
    %45 = vector.broadcast %cst_26 : f32 to vector<8x512xf32>
    %46 = arith.cmpf oge, %44, %45 : vector<8x512xf32>
    %cst_27 = arith.constant 2.000000e-01 : f32
    %47 = vector.broadcast %cst_27 : f32 to vector<8x512xf32>
    %48 = arith.mulf %47, %44 : vector<8x512xf32>
    %49 = arith.select %46, %44, %48 : vector<8x512xi1>, vector<8x512xf32>
    %50 = arith.truncf %49 : vector<8x512xf32> to vector<8x512xbf16>
    %c3 = arith.constant 3 : index
    %c0_28 = arith.constant 0 : index
    %c0_29 = arith.constant 0 : index
    %51 = vector.load %arg2[%c3, %c0_28, %c0_29] : memref<4x512x512xbf16, #tpu.memory_space<vmem>>, vector<1x512x512xbf16>
    %52 = vector.shape_cast %51 : vector<1x512x512xbf16> to vector<512x512xbf16>
    %cst_30 = arith.constant dense<0.000000e+00> : vector<8x512xf32>
    %53 = tpu.matmul %50, %52, %cst_30 {dimension_numbers = #tpu.dot_dimension_numbers<[1], [0], [0], [1], [0, 0, 1, 1], [], []>} : vector<8x512xbf16>, vector<512x512xbf16>, vector<8x512xf32> -> vector<8x512xf32>
    %c3_31 = arith.constant 3 : index
    %c0_32 = arith.constant 0 : index
    %c0_33 = arith.constant 0 : index
    %54 = vector.load %arg3[%c3_31, %c0_32, %c0_33] : memref<4x1x512xf32, #tpu.memory_space<vmem>>, vector<1x1x512xf32>
    %55 = vector.shape_cast %54 : vector<1x1x512xf32> to vector<1x512xf32>
    %56 = vector.broadcast %55 : vector<1x512xf32> to vector<8x512xf32>
    %57 = arith.addf %53, %56 : vector<8x512xf32>
    %cst_34 = arith.constant 0.000000e+00 : f32
    %58 = vector.broadcast %cst_34 : f32 to vector<8x512xf32>
    %59 = arith.cmpf oge, %57, %58 : vector<8x512xf32>
    %cst_35 = arith.constant 2.000000e-01 : f32
    %60 = vector.broadcast %cst_35 : f32 to vector<8x512xf32>
    %61 = arith.mulf %60, %57 : vector<8x512xf32>
    %62 = arith.select %59, %57, %61 : vector<8x512xi1>, vector<8x512xf32>
    %c0_36 = arith.constant 0 : index
    %c0_37 = arith.constant 0 : index
    %63 = vector.load %arg4[%c0_36, %c0_37] : memref<8x512xf32, #tpu.memory_space<vmem>>, vector<8x512xf32>
    tpu.vector_store %arg4[%c0_36, %c0_37], %62 {strides = array<i32>} : memref<8x512xf32, #tpu.memory_space<vmem>>, vector<8x512xf32>,
    return
  }
  func.func @transform_0(%arg0: i32) -> (i32, i32) {
    %c0_i32 = arith.constant 0 : i32
    %c0_i32_0 = arith.constant 0 : i32
    return %arg0, %c0_i32 : i32, i32
  }
  func.func @transform_1(%arg0: i32) -> (i32, i32, i32) {
    %c0_i32 = arith.constant 0 : i32
    %c0_i32_0 = arith.constant 0 : i32
    %c0_i32_1 = arith.constant 0 : i32
    %c0_i32_2 = arith.constant 0 : i32
    return %c0_i32, %c0_i32_0, %c0_i32_1 : i32, i32, i32
  }
  func.func @transform_2(%arg0: i32) -> (i32, i32, i32) {
    %c0_i32 = arith.constant 0 : i32
    %c0_i32_0 = arith.constant 0 : i32
    %c0_i32_1 = arith.constant 0 : i32
    %c0_i32_2 = arith.constant 0 : i32
    return %c0_i32, %c0_i32_0, %c0_i32_1 : i32, i32, i32
  }
  func.func @transform_3(%arg0: i32) -> (i32, i32) {
    %c0_i32 = arith.constant 0 : i32
    %c0_i32_0 = arith.constant 0 : i32
    return %arg0, %c0_i32 : i32, i32
  }
}

</mosaic_0001>

<bundles_post_ra>
// kernel: tpu_custom_call.1
= control target key start
LH: loop header
LB: loop body
LE: loop exit
PB: predicated region body
PF: predicated region fallthrough
CT: control target
= control target key end

     0   :  { %8 = vsyncpa [#allocation3], 0  ;;  %s7061_s0 = inlined_call_operand.hbm [shape: f32[8,512], index: 0, kind: input, shape index: {}]   ;;  %s7062_s1 = inlined_call_operand.hbm [shape: bf16[4,512,512], index: 1, kind: input, shape index: {}]   ;;  %s7063_s2 = inlined_call_operand.hbm [shape: f32[4,1,512], index: 2, kind: input, shape index: {}]   ;;  %s7064_s3 = inlined_call_operand.hbm [shape: f32[8,512], index: 3, kind: output, shape index: {}]  }
   0x1   :  { %9 = vsyncpa [#allocation6], 0  ;;  %s26_s14 = sshll.u32 %s7062_s1, 4  ;;  %s27_s14 = int_to_ptr.hbm [resolvable:$true] %s26_s14 }
   0x2   :  { %10 = vsyncpa [#allocation4], 0  ;;  %s6807_s15 = smov [#allocation5]   ;;  %s16_s19 = sshll.u32 %s7061_s0, 4  ;;  %s17_s19 = int_to_ptr.hbm [resolvable:$true] %s16_s19 }
   0x3   :  { %s28_s16 = sshll.u32 %s6807_s15, 4  ;;  %s6808_s20 = smov 256   ;;  %s29_s16 = int_to_ptr.vmem [resolvable:$true] %s28_s16 }
   0x4   :  { %s6809_s21 = smov 16   ;;  %s6810_s22 = smov [#allocation2]  }
   0x5   :  { %34 = dma.hbm_to_vmem [thread:$0]  %s27_s14, 65536, %s29_s16, [#allocation6], %s6808_s20, %s6808_s20, %s6809_s21  }
   0x6   :  { %s18_s23 = sshll.u32 %s6810_s22, 4  ;;  %s39_s26 = sshll.u32 %s7063_s2, 4  ;;  %s19_s23 = int_to_ptr.vmem [resolvable:$true] %s18_s23  ;;  %s40_s26 = int_to_ptr.hbm [resolvable:$true] %s39_s26 }
   0x7   :  { %21 = dma.hbm_to_vmem [thread:$0]  %s17_s19, 512, %s19_s23, [#allocation3]  }
   0x8   :  { %s6811_s1 = smov [#allocation7]   ;;  %s6812_s28 = smov 64  }
   0x9   :  { %s41_s27 = sshll.u32 %s6811_s1, 4  ;;  %s6813_s29 = smov 4   ;;  %s42_s27 = int_to_ptr.vmem [resolvable:$true] %s41_s27 }
   0xa   :  { %47 = dma.hbm_to_vmem [thread:$0]  %s40_s26, 256, %s42_s27, [#allocation6], %s6812_s28, %s6812_s28, %s6813_s29  }
   0xb   :  { %6801 = dma.done.wait [#allocation3], 512  }
   0xc   :  { %6802 = vsyncadd [#allocation3], 4294966784 }
   0xd   :  { %6803 = dma.done.wait [#allocation6], 65792  }
   0xe   :  { %6804 = vsyncadd [#allocation6], 4294901504  ;;  %v6845_v0 = vld [vmem:[#allocation2] sm:$0xff]  ;;  %v6847_v1 = vld [vmem:[#allocation2 + $0x8] sm:$0xff]  ;;  %s6815_s0 = smov [#allocation8]   ;;  %s4121_s5 = sshll.u32 %s7064_s3, 4  ;;  %s4122_s5 = int_to_ptr.hbm [resolvable:$true] %s4121_s5 }
   0xf   :  { %v6849_v2 = vld [vmem:[#allocation2 + $0x10] sm:$0xff]  ;;  %v6851_v3 = vld [vmem:[#allocation2 + $0x18] sm:$0xff]  ;;  %v64_v4 = vmul.f32 %v6845_v0, %v6845_v0  ;;  %v65_v5 = vmul.f32 %v6847_v1, %v6847_v1  ;;  %v4246_v7 = vld [vmem:[#allocation5 + $0xe0] sm:$0xf]  ;;  %s4119_s2 = sshll.u32 %s6815_s0, 4  ;;  %s4120_s2 = int_to_ptr.vmem [resolvable:$true] %s4119_s2 }
  0x10   :  { %v66_v6 = vmul.f32 %v6849_v2, %v6849_v2  ;;  %v6210_v8 = vld [vmem:[#allocation5 + $0xec] sm:$0xf0]  ;;  %v4374_v10 = vld [vmem:[#allocation5 + $0x1e0] sm:$0xf]  ;;  %v67_v13 = vmul.f32 %v6851_v3, %v6851_v3 }
  0x11   :  { %v4247_v9 = vor.u32 %v6210_v8, %v4246_v7  ;;  %v6242_v11 = vld [vmem:[#allocation5 + $0x1ec] sm:$0xf0]  ;;  %v4502_v12 = vld [vmem:[#allocation5 + $0x2e0] sm:$0xf]  ;;  %v68_v14 = vadd.f32 %v65_v5, %v64_v4 }
  0x12   :  { %v4375_v15 = vor.u32 %v6242_v11, %v4374_v10  ;;  %v6274_v16 = vld [vmem:[#allocation5 + $0x2ec] sm:$0xf0]  ;;  %v4630_v17 = vld [vmem:[#allocation5 + $0x3e0] sm:$0xf] }
  0x13   :  { %v6306_v18 = vld [vmem:[#allocation5 + $0x3ec] sm:$0xf0]  ;;  %878 = vmatpush.bf16.msra.mxu0 %v4247_v9  ;;  %v4503_v19 = vor.u32 %v6274_v16, %v4502_v12  ;;  %v4230_v21 = vld [vmem:[#allocation5 + $0xc0] sm:$0xf]  ;;  %v69_v24 = vadd.f32 %v68_v14, %v66_v6 }
  0x14   :  { %v4631_v20 = vor.u32 %v6306_v18, %v4630_v17  ;;  %v6206_v22 = vld [vmem:[#allocation5 + $0xcc] sm:$0xf0]  ;;  %v4358_v23 = vld [vmem:[#allocation5 + $0x1c0] sm:$0xf]  ;;  %891 = vmatpush.bf16.msra.mxu1 %v4375_v15 }
  0x15   :  { %v4231_v25 = vor.u32 %v6206_v22, %v4230_v21  ;;  %v6238_v26 = vld [vmem:[#allocation5 + $0x1cc] sm:$0xf0]  ;;  %v4486_v27 = vld [vmem:[#allocation5 + $0x2c0] sm:$0xf]  ;;  %904 = vmatpush.bf16.msra.mxu2 %v4503_v19  ;;  %v70_v34 = vadd.f32 %v69_v24, %v67_v13 }
  0x16   :  { %v6270_v28 = vld [vmem:[#allocation5 + $0x2cc] sm:$0xf0]  ;;  %917 = vmatpush.bf16.msra.mxu3 %v4631_v20  ;;  %v4359_v29 = vor.u32 %v6238_v26, %v4358_v23  ;;  %v4614_v31 = vld [vmem:[#allocation5 + $0x3c0] sm:$0xf] }
  0x17   :  { %v4487_v30 = vor.u32 %v6270_v28, %v4486_v27  ;;  %v6302_v32 = vld [vmem:[#allocation5 + $0x3cc] sm:$0xf0]  ;;  %v4214_v33 = vld [vmem:[#allocation5 + $0xa0] sm:$0xf]  ;;  %879 = vmatpush.bf16.msra.mxu0 %v4231_v25  ;;  %71 = vadd.xlane.f32.xlu0 %v70_v34 }
  0x18   :  { %v4615_v35 = vor.u32 %v6302_v32, %v4614_v31  ;;  %v6202_v36 = vld [vmem:[#allocation5 + $0xac] sm:$0xf0]  ;;  %v4342_v37 = vld [vmem:[#allocation5 + $0x1a0] sm:$0xf]  ;;  %892 = vmatpush.bf16.msra.mxu1 %v4359_v29 }
  0x19   :  { %v6234_v38 = vld [vmem:[#allocation5 + $0x1ac] sm:$0xf0]  ;;  %v4215_v39 = vor.u32 %v6202_v36, %v4214_v33  ;;  %v4470_v40 = vld [vmem:[#allocation5 + $0x2a0] sm:$0xf]  ;;  %905 = vmatpush.bf16.msra.mxu2 %v4487_v30 }
  0x1a   :  { %v6266_v41 = vld [vmem:[#allocation5 + $0x2ac] sm:$0xf0]  ;;  %v4598_v42 = vld [vmem:[#allocation5 + $0x3a0] sm:$0xf]  ;;  %v4343_v43 = vor.u32 %v6234_v38, %v4342_v37  ;;  %918 = vmatpush.bf16.msra.mxu3 %v4615_v35 }
  0x1b   :  { %v6298_v44 = vld [vmem:[#allocation5 + $0x3ac] sm:$0xf0]  ;;  %v4198_v45 = vld [vmem:[#allocation5 + $0x80] sm:$0xf]  ;;  %v4471_v47 = vor.u32 %v6266_v41, %v4470_v40  ;;  %880 = vmatpush.bf16.msra.mxu0 %v4215_v39  ;;  %v6208_v41 = vld [vmem:[#allocation5 + $0xe4] sm:$0xf] }
  0x1c   :  { %v6198_v46 = vld [vmem:[#allocation5 + $0x8c] sm:$0xf0]  ;;  %v4599_v48 = vor.u32 %v6298_v44, %v4598_v42  ;;  %v4326_v49 = vld [vmem:[#allocation5 + $0x180] sm:$0xf]  ;;  %893 = vmatpush.bf16.msra.mxu1 %v4343_v43  ;;  %v4248_v42 = vld [vmem:[#allocation5 + $0xf0] sm:$0xf0] }
  0x1d   :  { %v6230_v50 = vld [vmem:[#allocation5 + $0x18c] sm:$0xf0]  ;;  %v4454_v51 = vld [vmem:[#allocation5 + $0x280] sm:$0xf]  ;;  %v4199_v55 = vor.u32 %v6198_v46, %v4198_v45  ;;  %906 = vmatpush.bf16.msra.mxu2 %v4471_v47  ;;  %v6240_v45 = vld [vmem:[#allocation5 + $0x1e4] sm:$0xf] }
  0x1e   :  { %v6262_v52 = vld [vmem:[#allocation5 + $0x28c] sm:$0xf0]  ;;  %v4582_v53 = vld [vmem:[#allocation5 + $0x380] sm:$0xf]  ;;  %v4327_v56 = vor.u32 %v6230_v50, %v4326_v49  ;;  %919 = vmatpush.bf16.msra.mxu3 %v4599_v48  ;;  %v4376_v47 = vld [vmem:[#allocation5 + $0x1f0] sm:$0xf0] }
  0x1f   :  { %v6294_v54 = vld [vmem:[#allocation5 + $0x38c] sm:$0xf0]  ;;  %v4182_v57 = vld [vmem:[#allocation5 + $0x60] sm:$0xf]  ;;  %v4455_v59 = vor.u32 %v6262_v52, %v4454_v51  ;;  %881 = vmatpush.bf16.msra.mxu0 %v4199_v55  ;;  %v6272_v48 = vld [vmem:[#allocation5 + $0x2e4] sm:$0xf]  ;;  %v4251_v51 = vor.u32 %v6208_v41, %v4248_v42 }
  0x20   :  { %v6194_v58 = vld [vmem:[#allocation5 + $0x6c] sm:$0xf0]  ;;  %v4583_v60 = vor.u32 %v6294_v54, %v4582_v53  ;;  %v4310_v61 = vld [vmem:[#allocation5 + $0x160] sm:$0xf]  ;;  %894 = vmatpush.bf16.msra.mxu1 %v4327_v56  ;;  %v4504_v49 = vld [vmem:[#allocation5 + $0x2f0] sm:$0xf0]  ;;  %v4379_v56 = vor.u32 %v6240_v45, %v4376_v47 }
  0x21   :  { %v6226_v62 = vld [vmem:[#allocation5 + $0x16c] sm:$0xf0]  ;;  %v4438_v63 = vld [vmem:[#allocation5 + $0x260] sm:$0xf]  ;;  %v4183_v7 = vor.u32 %v6194_v58, %v4182_v57  ;;  %907 = vmatpush.bf16.msra.mxu2 %v4455_v59  ;;  %v6304_v52 = vld [vmem:[#allocation5 + $0x3e4] sm:$0xf]  ;;  %v4507_v57 = vor.u32 %v6272_v48, %v4504_v49 }
  0x22   :  { %v6258_v4 = vld [vmem:[#allocation5 + $0x26c] sm:$0xf0]  ;;  %v4566_v5 = vld [vmem:[#allocation5 + $0x360] sm:$0xf]  ;;  %v4311_v8 = vor.u32 %v6226_v62, %v4310_v61  ;;  %920 = vmatpush.bf16.msra.mxu3 %v4583_v60  ;;  %v4632_v53 = vld [vmem:[#allocation5 + $0x3f0] sm:$0xf0] }
  0x23   :  { %v6290_v6 = vld [vmem:[#allocation5 + $0x36c] sm:$0xf0]  ;;  %v4166_v9 = vld [vmem:[#allocation5 + $0x40] sm:$0xf]  ;;  %v4439_v11 = vor.u32 %v6258_v4, %v4438_v63  ;;  %882 = vmatpush.bf16.msra.mxu0 %v4183_v7  ;;  %v4635_v58 = vor.u32 %v6304_v52, %v4632_v53  ;;  %v6204_v59 = vld [vmem:[#allocation5 + $0xc4] sm:$0xf] }
  0x24   :  { %v6190_v10 = vld [vmem:[#allocation5 + $0x4c] sm:$0xf0]  ;;  %v4567_v12 = vor.u32 %v6290_v6, %v4566_v5  ;;  %v4294_v13 = vld [vmem:[#allocation5 + $0x140] sm:$0xf]  ;;  %895 = vmatpush.bf16.msra.mxu1 %v4311_v8  ;;  %v4232_v60 = vld [vmem:[#allocation5 + $0xd0] sm:$0xf0] }
  0x25   :  { %v6222_v14 = vld [vmem:[#allocation5 + $0x14c] sm:$0xf0]  ;;  %v4422_v15 = vld [vmem:[#allocation5 + $0x240] sm:$0xf]  ;;  %v4167_v19 = vor.u32 %v6190_v10, %v4166_v9  ;;  %908 = vmatpush.bf16.msra.mxu2 %v4439_v11  ;;  %v6236_v61 = vld [vmem:[#allocation5 + $0x1c4] sm:$0xf]  ;;  %v4235_v62 = vor.u32 %v6204_v59, %v4232_v60 }
  0x26   :  { %v6254_v16 = vld [vmem:[#allocation5 + $0x24c] sm:$0xf0]  ;;  %v4550_v17 = vld [vmem:[#allocation5 + $0x340] sm:$0xf]  ;;  %v4295_v20 = vor.u32 %v6222_v14, %v4294_v13  ;;  %921 = vmatpush.bf16.msra.mxu3 %v4567_v12  ;;  %v4360_v63 = vld [vmem:[#allocation5 + $0x1d0] sm:$0xf0] }
  0x27   :  { %v6286_v18 = vld [vmem:[#allocation5 + $0x34c] sm:$0xf0]  ;;  %v4150_v21 = vld [vmem:[#allocation5 + $0x20] sm:$0xf]  ;;  %v4423_v23 = vor.u32 %v6254_v16, %v4422_v15  ;;  %883 = vmatpush.bf16.msra.mxu0 %v4167_v19  ;;  %v6268_v4 = vld [vmem:[#allocation5 + $0x2c4] sm:$0xf]  ;;  %v4363_v6 = vor.u32 %v6236_v61, %v4360_v63 }
  0x28   :  { %v6186_v22 = vld [vmem:[#allocation5 + $0x2c] sm:$0xf0]  ;;  %v4551_v24 = vor.u32 %v6286_v18, %v4550_v17  ;;  %v4278_v25 = vld [vmem:[#allocation5 + $0x120] sm:$0xf]  ;;  %896 = vmatpush.bf16.msra.mxu1 %v4295_v20  ;;  %v4488_v5 = vld [vmem:[#allocation5 + $0x2d0] sm:$0xf0] }
  0x29   :  { %v6218_v26 = vld [vmem:[#allocation5 + $0x12c] sm:$0xf0]  ;;  %v4406_v27 = vld [vmem:[#allocation5 + $0x220] sm:$0xf]  ;;  %v4151_v31 = vor.u32 %v6186_v22, %v4150_v21  ;;  %909 = vmatpush.bf16.msra.mxu2 %v4423_v23  ;;  %v4491_v7 = vor.u32 %v6268_v4, %v4488_v5  ;;  %v6300_v8 = vld [vmem:[#allocation5 + $0x3c4] sm:$0xf] }
  0x2a   :  { %v6250_v28 = vld [vmem:[#allocation5 + $0x22c] sm:$0xf0]  ;;  %v4534_v29 = vld [vmem:[#allocation5 + $0x320] sm:$0xf]  ;;  %v4279_v34 = vor.u32 %v6218_v26, %v4278_v25  ;;  %922 = vmatpush.bf16.msra.mxu3 %v4551_v24  ;;  %v4616_v9 = vld [vmem:[#allocation5 + $0x3d0] sm:$0xf0] }
  0x2b   :  { %v6282_v30 = vld [vmem:[#allocation5 + $0x32c] sm:$0xf0]  ;;  %v4134_v32 = vld [vmem:[#allocation5] sm:$0xf]  ;;  %v4407_v38 = vor.u32 %v6250_v28, %v4406_v27  ;;  %884 = vmatpush.bf16.msra.mxu0 %v4151_v31  ;;  %v4619_v10 = vor.u32 %v6300_v8, %v4616_v9  ;;  %v6200_v11 = vld [vmem:[#allocation5 + $0xa4] sm:$0xf] }
  0x2c   :  { %v6182_v33 = vld [vmem:[#allocation5 + $0xc] sm:$0xf0]  ;;  %v4262_v35 = vld [vmem:[#allocation5 + $0x100] sm:$0xf]  ;;  %v4535_v39 = vor.u32 %v6282_v30, %v4534_v29  ;;  %897 = vmatpush.bf16.msra.mxu1 %v4279_v34  ;;  %v4216_v12 = vld [vmem:[#allocation5 + $0xb0] sm:$0xf0] }
  0x2d   :  { %v6214_v36 = vld [vmem:[#allocation5 + $0x10c] sm:$0xf0]  ;;  %v4390_v37 = vld [vmem:[#allocation5 + $0x200] sm:$0xf]  ;;  %v4135_v46 = vor.u32 %v6182_v33, %v4134_v32  ;;  %910 = vmatpush.bf16.msra.mxu2 %v4407_v38  ;;  %v6232_v13 = vld [vmem:[#allocation5 + $0x1a4] sm:$0xf]  ;;  %v4219_v14 = vor.u32 %v6200_v11, %v4216_v12 }
  0x2e   :  { %v6246_v40 = vld [vmem:[#allocation5 + $0x20c] sm:$0xf0]  ;;  %v4518_v43 = vld [vmem:[#allocation5 + $0x300] sm:$0xf]  ;;  %v4263_v50 = vor.u32 %v6214_v36, %v4262_v35  ;;  %923 = vmatpush.bf16.msra.mxu3 %v4535_v39  ;;  %v4344_v15 = vld [vmem:[#allocation5 + $0x1b0] sm:$0xf0] }
  0x2f   :  { %v6278_v44 = vld [vmem:[#allocation5 + $0x30c] sm:$0xf0]  ;;  %v4391_v54 = vor.u32 %v6246_v40, %v4390_v37  ;;  %885 = vmatpush.bf16.msra.mxu0 %v4135_v46  ;;  %v6264_v16 = vld [vmem:[#allocation5 + $0x2a4] sm:$0xf]  ;;  %v4472_v17 = vld [vmem:[#allocation5 + $0x2b0] sm:$0xf0]  ;;  %v4347_v19 = vor.u32 %v6232_v13, %v4344_v15 }
  0x30   :  { %v4519_v55 = vor.u32 %v6278_v44, %v4518_v43  ;;  %898 = vmatpush.bf16.msra.mxu1 %v4263_v50  ;;  %v6814_v18 = vmov 512.0   ;;  %v4475_v20 = vor.u32 %v6264_v16, %v4472_v17  ;;  %v6296_v21 = vld [vmem:[#allocation5 + $0x3a4] sm:$0xf]  ;;  %v4600_v22 = vld [vmem:[#allocation5 + $0x3b0] sm:$0xf0] }
  0x31   :  { %911 = vmatpush.bf16.msra.mxu2 %v4391_v54  ;;  %6701 = vrcp.f32 %v6814_v18  ;;  %v4603_v23 = vor.u32 %v6296_v21, %v4600_v22  ;;  %v6196_v24 = vld [vmem:[#allocation5 + $0x84] sm:$0xf]  ;;  %v4200_v25 = vld [vmem:[#allocation5 + $0x90] sm:$0xf0] }
  0x32   :  { %924 = vmatpush.bf16.msra.mxu3 %v4519_v55  ;;  %v6228_v26 = vld [vmem:[#allocation5 + $0x184] sm:$0xf]  ;;  %v4203_v27 = vor.u32 %v6196_v24, %v4200_v25  ;;  %v4328_v28 = vld [vmem:[#allocation5 + $0x190] sm:$0xf0] }
  0x33   :  { %930 = vmatpush.bf16.msrb.mxu0 %v4251_v51  ;;  %v6260_v29 = vld [vmem:[#allocation5 + $0x284] sm:$0xf]  ;;  %v4456_v30 = vld [vmem:[#allocation5 + $0x290] sm:$0xf0]  ;;  %v4331_v31 = vor.u32 %v6228_v26, %v4328_v28 }
  0x34   :  { %943 = vmatpush.bf16.msrb.mxu1 %v4379_v56  ;;  %v4459_v32 = vor.u32 %v6260_v29, %v4456_v30  ;;  %v6292_v33 = vld [vmem:[#allocation5 + $0x384] sm:$0xf]  ;;  %v4584_v34 = vld [vmem:[#allocation5 + $0x390] sm:$0xf0] }
  0x35   :  { %956 = vmatpush.bf16.msrb.mxu2 %v4507_v57  ;;  %v4587_v35 = vor.u32 %v6292_v33, %v4584_v34  ;;  %v6192_v37 = vld [vmem:[#allocation5 + $0x64] sm:$0xf]  ;;  %v4184_v38 = vld [vmem:[#allocation5 + $0x70] sm:$0xf0] }
  0x36   :  { %969 = vmatpush.bf16.msrb.mxu3 %v4635_v58  ;;  %v6224_v39 = vld [vmem:[#allocation5 + $0x164] sm:$0xf]  ;;  %v4187_v40 = vor.u32 %v6192_v37, %v4184_v38  ;;  %v4312_v41 = vld [vmem:[#allocation5 + $0x170] sm:$0xf0] }
  0x37   :  { %931 = vmatpush.bf16.msrb.mxu0 %v4235_v62  ;;  %v6861_v36 = vpop.eup %6701  ;;  %v6256_v42 = vld [vmem:[#allocation5 + $0x264] sm:$0xf]  ;;  %v4440_v43 = vld [vmem:[#allocation5 + $0x270] sm:$0xf0]  ;;  %v4315_v44 = vor.u32 %v6224_v39, %v4312_v41  ;;  %v6211_v41 = vld [vmem:[#allocation5 + $0xf4] sm:$0xf0] }
  0x38   :  { %944 = vmatpush.bf16.msrb.mxu1 %v4363_v6  ;;  %v4443_v45 = vor.u32 %v6256_v42, %v4440_v43  ;;  %v6288_v46 = vld [vmem:[#allocation5 + $0x364] sm:$0xf]  ;;  %v4568_v47 = vld [vmem:[#allocation5 + $0x370] sm:$0xf0]  ;;  %v74_v48 = vmul.f32 512.0, %v6861_v36  ;;  %vm78_vm0 = vweird.f32 %v6861_v36 }
  0x39   :  { %957 = vmatpush.bf16.msrb.mxu2 %v4491_v7  ;;  %v4571_v49 = vor.u32 %v6288_v46, %v4568_v47  ;;  %v6188_v50 = vld [vmem:[#allocation5 + $0x44] sm:$0xf]  ;;  %v4168_v51 = vld [vmem:[#allocation5 + $0x50] sm:$0xf0]  ;;  %v4382_v42 = vld [vmem:[#allocation5 + $0x1e8] sm:$0xf] }
  0x3a   :  { %970 = vmatpush.bf16.msrb.mxu3 %v4619_v10  ;;  %v6220_v52 = vld [vmem:[#allocation5 + $0x144] sm:$0xf]  ;;  %v4171_v53 = vor.u32 %v6188_v50, %v4168_v51  ;;  %v4296_v54 = vld [vmem:[#allocation5 + $0x150] sm:$0xf0]  ;;  %v75_v61 = vsub.f32 1.0, %v74_v48 }
  0x3b   :  { %932 = vmatpush.bf16.msrb.mxu0 %v4219_v14  ;;  %v6252_v55 = vld [vmem:[#allocation5 + $0x244] sm:$0xf]  ;;  %v4424_v56 = vld [vmem:[#allocation5 + $0x250] sm:$0xf0]  ;;  %v4299_v57 = vor.u32 %v6220_v52, %v4296_v54  ;;  %v6243_v43 = vld [vmem:[#allocation5 + $0x1f4] sm:$0xf0] }
  0x3c   :  { %945 = vmatpush.bf16.msrb.mxu1 %v4347_v19  ;;  %v4427_v58 = vor.u32 %v6252_v55, %v4424_v56  ;;  %v6284_v59 = vld [vmem:[#allocation5 + $0x344] sm:$0xf]  ;;  %v4552_v60 = vld [vmem:[#allocation5 + $0x350] sm:$0xf0]  ;;  %v76_v14 = vmul.f32 %v6861_v36, %v75_v61  ;;  %v4638_v50 = vld [vmem:[#allocation5 + $0x3e8] sm:$0xf] }
  0x3d   :  { %958 = vmatpush.bf16.msrb.mxu2 %v4475_v20  ;;  %v4555_v62 = vor.u32 %v6284_v59, %v4552_v60  ;;  %v6184_v63 = vld [vmem:[#allocation5 + $0x24] sm:$0xf]  ;;  %v4152_v4 = vld [vmem:[#allocation5 + $0x30] sm:$0xf0]  ;;  %v6307_v51 = vld [vmem:[#allocation5 + $0x3f4] sm:$0xf0] }
  0x3e   :  { %971 = vmatpush.bf16.msrb.mxu3 %v4603_v23  ;;  %v6216_v5 = vld [vmem:[#allocation5 + $0x124] sm:$0xf]  ;;  %v4155_v6 = vor.u32 %v6184_v63, %v4152_v4  ;;  %v4280_v7 = vld [vmem:[#allocation5 + $0x130] sm:$0xf0]  ;;  %v77_v28 = vadd.f32 %v6861_v36, %v76_v14  ;;  %v4639_v59 = vor.u32 %v6307_v51, %v4638_v50  ;;  %v6239_v60 = vld [vmem:[#allocation5 + $0x1d4] sm:$0xf0] }
  0x3f   :  { %933 = vmatpush.bf16.msrb.mxu0 %v4203_v27  ;;  %v6248_v8 = vld [vmem:[#allocation5 + $0x224] sm:$0xf]  ;;  %v4408_v9 = vld [vmem:[#allocation5 + $0x230] sm:$0xf0]  ;;  %v4283_v10 = vor.u32 %v6216_v5, %v4280_v7  ;;  %v6271_v61 = vld [vmem:[#allocation5 + $0x2d4] sm:$0xf0] }
  0x40   :  { %946 = vmatpush.bf16.msrb.mxu1 %v4331_v31  ;;  %v4411_v11 = vor.u32 %v6248_v8, %v4408_v9  ;;  %v6280_v12 = vld [vmem:[#allocation5 + $0x324] sm:$0xf]  ;;  %v4536_v13 = vld [vmem:[#allocation5 + $0x330] sm:$0xf0]  ;;  %v79_v29 = vsel %vm78_vm0, %v6861_v36, %v77_v28  ;;  %v6303_v63 = vld [vmem:[#allocation5 + $0x3d4] sm:$0xf0] }
  0x41   :  { %959 = vmatpush.bf16.msrb.mxu2 %v4459_v32  ;;  %v4539_v15 = vor.u32 %v6280_v12, %v4536_v13  ;;  %v6180_v16 = vld [vmem:[#allocation5 + $0x4] sm:$0xf]  ;;  %v4136_v17 = vld [vmem:[#allocation5 + $0x10] sm:$0xf0]  ;;  %v6203_v7 = vld [vmem:[#allocation5 + $0xb4] sm:$0xf0] }
  0x42   :  { %972 = vmatpush.bf16.msrb.mxu3 %v4587_v35  ;;  %v6212_v18 = vld [vmem:[#allocation5 + $0x104] sm:$0xf]  ;;  %v4139_v19 = vor.u32 %v6180_v16, %v4136_v17  ;;  %v4264_v20 = vld [vmem:[#allocation5 + $0x110] sm:$0xf0]  ;;  %v4478_v12 = vld [vmem:[#allocation5 + $0x2a8] sm:$0xf] }
  0x43   :  { %934 = vmatpush.bf16.msrb.mxu0 %v4187_v40  ;;  %v6244_v21 = vld [vmem:[#allocation5 + $0x204] sm:$0xf]  ;;  %v4392_v22 = vld [vmem:[#allocation5 + $0x210] sm:$0xf0]  ;;  %v4267_v23 = vor.u32 %v6212_v18, %v4264_v20  ;;  %v4254_v40 = vld [vmem:[#allocation5 + $0xe8] sm:$0xf] }
  0x44   :  { %947 = vmatpush.bf16.msrb.mxu1 %v4315_v44  ;;  %v4395_v24 = vor.u32 %v6244_v21, %v4392_v22  ;;  %v6276_v25 = vld [vmem:[#allocation5 + $0x304] sm:$0xf]  ;;  %v4520_v26 = vld [vmem:[#allocation5 + $0x310] sm:$0xf0]  ;;  %v4255_v52 = vor.u32 %v6211_v41, %v4254_v40  ;;  %v6267_v13 = vld [vmem:[#allocation5 + $0x2b4] sm:$0xf0] }
  0x45   :  { %960 = vmatpush.bf16.msrb.mxu2 %v4443_v45  ;;  %v4523_v27 = vor.u32 %v6276_v25, %v4520_v26  ;;  %v4510_v45 = vld [vmem:[#allocation5 + $0x2e8] sm:$0xf]  ;;  %v4479_v20 = vor.u32 %v6267_v13, %v4478_v12  ;;  %v6263_v25 = vld [vmem:[#allocation5 + $0x294] sm:$0xf0] }
  0x46   :  { %973 = vmatpush.bf16.msrb.mxu3 %v4571_v49  ;;  %v6275_v49 = vld [vmem:[#allocation5 + $0x2f4] sm:$0xf0]  ;;  %v4606_v14 = vld [vmem:[#allocation5 + $0x3a8] sm:$0xf] }
  0x47   :  { %935 = vmatpush.bf16.msrb.mxu0 %v4171_v53  ;;  %v4383_v53 = vor.u32 %v6243_v43, %v4382_v42  ;;  %v4206_v18 = vld [vmem:[#allocation5 + $0x88] sm:$0xf]  ;;  %v6291_v40 = vld [vmem:[#allocation5 + $0x374] sm:$0xf0] }
  0x48   :  { %948 = vmatpush.bf16.msrb.mxu1 %v4299_v57  ;;  %v4334_v22 = vld [vmem:[#allocation5 + $0x188] sm:$0xf]  ;;  %v6287_v51 = vld [vmem:[#allocation5 + $0x354] sm:$0xf0] }
  0x49   :  { %961 = vmatpush.bf16.msrb.mxu2 %v4427_v58  ;;  %v6207_v58 = vld [vmem:[#allocation5 + $0xd4] sm:$0xf0]  ;;  %v4590_v26 = vld [vmem:[#allocation5 + $0x388] sm:$0xf] }
  0x4a   :  { %974 = vmatpush.bf16.msrb.mxu3 %v4555_v62  ;;  %v4622_v62 = vld [vmem:[#allocation5 + $0x3c8] sm:$0xf]  ;;  %v6247_v13 = vld [vmem:[#allocation5 + $0x214] sm:$0xf0] }
  0x4b   :  { %936 = vmatpush.bf16.msrb.mxu0 %v4155_v6  ;;  %v4222_v6 = vld [vmem:[#allocation5 + $0xa8] sm:$0xf]  ;;  %v4623_v9 = vor.u32 %v6303_v63, %v4622_v62  ;;  %v6283_v63 = vld [vmem:[#allocation5 + $0x334] sm:$0xf0] }
  0x4c   :  { %949 = vmatpush.bf16.msrb.mxu1 %v4283_v10  ;;  %v4350_v10 = vld [vmem:[#allocation5 + $0x1a8] sm:$0xf]  ;;  %v4223_v16 = vor.u32 %v6203_v7, %v4222_v6  ;;  %v6183_v7 = vld [vmem:[#allocation5 + $0x14] sm:$0xf0] }
  0x4d   :  { %962 = vmatpush.bf16.msrb.mxu2 %v4411_v11  ;;  %v6235_v11 = vld [vmem:[#allocation5 + $0x1b4] sm:$0xf0]  ;;  %v4174_v43 = vld [vmem:[#allocation5 + $0x48] sm:$0xf] }
  0x4e   :  { %975 = vmatpush.bf16.msrb.mxu3 %v4539_v15  ;;  %v6299_v15 = vld [vmem:[#allocation5 + $0x3b4] sm:$0xf0]  ;;  %v4351_v17 = vor.u32 %v6235_v11, %v4350_v10  ;;  %v4558_v50 = vld [vmem:[#allocation5 + $0x348] sm:$0xf] }
  0x4f   :  { %937 = vmatpush.bf16.msrb.mxu0 %v4139_v19  ;;  %v6199_v19 = vld [vmem:[#allocation5 + $0x94] sm:$0xf0]  ;;  %v4607_v21 = vor.u32 %v6299_v15, %v4606_v14  ;;  %v4542_v62 = vld [vmem:[#allocation5 + $0x328] sm:$0xf] }
  0x50   :  { %950 = vmatpush.bf16.msrb.mxu1 %v4267_v23  ;;  %v6231_v23 = vld [vmem:[#allocation5 + $0x194] sm:$0xf0]  ;;  %v4207_v28 = vor.u32 %v6199_v19, %v4206_v18  ;;  %v4543_v11 = vor.u32 %v6283_v63, %v4542_v62  ;;  %v4398_v12 = vld [vmem:[#allocation5 + $0x208] sm:$0xf]  ;;  %v6241_v18 = vld [vmem:[#allocation5 + $0x1ec] sm:$0xf] }
  0x51   :  { %963 = vmatpush.bf16.msrb.mxu2 %v4395_v24  ;;  %v4462_v24 = vld [vmem:[#allocation5 + $0x288] sm:$0xf]  ;;  %v6279_v15 = vld [vmem:[#allocation5 + $0x314] sm:$0xf0]  ;;  %v4384_v19 = vld [vmem:[#allocation5 + $0x1f8] sm:$0xf0] }
  0x52   :  { %976 = vmatpush.bf16.msrb.mxu3 %v4523_v27  ;;  %v6295_v27 = vld [vmem:[#allocation5 + $0x394] sm:$0xf0]  ;;  %v4526_v14 = vld [vmem:[#allocation5 + $0x308] sm:$0xf]  ;;  %v6293_v62 = vld [vmem:[#allocation5 + $0x38c] sm:$0xf] }
  0x53   :  { %v4592_v63 = vld [vmem:[#allocation5 + $0x398] sm:$0xf0] }
  0x8a   :  { %v72_v30 = vpop.xlane.xlu0 %71 }
  0x8b   :  { %v80_v31 = vmul.f32 %v79_v29, %v72_v30  ;;  %v4335_v29 = vor.u32 %v6231_v23, %v4334_v22  ;;  %v4190_v30 = vld [vmem:[#allocation5 + $0x68] sm:$0xf]  ;;  %v4512_v23 = vld [vmem:[#allocation5 + $0x2f8] sm:$0xf0] }
  0x8d   :  { %v81_v32 = vadd.f32 1e-08, %v80_v31  ;;  %v6195_v31 = vld [vmem:[#allocation5 + $0x74] sm:$0xf0] }
  0x8e   :  { %v4191_v41 = vor.u32 %v6195_v31, %v4190_v30  ;;  %v6205_v30 = vld [vmem:[#allocation5 + $0xcc] sm:$0xf]  ;;  %v4240_v31 = vld [vmem:[#allocation5 + $0xd8] sm:$0xf0] }
  0x8f   :  { %6703 = vrsqrt.f32 %v81_v32  ;;  %vm88_vm2 = vweird.f32 %v81_v32 }
  0x95   :  { %v6704_v33 = vpop.eup %6703 }
  0x96   :  { %v83_v34 = vmul.f32 %v6704_v33, %v81_v32  ;;  %vm89_vm1 = vweird.f32 %v6704_v33  ;;  %v4463_v32 = vor.u32 %v6263_v25, %v4462_v24  ;;  %v6305_v24 = vld [vmem:[#allocation5 + $0x3ec] sm:$0xf]  ;;  %v4640_v25 = vld [vmem:[#allocation5 + $0x3f8] sm:$0xf0] }
  0x97   :  { %vm90_vm3 = vmor %vm88_vm2, %vm89_vm1 }
  0x98   :  { %v84_v35 = vmul.f32 %v6704_v33, %v83_v34  ;;  %v4318_v34 = vld [vmem:[#allocation5 + $0x168] sm:$0xf] }
  0x9a   :  { %v85_v37 = vmul.f32 0.5, %v84_v35  ;;  %v6227_v35 = vld [vmem:[#allocation5 + $0x174] sm:$0xf0] }
  0x9b   :  { %v4319_v42 = vor.u32 %v6227_v35, %v4318_v34  ;;  %v6237_v34 = vld [vmem:[#allocation5 + $0x1cc] sm:$0xf]  ;;  %v4368_v35 = vld [vmem:[#allocation5 + $0x1d8] sm:$0xf0] }
  0x9c   :  { %v86_v38 = vsub.f32 1.5, %v85_v37  ;;  %v4446_v37 = vld [vmem:[#allocation5 + $0x268] sm:$0xf] }
  0x9e   :  { %v87_v39 = vmul.f32 %v6704_v33, %v86_v38  ;;  %v6259_v38 = vld [vmem:[#allocation5 + $0x274] sm:$0xf0] }
  0xa0   :  { %v91_v44 = vsel %vm90_vm3, %v6704_v33, %v87_v39  ;;  %v4591_v33 = vor.u32 %v6295_v27, %v4590_v26  ;;  %v4574_v39 = vld [vmem:[#allocation5 + $0x368] sm:$0xf]  ;;  %v4399_v26 = vor.u32 %v6247_v13, %v4398_v12  ;;  %v4527_v27 = vor.u32 %v6279_v15, %v4526_v14  ;;  %v6257_v12 = vld [vmem:[#allocation5 + $0x26c] sm:$0xf]  ;;  %v4448_v13 = vld [vmem:[#allocation5 + $0x278] sm:$0xf0] }
  0xa1   :  { %v92_v36 = vmul.f32 %v91_v44, %v6845_v0  ;;  %v93_v46 = vmul.f32 %v91_v44, %v6847_v1  ;;  %v94_v47 = vmul.f32 %v91_v44, %v6849_v2  ;;  %v95_v48 = vmul.f32 %v91_v44, %v6851_v3  ;;  %v4238_v0 = vld [vmem:[#allocation5 + $0xc8] sm:$0xf]  ;;  %v6191_v44 = vld [vmem:[#allocation5 + $0x54] sm:$0xf0]  ;;  %v6289_v14 = vld [vmem:[#allocation5 + $0x36c] sm:$0xf] }
  0xa2   :  { %v4511_v1 = vor.u32 %v6275_v49, %v4510_v45  ;;  %v4366_v2 = vld [vmem:[#allocation5 + $0x1c8] sm:$0xf]  ;;  %v4239_v4 = vor.u32 %v6207_v58, %v4238_v0  ;;  %v4447_v45 = vor.u32 %v6259_v38, %v4446_v37  ;;  %v6255_v49 = vld [vmem:[#allocation5 + $0x254] sm:$0xf0]  ;;  %v6269_v37 = vld [vmem:[#allocation5 + $0x2cc] sm:$0xf] }
  0xa3   :  { %v6872_v54 = vpack.c.bf16 %v92_v36, %v92_v36  ;;  %v6874_v55 = vpack.c.bf16 %v93_v46, %v93_v46  ;;  %v6876_v56 = vpack.c.bf16 %v94_v47, %v94_v47  ;;  %v6878_v57 = vpack.c.bf16 %v95_v48, %v95_v48  ;;  %v4494_v3 = vld [vmem:[#allocation5 + $0x2c8] sm:$0xf]  ;;  %v6223_v47 = vld [vmem:[#allocation5 + $0x154] sm:$0xf0]  ;;  %v4496_v38 = vld [vmem:[#allocation5 + $0x2d8] sm:$0xf0] }
  0xa4   :  { %v4367_v5 = vor.u32 %v6239_v60, %v4366_v2  ;;  %v4495_v8 = vor.u32 %v6271_v61, %v4494_v3  ;;  %v4575_v36 = vor.u32 %v6291_v40, %v4574_v39  ;;  %v4302_v46 = vld [vmem:[#allocation5 + $0x148] sm:$0xf]  ;;  %v6187_v58 = vld [vmem:[#allocation5 + $0x34] sm:$0xf0]  ;;  %v6301_v39 = vld [vmem:[#allocation5 + $0x3cc] sm:$0xf] }
  0xa5   :  { %886 = vmatmul.bf16.vlgmr.msra.gmra.mxu0 %v6872_v54  ;;  %899 = vmatmul.bf16.vlgmr.msra.gmra.mxu1 %v6874_v55  ;;  %v4430_v48 = vld [vmem:[#allocation5 + $0x248] sm:$0xf]  ;;  %v6219_v60 = vld [vmem:[#allocation5 + $0x134] sm:$0xf0]  ;;  %v4624_v40 = vld [vmem:[#allocation5 + $0x3d8] sm:$0xf0] }
  0xa6   :  { %912 = vmatmul.bf16.vlgmr.msra.gmra.mxu2 %v6876_v56  ;;  %925 = vmatmul.bf16.vlgmr.msra.gmra.mxu3 %v6878_v57  ;;  %v4158_v0 = vld [vmem:[#allocation5 + $0x28] sm:$0xf]  ;;  %v6251_v61 = vld [vmem:[#allocation5 + $0x234] sm:$0xf0]  ;;  %v4576_v15 = vld [vmem:[#allocation5 + $0x378] sm:$0xf0] }
  0xa7   :  { %982 = vmatpush.bf16.msra.mxu0 %v4255_v52  ;;  %995 = vmatpush.bf16.msra.mxu1 %v4383_v53  ;;  %v4175_v52 = vor.u32 %v6191_v44, %v4174_v43  ;;  %v4303_v53 = vor.u32 %v6223_v47, %v4302_v46  ;;  %v4286_v2 = vld [vmem:[#allocation5 + $0x128] sm:$0xf]  ;;  %v6201_v43 = vld [vmem:[#allocation5 + $0xac] sm:$0xf]  ;;  %v4224_v44 = vld [vmem:[#allocation5 + $0xb8] sm:$0xf0] }
  0xa8   :  { %1008 = vmatpush.bf16.msra.mxu2 %v4511_v1  ;;  %1021 = vmatpush.bf16.msra.mxu3 %v4639_v59  ;;  %v4431_v1 = vor.u32 %v6255_v49, %v4430_v48  ;;  %v4559_v59 = vor.u32 %v6287_v51, %v4558_v50  ;;  %v4414_v3 = vld [vmem:[#allocation5 + $0x228] sm:$0xf]  ;;  %v4287_v6 = vor.u32 %v6219_v60, %v4286_v2  ;;  %v6233_v46 = vld [vmem:[#allocation5 + $0x1ac] sm:$0xf]  ;;  %v4352_v47 = vld [vmem:[#allocation5 + $0x1b8] sm:$0xf0] }
  0xa9   :  { %v4415_v10 = vor.u32 %v6251_v61, %v4414_v3  ;;  %v6265_v48 = vld [vmem:[#allocation5 + $0x2ac] sm:$0xf]  ;;  %v4480_v49 = vld [vmem:[#allocation5 + $0x2b8] sm:$0xf0] }
  0xaa   :  { %v6297_v50 = vld [vmem:[#allocation5 + $0x3ac] sm:$0xf]  ;;  %v4608_v51 = vld [vmem:[#allocation5 + $0x3b8] sm:$0xf0] }
  0xab   :  { %983 = vmatpush.bf16.msra.mxu0 %v4239_v4  ;;  %996 = vmatpush.bf16.msra.mxu1 %v4367_v5  ;;  %v4142_v4 = vld [vmem:[#allocation5 + $0x8] sm:$0xf]  ;;  %v4159_v5 = vor.u32 %v6187_v58, %v4158_v0  ;;  %v6197_v0 = vld [vmem:[#allocation5 + $0x8c] sm:$0xf]  ;;  %v4208_v58 = vld [vmem:[#allocation5 + $0x98] sm:$0xf0] }
  0xac   :  { %1009 = vmatpush.bf16.msra.mxu2 %v4495_v8  ;;  %1022 = vmatpush.bf16.msra.mxu3 %v4623_v9  ;;  %v4270_v8 = vld [vmem:[#allocation5 + $0x108] sm:$0xf]  ;;  %v6215_v9 = vld [vmem:[#allocation5 + $0x114] sm:$0xf0]  ;;  %v6229_v2 = vld [vmem:[#allocation5 + $0x18c] sm:$0xf] }
  0xad   :  { %v4271_v22 = vor.u32 %v6215_v9, %v4270_v8  ;;  %v4336_v60 = vld [vmem:[#allocation5 + $0x198] sm:$0xf0]  ;;  %v6261_v3 = vld [vmem:[#allocation5 + $0x28c] sm:$0xf]  ;;  %v4595_v9 = vor.u32 %v6293_v62, %v4592_v63  ;;  %v6334_v63 = vld [vmem:[#allocation5 + $0x4cc] sm:$0xf0] }
  0xae   :  { %v4464_v61 = vld [vmem:[#allocation5 + $0x298] sm:$0xf0] }
  0xaf   :  { %984 = vmatpush.bf16.msra.mxu0 %v4223_v16  ;;  %997 = vmatpush.bf16.msra.mxu1 %v4351_v17  ;;  %v6209_v16 = vld [vmem:[#allocation5 + $0xec] sm:$0xf]  ;;  %v4256_v17 = vld [vmem:[#allocation5 + $0xf8] sm:$0xf0]  ;;  %v4467_v8 = vor.u32 %v6261_v3, %v4464_v61  ;;  %v4742_v61 = vld [vmem:[#allocation5 + $0x4c0] sm:$0xf] }
  0xb0   :  { %1010 = vmatpush.bf16.msra.mxu2 %v4479_v20  ;;  %1023 = vmatpush.bf16.msra.mxu3 %v4607_v21  ;;  %v6273_v20 = vld [vmem:[#allocation5 + $0x2ec] sm:$0xf]  ;;  %v4143_v21 = vor.u32 %v6183_v7, %v4142_v4  ;;  %v4211_v4 = vor.u32 %v6197_v0, %v4208_v58  ;;  %v4192_v7 = vld [vmem:[#allocation5 + $0x78] sm:$0xf0]  ;;  %v4886_v0 = vld [vmem:[#allocation5 + $0x5e0] sm:$0xf] }
  0xb1   :  { %v6370_v58 = vld [vmem:[#allocation5 + $0x5ec] sm:$0xf0] }
  0xb2   :  { %v4887_v62 = vor.u32 %v6370_v58, %v4886_v0  ;;  %v6324_v58 = vld [vmem:[#allocation5 + $0x484] sm:$0xf] }
  0xb3   :  { %985 = vmatpush.bf16.msra.mxu0 %v4207_v28  ;;  %998 = vmatpush.bf16.msra.mxu1 %v4335_v29  ;;  %v4259_v28 = vor.u32 %v6209_v16, %v4256_v17  ;;  %v4387_v29 = vor.u32 %v6241_v18, %v4384_v19  ;;  %v6189_v18 = vld [vmem:[#allocation5 + $0x4c] sm:$0xf]  ;;  %v4176_v19 = vld [vmem:[#allocation5 + $0x58] sm:$0xf0] }
  0xb4   :  { %1011 = vmatpush.bf16.msra.mxu2 %v4463_v32  ;;  %1024 = vmatpush.bf16.msra.mxu3 %v4591_v33  ;;  %v4515_v32 = vor.u32 %v6273_v20, %v4512_v23  ;;  %v4643_v33 = vor.u32 %v6305_v24, %v4640_v25  ;;  %v4451_v20 = vor.u32 %v6257_v12, %v4448_v13  ;;  %v4304_v23 = vld [vmem:[#allocation5 + $0x158] sm:$0xf0]  ;;  %v6253_v24 = vld [vmem:[#allocation5 + $0x24c] sm:$0xf]  ;;  %v4854_v13 = vld [vmem:[#allocation5 + $0x5a0] sm:$0xf] }
  0xb5   :  { %938 = vmatmul.bf16.vlgmr.msrb.gmra.mxu0 %v6872_v54  ;;  %951 = vmatmul.bf16.vlgmr.msrb.gmra.mxu1 %v6874_v55  ;;  %v4432_v25 = vld [vmem:[#allocation5 + $0x258] sm:$0xf0] }
  0xb6   :  { %964 = vmatmul.bf16.vlgmr.msrb.gmra.mxu2 %v6876_v56  ;;  %977 = vmatmul.bf16.vlgmr.msrb.gmra.mxu3 %v6878_v57 }
  0xb7   :  { %986 = vmatpush.bf16.msra.mxu0 %v4191_v41  ;;  %999 = vmatpush.bf16.msra.mxu1 %v4319_v42  ;;  %v4243_v41 = vor.u32 %v6205_v30, %v4240_v31  ;;  %v4371_v42 = vor.u32 %v6237_v34, %v4368_v35  ;;  %v6185_v30 = vld [vmem:[#allocation5 + $0x2c] sm:$0xf]  ;;  %v4160_v31 = vld [vmem:[#allocation5 + $0x38] sm:$0xf0] }
  0xb8   :  { %1012 = vmatpush.bf16.msra.mxu2 %v4447_v45  ;;  %1025 = vmatpush.bf16.msra.mxu3 %v4575_v36  ;;  %v4499_v45 = vor.u32 %v6269_v37, %v4496_v38  ;;  %v4627_v36 = vor.u32 %v6301_v39, %v4624_v40  ;;  %v6217_v34 = vld [vmem:[#allocation5 + $0x12c] sm:$0xf]  ;;  %v4288_v35 = vld [vmem:[#allocation5 + $0x138] sm:$0xf0] }
  0xb9   :  { %v6249_v37 = vld [vmem:[#allocation5 + $0x22c] sm:$0xf]  ;;  %v4416_v38 = vld [vmem:[#allocation5 + $0x238] sm:$0xf0] }
  0xba   :  { %v6281_v39 = vld [vmem:[#allocation5 + $0x32c] sm:$0xf]  ;;  %v4544_v40 = vld [vmem:[#allocation5 + $0x338] sm:$0xf0] }
  0xbb   :  { %987 = vmatpush.bf16.msra.mxu0 %v4175_v52  ;;  %1000 = vmatpush.bf16.msra.mxu1 %v4303_v53  ;;  %v4227_v52 = vor.u32 %v6201_v43, %v4224_v44  ;;  %v4355_v53 = vor.u32 %v6233_v46, %v4352_v47  ;;  %v6181_v43 = vld [vmem:[#allocation5 + $0xc] sm:$0xf]  ;;  %v4144_v44 = vld [vmem:[#allocation5 + $0x18] sm:$0xf0]  ;;  %v4547_v46 = vor.u32 %v6281_v39, %v4544_v40  ;;  %v6314_v39 = vld [vmem:[#allocation5 + $0x42c] sm:$0xf0] }
  0xbc   :  { %1013 = vmatpush.bf16.msra.mxu2 %v4431_v1  ;;  %1026 = vmatpush.bf16.msra.mxu3 %v4559_v59  ;;  %v4483_v1 = vor.u32 %v6265_v48, %v4480_v49  ;;  %v4611_v59 = vor.u32 %v6297_v50, %v4608_v51  ;;  %v4272_v47 = vld [vmem:[#allocation5 + $0x118] sm:$0xf0]  ;;  %v6245_v48 = vld [vmem:[#allocation5 + $0x20c] sm:$0xf]  ;;  %v4790_v40 = vld [vmem:[#allocation5 + $0x520] sm:$0xf] }
  0xbd   :  { %v4400_v49 = vld [vmem:[#allocation5 + $0x218] sm:$0xf0]  ;;  %v6277_v50 = vld [vmem:[#allocation5 + $0x30c] sm:$0xf] }
  0xbe   :  { %v4528_v51 = vld [vmem:[#allocation5 + $0x318] sm:$0xf0] }
  0xbf   :  { %988 = vmatpush.bf16.msra.mxu0 %v4159_v5  ;;  %1001 = vmatpush.bf16.msra.mxu1 %v4287_v6  ;;  %v4339_v5 = vor.u32 %v6229_v2, %v4336_v60  ;;  %v6193_v6 = vld [vmem:[#allocation5 + $0x6c] sm:$0xf]  ;;  %v4403_v2 = vor.u32 %v6245_v48, %v4400_v49  ;;  %v4531_v60 = vor.u32 %v6277_v50, %v4528_v51  ;;  %v6332_v49 = vld [vmem:[#allocation5 + $0x4c4] sm:$0xf]  ;;  %v4744_v50 = vld [vmem:[#allocation5 + $0x4d0] sm:$0xf0] }
  0xc0   :  { %1014 = vmatpush.bf16.msra.mxu2 %v4415_v10  ;;  %1027 = vmatpush.bf16.msra.mxu3 %v4543_v11  ;;  %v6225_v10 = vld [vmem:[#allocation5 + $0x16c] sm:$0xf]  ;;  %v4320_v11 = vld [vmem:[#allocation5 + $0x178] sm:$0xf0]  ;;  %v4195_v16 = vor.u32 %v6193_v6, %v4192_v7  ;;  %v5014_v6 = vld [vmem:[#allocation5 + $0x6e0] sm:$0xf]  ;;  %v4747_v51 = vor.u32 %v6332_v49, %v4744_v50 }
  0xc1   :  { %v4323_v17 = vor.u32 %v6225_v10, %v4320_v11  ;;  %v6402_v7 = vld [vmem:[#allocation5 + $0x6ec] sm:$0xf0]  ;;  %v4726_v10 = vld [vmem:[#allocation5 + $0x4a0] sm:$0xf]  ;;  %v4808_v49 = vld [vmem:[#allocation5 + $0x550] sm:$0xf0] }
  0xc2   :  { %v6330_v11 = vld [vmem:[#allocation5 + $0x4ac] sm:$0xf0]  ;;  %v6396_v50 = vld [vmem:[#allocation5 + $0x6c4] sm:$0xf] }
  0xc3   :  { %989 = vmatpush.bf16.msra.mxu0 %v4143_v21  ;;  %1002 = vmatpush.bf16.msra.mxu1 %v4271_v22  ;;  %v4579_v21 = vor.u32 %v6289_v14, %v4576_v15  ;;  %v6221_v22 = vld [vmem:[#allocation5 + $0x14c] sm:$0xf]  ;;  %v6362_v14 = vld [vmem:[#allocation5 + $0x5ac] sm:$0xf0]  ;;  %v4998_v15 = vld [vmem:[#allocation5 + $0x6c0] sm:$0xf] }
  0xc4   :  { %1015 = vmatpush.bf16.msra.mxu2 %v4399_v26  ;;  %1028 = vmatpush.bf16.msra.mxu3 %v4527_v27  ;;  %v6285_v26 = vld [vmem:[#allocation5 + $0x34c] sm:$0xf]  ;;  %v4560_v27 = vld [vmem:[#allocation5 + $0x358] sm:$0xf0] }
  0xc6   :  { %990 = vmatmul.bf16.vlgmr.msra.gmra.mxu0 %v6872_v54  ;;  %1003 = vmatmul.bf16.vlgmr.msra.gmra.mxu1 %v6874_v55 }
  0xc7   :  { %1034 = vmatpush.bf16.msrb.mxu0 %v4259_v28  ;;  %1047 = vmatpush.bf16.msrb.mxu1 %v4387_v29  ;;  %v4179_v28 = vor.u32 %v6189_v18, %v4176_v19  ;;  %v4307_v29 = vor.u32 %v6221_v22, %v4304_v23  ;;  %v4727_v18 = vor.u32 %v6330_v11, %v4726_v10  ;;  %v4710_v19 = vld [vmem:[#allocation5 + $0x480] sm:$0xf]  ;;  %v6386_v10 = vld [vmem:[#allocation5 + $0x66c] sm:$0xf0] }
  0xc8   :  { %1060 = vmatpush.bf16.msrb.mxu2 %v4515_v32  ;;  %1073 = vmatpush.bf16.msrb.mxu3 %v4643_v33  ;;  %v4435_v32 = vor.u32 %v6253_v24, %v4432_v25  ;;  %v4563_v33 = vor.u32 %v6285_v26, %v4560_v27  ;;  %v4838_v22 = vld [vmem:[#allocation5 + $0x580] sm:$0xf]  ;;  %v6322_v26 = vld [vmem:[#allocation5 + $0x46c] sm:$0xf0] }
  0xc9   :  { %1016 = vmatmul.bf16.vlgmr.msra.gmra.mxu2 %v6876_v56  ;;  %1029 = vmatmul.bf16.vlgmr.msra.gmra.mxu3 %v6878_v57  ;;  %v4982_v23 = vld [vmem:[#allocation5 + $0x6a0] sm:$0xf] }
  0xca   :  { %v4822_v27 = vld [vmem:[#allocation5 + $0x560] sm:$0xf] }
  0xcb   :  { %1035 = vmatpush.bf16.msrb.mxu0 %v4243_v41  ;;  %1048 = vmatpush.bf16.msrb.mxu1 %v4371_v42  ;;  %v4163_v41 = vor.u32 %v6185_v30, %v4160_v31  ;;  %v4291_v42 = vor.u32 %v6217_v34, %v4288_v35  ;;  %v4678_v30 = vld [vmem:[#allocation5 + $0x440] sm:$0xf]  ;;  %v6350_v34 = vld [vmem:[#allocation5 + $0x54c] sm:$0xf0] }
  0xcc   :  { %1061 = vmatpush.bf16.msrb.mxu2 %v4499_v45  ;;  %1074 = vmatpush.bf16.msrb.mxu3 %v4627_v36  ;;  %v6213_v45 = vld [vmem:[#allocation5 + $0x10c] sm:$0xf]  ;;  %v4419_v36 = vor.u32 %v6249_v37, %v4416_v38  ;;  %v4662_v37 = vld [vmem:[#allocation5 + $0x420] sm:$0xf] }
  0xcf   :  { %1036 = vmatpush.bf16.msrb.mxu0 %v4227_v52  ;;  %1049 = vmatpush.bf16.msrb.mxu1 %v4355_v53  ;;  %v4758_v52 = vld [vmem:[#allocation5 + $0x4e0] sm:$0xf]  ;;  %v6338_v53 = vld [vmem:[#allocation5 + $0x4ec] sm:$0xf0] }
  0xd0   :  { %1062 = vmatpush.bf16.msrb.mxu2 %v4483_v1  ;;  %1075 = vmatpush.bf16.msrb.mxu3 %v4611_v59  ;;  %v4147_v1 = vor.u32 %v6181_v43, %v4144_v44  ;;  %v4275_v59 = vor.u32 %v6213_v45, %v4272_v47  ;;  %v4759_v3 = vor.u32 %v6338_v53, %v4758_v52  ;;  %v4646_v44 = vld [vmem:[#allocation5 + $0x400] sm:$0xf]  ;;  %v6310_v45 = vld [vmem:[#allocation5 + $0x40c] sm:$0xf0]  ;;  %v6328_v52 = vld [vmem:[#allocation5 + $0x4a4] sm:$0xf] }
  0xd1   :  { %v4647_v47 = vor.u32 %v6310_v45, %v4646_v44  ;;  %v4728_v53 = vld [vmem:[#allocation5 + $0x4b0] sm:$0xf0] }
  0xd2   :  { %v4731_v0 = vor.u32 %v6328_v52, %v4728_v53  ;;  %v5000_v52 = vld [vmem:[#allocation5 + $0x6d0] sm:$0xf0] }
  0xd3   :  { %1037 = vmatpush.bf16.msrb.mxu0 %v4211_v4  ;;  %1050 = vmatpush.bf16.msrb.mxu1 %v4339_v5  ;;  %v4870_v4 = vld [vmem:[#allocation5 + $0x5c0] sm:$0xf]  ;;  %v6366_v5 = vld [vmem:[#allocation5 + $0x5cc] sm:$0xf0]  ;;  %v5003_v53 = vor.u32 %v6396_v50, %v5000_v52 }
  0xd4   :  { %1063 = vmatpush.bf16.msrb.mxu2 %v4467_v8  ;;  %1076 = vmatpush.bf16.msrb.mxu3 %v4595_v9  ;;  %v5015_v8 = vor.u32 %v6402_v7, %v5014_v6  ;;  %v4743_v9 = vor.u32 %v6334_v63, %v4742_v61  ;;  %v4871_v12 = vor.u32 %v6366_v5, %v4870_v4  ;;  %v6390_v61 = vld [vmem:[#allocation5 + $0x68c] sm:$0xf0]  ;;  %v6368_v63 = vld [vmem:[#allocation5 + $0x5e4] sm:$0xf]  ;;  %v4888_v4 = vld [vmem:[#allocation5 + $0x5f0] sm:$0xf0] }
  0xd5   :  { %v6320_v6 = vld [vmem:[#allocation5 + $0x464] sm:$0xf]  ;;  %v4891_v7 = vor.u32 %v6368_v63, %v4888_v4  ;;  %v6406_v50 = vld [vmem:[#allocation5 + $0x70c] sm:$0xf0] }
  0xd7   :  { %1038 = vmatpush.bf16.msrb.mxu0 %v4195_v16  ;;  %1051 = vmatpush.bf16.msrb.mxu1 %v4323_v17  ;;  %v6398_v16 = vld [vmem:[#allocation5 + $0x6cc] sm:$0xf0] }
  0xd8   :  { %1064 = vmatpush.bf16.msrb.mxu2 %v4451_v20  ;;  %1077 = vmatpush.bf16.msrb.mxu3 %v4579_v21  ;;  %v4999_v17 = vor.u32 %v6398_v16, %v4998_v15  ;;  %v6326_v20 = vld [vmem:[#allocation5 + $0x48c] sm:$0xf0]  ;;  %v4855_v21 = vor.u32 %v6362_v14, %v4854_v13  ;;  %v4872_v13 = vld [vmem:[#allocation5 + $0x5d0] sm:$0xf0]  ;;  %v6316_v15 = vld [vmem:[#allocation5 + $0x444] sm:$0xf] }
  0xd9   :  { %v4711_v25 = vor.u32 %v6326_v20, %v4710_v19  ;;  %v6382_v19 = vld [vmem:[#allocation5 + $0x64c] sm:$0xf0] }
  0xdb   :  { %1039 = vmatpush.bf16.msrb.mxu0 %v4179_v28  ;;  %1052 = vmatpush.bf16.msrb.mxu1 %v4307_v29  ;;  %v6354_v28 = vld [vmem:[#allocation5 + $0x56c] sm:$0xf0] }
  0xdc   :  { %1065 = vmatpush.bf16.msrb.mxu2 %v4435_v32  ;;  %1078 = vmatpush.bf16.msrb.mxu3 %v4563_v33  ;;  %v4823_v31 = vor.u32 %v6354_v28, %v4822_v27  ;;  %v6318_v32 = vld [vmem:[#allocation5 + $0x44c] sm:$0xf0]  ;;  %v4806_v33 = vld [vmem:[#allocation5 + $0x540] sm:$0xf]  ;;  %v4840_v27 = vld [vmem:[#allocation5 + $0x590] sm:$0xf0] }
  0xdd   :  { %v4679_v35 = vor.u32 %v6318_v32, %v4678_v30  ;;  %v4807_v38 = vor.u32 %v6350_v34, %v4806_v33  ;;  %v6308_v30 = vld [vmem:[#allocation5 + $0x404] sm:$0xf]  ;;  %v4902_v32 = vld [vmem:[#allocation5 + $0x600] sm:$0xf]  ;;  %v6374_v33 = vld [vmem:[#allocation5 + $0x60c] sm:$0xf0] }
  0xde   :  { %v5142_v34 = vld [vmem:[#allocation5 + $0x7e0] sm:$0xf] }
  0xdf   :  { %1040 = vmatpush.bf16.msrb.mxu0 %v4163_v41  ;;  %1053 = vmatpush.bf16.msrb.mxu1 %v4291_v42  ;;  %v6346_v41 = vld [vmem:[#allocation5 + $0x52c] sm:$0xf0]  ;;  %v4663_v42 = vor.u32 %v6314_v39, %v4662_v37  ;;  %v4824_v39 = vld [vmem:[#allocation5 + $0x570] sm:$0xf0] }
  0xe0   :  { %1066 = vmatpush.bf16.msrb.mxu2 %v4419_v36  ;;  %1079 = vmatpush.bf16.msrb.mxu3 %v4547_v46  ;;  %v4791_v43 = vor.u32 %v6346_v41, %v4790_v40  ;;  %v6336_v36 = vld [vmem:[#allocation5 + $0x4e4] sm:$0xf]  ;;  %v4760_v46 = vld [vmem:[#allocation5 + $0x4f0] sm:$0xf0]  ;;  %v6434_v37 = vld [vmem:[#allocation5 + $0x7ec] sm:$0xf0] }
  0xe1   :  { %v4763_v48 = vor.u32 %v6336_v36, %v4760_v46  ;;  %v5143_v40 = vor.u32 %v6434_v37, %v5142_v34  ;;  %v5126_v36 = vld [vmem:[#allocation5 + $0x7c0] sm:$0xf]  ;;  %v6430_v46 = vld [vmem:[#allocation5 + $0x7cc] sm:$0xf0] }
  0xe2   :  { %v5046_v34 = vld [vmem:[#allocation5 + $0x720] sm:$0xf] }
  0xe3   :  { %1041 = vmatpush.bf16.msrb.mxu0 %v4147_v1  ;;  %1054 = vmatpush.bf16.msrb.mxu1 %v4275_v59  ;;  %v4712_v1 = vld [vmem:[#allocation5 + $0x490] sm:$0xf0]  ;;  %v4774_v59 = vld [vmem:[#allocation5 + $0x500] sm:$0xf] }
  0xe4   :  { %1067 = vmatpush.bf16.msrb.mxu2 %v4403_v2  ;;  %1080 = vmatpush.bf16.msrb.mxu3 %v4531_v60  ;;  %v6342_v2 = vld [vmem:[#allocation5 + $0x50c] sm:$0xf0]  ;;  %v4966_v60 = vld [vmem:[#allocation5 + $0x680] sm:$0xf]  ;;  %v4715_v5 = vor.u32 %v6324_v58, %v4712_v1 }
  0xe5   :  { %v5110_v58 = vld [vmem:[#allocation5 + $0x7a0] sm:$0xf]  ;;  %v6426_v1 = vld [vmem:[#allocation5 + $0x7ac] sm:$0xf0] }
  0xe6   :  { %1042 = vmatmul.bf16.vlgmr.msrb.gmra.mxu0 %v6872_v54  ;;  %1055 = vmatmul.bf16.vlgmr.msrb.gmra.mxu1 %v6874_v55  ;;  %v6358_v54 = vld [vmem:[#allocation5 + $0x58c] sm:$0xf0] }
  0xe7   :  { %1882 = vmatpush.bf16.msra.mxu0 %v4759_v3  ;;  %1895 = vmatpush.bf16.msra.mxu1 %v4887_v62  ;;  %v6394_v55 = vld [vmem:[#allocation5 + $0x6ac] sm:$0xf0]  ;;  %v4775_v3 = vor.u32 %v6342_v2, %v4774_v59  ;;  %v4967_v62 = vor.u32 %v6390_v61, %v4966_v60  ;;  %v5111_v59 = vor.u32 %v6426_v1, %v5110_v58  ;;  %v6344_v2 = vld [vmem:[#allocation5 + $0x524] sm:$0xf]  ;;  %v4792_v60 = vld [vmem:[#allocation5 + $0x530] sm:$0xf0] }
  0xe8   :  { %1068 = vmatmul.bf16.vlgmr.msrb.gmra.mxu2 %v6876_v56  ;;  %1081 = vmatmul.bf16.vlgmr.msrb.gmra.mxu3 %v6878_v57  ;;  %v4983_v24 = vor.u32 %v6394_v55, %v4982_v23  ;;  %v4694_v56 = vld [vmem:[#allocation5 + $0x460] sm:$0xf]  ;;  %v4839_v57 = vor.u32 %v6358_v54, %v4838_v22  ;;  %v4856_v22 = vld [vmem:[#allocation5 + $0x5b0] sm:$0xf0]  ;;  %v6312_v23 = vld [vmem:[#allocation5 + $0x424] sm:$0xf]  ;;  %v4795_v61 = vor.u32 %v6344_v2, %v4792_v60 }
  0xe9   :  { %1908 = vmatpush.bf16.msra.mxu2 %v5015_v8  ;;  %v4695_v29 = vor.u32 %v6322_v26, %v4694_v56  ;;  %v4696_v8 = vld [vmem:[#allocation5 + $0x470] sm:$0xf0]  ;;  %v6378_v56 = vld [vmem:[#allocation5 + $0x62c] sm:$0xf0]  ;;  %v6356_v26 = vld [vmem:[#allocation5 + $0x584] sm:$0xf]  ;;  %1921 = vmatpush.bf16.msra.mxu3 %v5143_v40 }
  0xea   :  { %v4699_v14 = vor.u32 %v6320_v6, %v4696_v8  ;;  %v4843_v28 = vor.u32 %v6356_v26, %v4840_v27  ;;  %v6422_v6 = vld [vmem:[#allocation5 + $0x78c] sm:$0xf0]  ;;  %v4920_v40 = vld [vmem:[#allocation5 + $0x630] sm:$0xf0]  ;;  %v6372_v58 = vld [vmem:[#allocation5 + $0x604] sm:$0xf] }
  0xeb   :  { %1883 = vmatpush.bf16.msra.mxu0 %v4743_v9  ;;  %1896 = vmatpush.bf16.msra.mxu1 %v4871_v12  ;;  %v4950_v9 = vld [vmem:[#allocation5 + $0x660] sm:$0xf]  ;;  %v6364_v12 = vld [vmem:[#allocation5 + $0x5c4] sm:$0xf]  ;;  %v4904_v1 = vld [vmem:[#allocation5 + $0x610] sm:$0xf0] }
  0xec   :  { %v4951_v11 = vor.u32 %v6386_v10, %v4950_v9  ;;  %v4875_v16 = vor.u32 %v6364_v12, %v4872_v13  ;;  %v6388_v12 = vld [vmem:[#allocation5 + $0x684] sm:$0xf]  ;;  %v4968_v13 = vld [vmem:[#allocation5 + $0x690] sm:$0xf0]  ;;  %v4907_v2 = vor.u32 %v6372_v58, %v4904_v1  ;;  %v4654_v1 = vld [vmem:[#allocation5 + $0x408] sm:$0xf] }
  0xed   :  { %1909 = vmatpush.bf16.msra.mxu2 %v4999_v17  ;;  %v4680_v17 = vld [vmem:[#allocation5 + $0x450] sm:$0xf0] }
  0xee   :  { %v4683_v54 = vor.u32 %v6316_v15, %v4680_v17  ;;  %v4971_v15 = vor.u32 %v6388_v12, %v4968_v13  ;;  %v5078_v17 = vld [vmem:[#allocation5 + $0x760] sm:$0xf]  ;;  %v5144_v60 = vld [vmem:[#allocation5 + $0x7f0] sm:$0xf0]  ;;  %v4718_v12 = vld [vmem:[#allocation5 + $0x488] sm:$0xf] }
  0xef   :  { %1884 = vmatpush.bf16.msra.mxu0 %v4727_v18  ;;  %1897 = vmatpush.bf16.msra.mxu1 %v4855_v21  ;;  %v4934_v18 = vld [vmem:[#allocation5 + $0x640] sm:$0xf]  ;;  %v6360_v21 = vld [vmem:[#allocation5 + $0x5a4] sm:$0xf]  ;;  %v6327_v13 = vld [vmem:[#allocation5 + $0x494] sm:$0xf0] }
  0xf0   :  { %v4935_v20 = vor.u32 %v6382_v19, %v4934_v18  ;;  %v4859_v55 = vor.u32 %v6360_v21, %v4856_v22  ;;  %v6418_v18 = vld [vmem:[#allocation5 + $0x76c] sm:$0xf0]  ;;  %v4952_v21 = vld [vmem:[#allocation5 + $0x670] sm:$0xf0] }
  0xf1   :  { %1910 = vmatpush.bf16.msra.mxu2 %v4983_v24  ;;  %v4664_v24 = vld [vmem:[#allocation5 + $0x430] sm:$0xf0]  ;;  %v5079_v19 = vor.u32 %v6418_v18, %v5078_v17  ;;  %v6424_v17 = vld [vmem:[#allocation5 + $0x7a4] sm:$0xf] }
  0xf2   :  { %v5112_v18 = vld [vmem:[#allocation5 + $0x7b0] sm:$0xf0] }
  0xf3   :  { %1885 = vmatpush.bf16.msra.mxu0 %v4711_v25  ;;  %1898 = vmatpush.bf16.msra.mxu1 %v4839_v57  ;;  %v4918_v25 = vld [vmem:[#allocation5 + $0x620] sm:$0xf] }
  0xf4   :  { %v4919_v57 = vor.u32 %v6378_v56, %v4918_v25  ;;  %v6414_v25 = vld [vmem:[#allocation5 + $0x74c] sm:$0xf0] }
  0xf5   :  { %1911 = vmatpush.bf16.msra.mxu2 %v4967_v62  ;;  %v4984_v62 = vld [vmem:[#allocation5 + $0x6b0] sm:$0xf0] }
  0xf7   :  { %1886 = vmatpush.bf16.msra.mxu0 %v4695_v29  ;;  %1899 = vmatpush.bf16.msra.mxu1 %v4823_v31  ;;  %v4667_v29 = vor.u32 %v6312_v23, %v4664_v24  ;;  %v4648_v31 = vld [vmem:[#allocation5 + $0x410] sm:$0xf0]  ;;  %v5062_v24 = vld [vmem:[#allocation5 + $0x740] sm:$0xf] }
  0xf8   :  { %v4651_v44 = vor.u32 %v6308_v30, %v4648_v31  ;;  %v5063_v27 = vor.u32 %v6414_v25, %v5062_v24  ;;  %v6420_v25 = vld [vmem:[#allocation5 + $0x784] sm:$0xf] }
  0xf9   :  { %1912 = vmatpush.bf16.msra.mxu2 %v4951_v11  ;;  %v4776_v11 = vld [vmem:[#allocation5 + $0x510] sm:$0xf0] }
  0xfb   :  { %1887 = vmatpush.bf16.msra.mxu0 %v4679_v35  ;;  %1900 = vmatpush.bf16.msra.mxu1 %v4807_v38  ;;  %v4903_v35 = vor.u32 %v6374_v33, %v4902_v32  ;;  %v6352_v38 = vld [vmem:[#allocation5 + $0x564] sm:$0xf]  ;;  %v4766_v32 = vld [vmem:[#allocation5 + $0x4e8] sm:$0xf]  ;;  %v6339_v33 = vld [vmem:[#allocation5 + $0x4f4] sm:$0xf0] }
  0xfc   :  { %v4827_v41 = vor.u32 %v6352_v38, %v4824_v39  ;;  %v6376_v39 = vld [vmem:[#allocation5 + $0x624] sm:$0xf] }
  0xfd   :  { %1913 = vmatpush.bf16.msra.mxu2 %v4935_v20  ;;  %v6384_v20 = vld [vmem:[#allocation5 + $0x664] sm:$0xf] }
  0xfe   :  { %v4955_v22 = vor.u32 %v6384_v20, %v4952_v21  ;;  %v4719_v21 = vor.u32 %v6327_v13, %v4718_v12 }
  0xff   :  { %1888 = vmatpush.bf16.msra.mxu0 %v4663_v42  ;;  %1901 = vmatpush.bf16.msra.mxu1 %v4791_v43  ;;  %v6400_v42 = vld [vmem:[#allocation5 + $0x6e4] sm:$0xf]  ;;  %v5016_v43 = vld [vmem:[#allocation5 + $0x6f0] sm:$0xf0] }
 0x100   :  { %v5019_v45 = vor.u32 %v6400_v42, %v5016_v43  ;;  %v4767_v43 = vor.u32 %v6339_v33, %v4766_v32  ;;  %v6319_v33 = vld [vmem:[#allocation5 + $0x454] sm:$0xf0] }
 0x101   :  { %1914 = vmatpush.bf16.msra.mxu2 %v4919_v57 }
 0x103   :  { %1889 = vmatpush.bf16.msra.mxu0 %v4647_v47  ;;  %1902 = vmatpush.bf16.msra.mxu1 %v4775_v3  ;;  %v5127_v47 = vor.u32 %v6430_v46, %v5126_v36  ;;  %v6392_v3 = vld [vmem:[#allocation5 + $0x6a4] sm:$0xf] }
 0x104   :  { %v4987_v4 = vor.u32 %v6392_v3, %v4984_v62 }
 0x105   :  { %1915 = vmatpush.bf16.msra.mxu2 %v4903_v35  ;;  %1922 = vmatpush.bf16.msra.mxu3 %v5127_v47  ;;  %v6410_v35 = vld [vmem:[#allocation5 + $0x72c] sm:$0xf0] }
 0x106   :  { %v5047_v38 = vor.u32 %v6410_v35, %v5046_v34  ;;  %v4878_v34 = vld [vmem:[#allocation5 + $0x5c8] sm:$0xf]  ;;  %v6367_v35 = vld [vmem:[#allocation5 + $0x5d4] sm:$0xf0] }
 0x107   :  { %1934 = vmatpush.bf16.msrb.mxu0 %v4763_v48  ;;  %1947 = vmatpush.bf16.msrb.mxu1 %v4891_v7  ;;  %v6348_v48 = vld [vmem:[#allocation5 + $0x544] sm:$0xf] }
 0x108   :  { %v6340_v7 = vld [vmem:[#allocation5 + $0x504] sm:$0xf] }
 0x109   :  { %1960 = vmatpush.bf16.msrb.mxu2 %v5019_v45  ;;  %1923 = vmatpush.bf16.msra.mxu3 %v5111_v59  ;;  %v4923_v45 = vor.u32 %v6376_v39, %v4920_v40  ;;  %v6432_v59 = vld [vmem:[#allocation5 + $0x7e4] sm:$0xf]  ;;  %v5080_v39 = vld [vmem:[#allocation5 + $0x770] sm:$0xf0] }
 0x10a   :  { %v5147_v62 = vor.u32 %v6432_v59, %v5144_v60  ;;  %v6311_v59 = vld [vmem:[#allocation5 + $0x414] sm:$0xf0] }
 0x10b   :  { %1935 = vmatpush.bf16.msrb.mxu0 %v4747_v51  ;;  %1948 = vmatpush.bf16.msrb.mxu1 %v4875_v16  ;;  %v4811_v51 = vor.u32 %v6348_v48, %v4808_v49  ;;  %v6335_v48 = vld [vmem:[#allocation5 + $0x4d4] sm:$0xf0]  ;;  %v5030_v49 = vld [vmem:[#allocation5 + $0x700] sm:$0xf] }
 0x10c   :  { %v6359_v60 = vld [vmem:[#allocation5 + $0x594] sm:$0xf0] }
 0x10d   :  { %1961 = vmatpush.bf16.msrb.mxu2 %v5003_v53  ;;  %v5031_v53 = vor.u32 %v6406_v50, %v5030_v49  ;;  %v6412_v50 = vld [vmem:[#allocation5 + $0x744] sm:$0xf] }
 0x10f   :  { %1936 = vmatpush.bf16.msrb.mxu0 %v4731_v0  ;;  %1949 = vmatpush.bf16.msrb.mxu1 %v4859_v55  ;;  %v6896_v0 = vld [vmem:[#allocation7] sm:$0xf] }
 0x110   :  { %v230_v63 = vperm.slane %v6896_v0, 0  ;;  %v231_v42 = vperm.slane %v6896_v0, 1 }
 0x111   :  { %1962 = vmatpush.bf16.msrb.mxu2 %v4987_v4  ;;  %v6331_v4 = vld [vmem:[#allocation5 + $0x4b4] sm:$0xf0] }
 0x113   :  { %1937 = vmatpush.bf16.msrb.mxu0 %v4715_v5  ;;  %1950 = vmatpush.bf16.msrb.mxu1 %v4843_v28  ;;  %v5094_v5 = vld [vmem:[#allocation5 + $0x780] sm:$0xf]  ;;  %v6380_v28 = vld [vmem:[#allocation5 + $0x644] sm:$0xf] }
 0x114   :  { %v5095_v10 = vor.u32 %v6422_v6, %v5094_v5  ;;  %v6428_v5 = vld [vmem:[#allocation5 + $0x7c4] sm:$0xf]  ;;  %v5128_v6 = vld [vmem:[#allocation5 + $0x7d0] sm:$0xf0] }
 0x115   :  { %1963 = vmatpush.bf16.msrb.mxu2 %v4971_v15 }
 0x116   :  { %1924 = vmatpush.bf16.msra.mxu3 %v5095_v10 }
 0x117   :  { %1938 = vmatpush.bf16.msrb.mxu0 %v4699_v14  ;;  %1951 = vmatpush.bf16.msrb.mxu1 %v4827_v41  ;;  %v4779_v14 = vor.u32 %v6340_v7, %v4776_v11  ;;  %v5131_v7 = vor.u32 %v6428_v5, %v5128_v6 }
 0x119   :  { %1964 = vmatpush.bf16.msrb.mxu2 %v4955_v22  ;;  %v4702_v22 = vld [vmem:[#allocation5 + $0x468] sm:$0xf] }
 0x11a   :  { %1925 = vmatpush.bf16.msra.mxu3 %v5079_v19  ;;  %v5115_v19 = vor.u32 %v6424_v17, %v5112_v18  ;;  %v4752_v18 = vld [vmem:[#allocation5 + $0x4d8] sm:$0xf0] }
 0x11b   :  { %1939 = vmatpush.bf16.msrb.mxu0 %v4683_v54  ;;  %1952 = vmatpush.bf16.msrb.mxu1 %v4811_v51 }
 0x11e   :  { %1926 = vmatpush.bf16.msra.mxu3 %v5063_v27 }
 0x11f   :  { %1940 = vmatpush.bf16.msrb.mxu0 %v4667_v29  ;;  %1953 = vmatpush.bf16.msrb.mxu1 %v4795_v61  ;;  %v4936_v29 = vld [vmem:[#allocation5 + $0x650] sm:$0xf0] }
 0x120   :  { %v4939_v30 = vor.u32 %v6380_v28, %v4936_v29  ;;  %v4686_v28 = vld [vmem:[#allocation5 + $0x448] sm:$0xf] }
 0x122   :  { %v887_v8 = vpop.f32.mrf.mxu0  ;;  %v900_v9 = vpop.f32.mrf.mxu1  ;;  %1965 = vmatpush.bf16.msrb.mxu2 %v4939_v30  ;;  %1927 = vmatpush.bf16.msra.mxu3 %v5047_v38  ;;  %v6416_v38 = vld [vmem:[#allocation5 + $0x764] sm:$0xf] }
 0x123   :  { %1941 = vmatpush.bf16.msrb.mxu0 %v4651_v44  ;;  %v888_v16 = vadd.f32 %v887_v8, %v230_v63  ;;  %1954 = vmatpush.bf16.msrb.mxu1 %v4779_v14  ;;  %v4750_v44 = vld [vmem:[#allocation5 + $0x4c8] sm:$0xf]  ;;  %v5083_v40 = vor.u32 %v6416_v38, %v5080_v39  ;;  %v6347_v39 = vld [vmem:[#allocation5 + $0x534] sm:$0xf0] }
 0x124   :  { %v4751_v61 = vor.u32 %v6335_v48, %v4750_v44  ;;  %v4734_v63 = vld [vmem:[#allocation5 + $0x4a8] sm:$0xf]  ;;  %v4879_v44 = vor.u32 %v6367_v35, %v4878_v34  ;;  %v6363_v48 = vld [vmem:[#allocation5 + $0x5b4] sm:$0xf0] }
 0x125   :  { %v901_v54 = vadd.f32 %v900_v9, %v888_v16  ;;  %v4735_v9 = vor.u32 %v6331_v4, %v4734_v63  ;;  %v6408_v63 = vld [vmem:[#allocation5 + $0x724] sm:$0xf]  ;;  %v5048_v4 = vld [vmem:[#allocation5 + $0x730] sm:$0xf0]  ;;  %v6399_v34 = vld [vmem:[#allocation5 + $0x6d4] sm:$0xf0] }
 0x126   :  { %1966 = vmatpush.bf16.msrb.mxu2 %v4923_v45  ;;  %1928 = vmatpush.bf16.msra.mxu3 %v5031_v53  ;;  %v4670_v45 = vld [vmem:[#allocation5 + $0x428] sm:$0xf] }
 0x127   :  { %v4798_v38 = vld [vmem:[#allocation5 + $0x528] sm:$0xf] }
 0x129   :  { %v913_v23 = vpop.f32.mrf.mxu2  ;;  %v926_v55 = vpop.f32.mrf.mxu3 }
 0x12a   :  { %v914_v56 = vadd.f32 %v913_v23, %v901_v54  ;;  %v889_v57 = vpop.f32.mrf.mxu0  ;;  %v902_v26 = vpop.f32.mrf.mxu1  ;;  %1967 = vmatpush.bf16.msrb.mxu2 %v4907_v2  ;;  %1973 = vmatpush.bf16.msrb.mxu3 %v5147_v62  ;;  %v6323_v54 = vld [vmem:[#allocation5 + $0x474] sm:$0xf0]  ;;  %v4894_v23 = vld [vmem:[#allocation5 + $0x5e8] sm:$0xf]  ;;  %v4768_v62 = vld [vmem:[#allocation5 + $0x4f8] sm:$0xf0] }
 0x12b   :  { %v4703_v26 = vor.u32 %v6323_v54, %v4702_v22  ;;  %v4846_v2 = vld [vmem:[#allocation5 + $0x588] sm:$0xf]  ;;  %v6403_v22 = vld [vmem:[#allocation5 + $0x6f4] sm:$0xf0] }
 0x12c   :  { %v927_v31 = vadd.f32 %v926_v55, %v914_v56  ;;  %v6371_v55 = vld [vmem:[#allocation5 + $0x5f4] sm:$0xf0]  ;;  %v5096_v56 = vld [vmem:[#allocation5 + $0x790] sm:$0xf0]  ;;  %v4847_v12 = vor.u32 %v6359_v60, %v4846_v2  ;;  %v233_v2 = vperm.slane %v6896_v0, 3 }
 0x12d   :  { %v4895_v27 = vor.u32 %v6371_v55, %v4894_v23  ;;  %v5099_v29 = vor.u32 %v6420_v25, %v5096_v56  ;;  %v4814_v25 = vld [vmem:[#allocation5 + $0x548] sm:$0xf]  ;;  %v6351_v56 = vld [vmem:[#allocation5 + $0x554] sm:$0xf0] }
 0x12e   :  { %vm1086_vm4 = vcmp.ge.f32.partialorder %v927_v31, 0.0  ;;  %v1090_v37 = vmul.f32 0.2, %v927_v31  ;;  %1974 = vmatpush.bf16.msrb.mxu3 %v5131_v7  ;;  %v5051_v7 = vor.u32 %v6408_v63, %v5048_v4  ;;  %v4815_v35 = vor.u32 %v6351_v56, %v4814_v25  ;;  %v6317_v63 = vld [vmem:[#allocation5 + $0x44c] sm:$0xf] }
 0x12f   :  { %v4688_v4 = vld [vmem:[#allocation5 + $0x458] sm:$0xf0]  ;;  %v6357_v25 = vld [vmem:[#allocation5 + $0x58c] sm:$0xf] }
 0x130   :  { %v1094_v41 = vsel %vm1086_vm4, %v927_v31, %v1090_v37  ;;  %v232_v37 = vperm.slane %v6896_v0, 2  ;;  %v4942_v0 = vld [vmem:[#allocation5 + $0x648] sm:$0xf]  ;;  %v4848_v56 = vld [vmem:[#allocation5 + $0x598] sm:$0xf0] }
 0x131   :  { %v6900_v36 = vpack.c.bf16 %v1094_v41, %v1094_v41  ;;  %v915_v46 = vpop.f32.mrf.mxu2  ;;  %v928_v47 = vpop.f32.mrf.mxu3 }
 0x132   :  { %v939_v51 = vpop.f32.mrf.mxu0  ;;  %v952_v52 = vpop.f32.mrf.mxu1  ;;  %1975 = vmatpush.bf16.msrb.mxu3 %v5115_v19  ;;  %v6315_v46 = vld [vmem:[#allocation5 + $0x434] sm:$0xf0]  ;;  %v4862_v47 = vld [vmem:[#allocation5 + $0x5a8] sm:$0xf]  ;;  %v6404_v19 = vld [vmem:[#allocation5 + $0x704] sm:$0xf] }
 0x133   :  { %1890 = vmatmul.bf16.vlgmr.msra.gmra.mxu0 %v6900_v36  ;;  %v940_v3 = vadd.f32 %v939_v51, %v231_v42  ;;  %v5064_v51 = vld [vmem:[#allocation5 + $0x750] sm:$0xf0]  ;;  %v4671_v53 = vor.u32 %v6315_v46, %v4670_v45  ;;  %v4863_v58 = vor.u32 %v6363_v48, %v4862_v47  ;;  %v4799_v45 = vor.u32 %v6347_v39, %v4798_v38  ;;  %v4782_v47 = vld [vmem:[#allocation5 + $0x508] sm:$0xf]  ;;  %v6343_v48 = vld [vmem:[#allocation5 + $0x514] sm:$0xf0] }
 0x134   :  { %1986 = vmatpush.bf16.msra.mxu0 %v4767_v43  ;;  %v4687_v43 = vor.u32 %v6319_v33, %v4686_v28  ;;  %v4736_v28 = vld [vmem:[#allocation5 + $0x4b8] sm:$0xf0]  ;;  %v5006_v33 = vld [vmem:[#allocation5 + $0x6c8] sm:$0xf]  ;;  %v6375_v38 = vld [vmem:[#allocation5 + $0x614] sm:$0xf0] }
 0x135   :  { %v953_v8 = vadd.f32 %v952_v52, %v940_v3  ;;  %v5067_v52 = vor.u32 %v6412_v50, %v5064_v51  ;;  %v6337_v3 = vld [vmem:[#allocation5 + $0x4ec] sm:$0xf]  ;;  %v4704_v51 = vld [vmem:[#allocation5 + $0x478] sm:$0xf0]  ;;  %v5150_v39 = vld [vmem:[#allocation5 + $0x7e8] sm:$0xf] }
 0x136   :  { %1976 = vmatpush.bf16.msrb.mxu3 %v5099_v29  ;;  %v4771_v13 = vor.u32 %v6337_v3, %v4768_v62  ;;  %v4958_v62 = vld [vmem:[#allocation5 + $0x668] sm:$0xf] }
 0x138   :  { %1987 = vmatpush.bf16.msra.mxu0 %v4751_v61 }
 0x139   :  { %v965_v10 = vpop.f32.mrf.mxu2  ;;  %v978_v11 = vpop.f32.mrf.mxu3 }
 0x13a   :  { %v966_v14 = vadd.f32 %v965_v10, %v953_v8  ;;  %v941_v15 = vpop.f32.mrf.mxu0  ;;  %v954_v16 = vpop.f32.mrf.mxu1  ;;  %1977 = vmatpush.bf16.msrb.mxu3 %v5083_v40  ;;  %v5007_v40 = vor.u32 %v6399_v34, %v5006_v33  ;;  %v4851_v34 = vor.u32 %v6357_v25, %v4848_v56  ;;  %v6415_v25 = vld [vmem:[#allocation5 + $0x754] sm:$0xf0]  ;;  %v6381_v56 = vld [vmem:[#allocation5 + $0x64c] sm:$0xf] }
 0x13b   :  { %v6355_v15 = vld [vmem:[#allocation5 + $0x574] sm:$0xf0]  ;;  %v6333_v16 = vld [vmem:[#allocation5 + $0x4cc] sm:$0xf] }
 0x13c   :  { %v979_v20 = vadd.f32 %v978_v11, %v966_v14  ;;  %1988 = vmatpush.bf16.msra.mxu0 %v4735_v9  ;;  %v4655_v11 = vor.u32 %v6311_v59, %v4654_v1  ;;  %v4830_v14 = vld [vmem:[#allocation5 + $0x568] sm:$0xf]  ;;  %v6391_v1 = vld [vmem:[#allocation5 + $0x694] sm:$0xf0]  ;;  %v4783_v59 = vor.u32 %v6343_v48, %v4782_v47 }
 0x13d   :  { %v4831_v55 = vor.u32 %v6355_v15, %v4830_v14  ;;  %v4672_v14 = vld [vmem:[#allocation5 + $0x438] sm:$0xf0] }
 0x13e   :  { %vm1087_vm5 = vcmp.ge.f32.partialorder %v979_v20, 0.0  ;;  %v1091_v24 = vmul.f32 0.2, %v979_v20  ;;  %1978 = vmatpush.bf16.msrb.mxu3 %v5067_v52  ;;  %v6369_v52 = vld [vmem:[#allocation5 + $0x5ec] sm:$0xf] }
 0x140   :  { %v1095_v57 = vsel %vm1087_vm5, %v979_v20, %v1091_v24  ;;  %1989 = vmatpush.bf16.msra.mxu0 %v4719_v21  ;;  %v5032_v20 = vld [vmem:[#allocation5 + $0x710] sm:$0xf0]  ;;  %v5022_v21 = vld [vmem:[#allocation5 + $0x6e8] sm:$0xf]  ;;  %v4755_v24 = vor.u32 %v6333_v16, %v4752_v18  ;;  %v6383_v16 = vld [vmem:[#allocation5 + $0x654] sm:$0xf0] }
 0x141   :  { %v6903_v30 = vpack.c.bf16 %v1095_v57, %v1095_v57  ;;  %v967_v31 = vpop.f32.mrf.mxu2  ;;  %v980_v32 = vpop.f32.mrf.mxu3  ;;  %v5035_v54 = vor.u32 %v6404_v19, %v5032_v20  ;;  %v4864_v18 = vld [vmem:[#allocation5 + $0x5b8] sm:$0xf0]  ;;  %v4943_v20 = vor.u32 %v6383_v16, %v4942_v0  ;;  %v6423_v0 = vld [vmem:[#allocation5 + $0x794] sm:$0xf0] }
 0x142   :  { %1979 = vmatpush.bf16.msrb.mxu3 %v5051_v7  ;;  %v4880_v7 = vld [vmem:[#allocation5 + $0x5d8] sm:$0xf0] }
 0x143   :  { %1903 = vmatmul.bf16.vlgmr.msra.gmra.mxu1 %v6903_v30  ;;  %1942 = vmatmul.bf16.vlgmr.msrb.gmra.mxu0 %v6900_v36  ;;  %v991_v41 = vpop.f32.mrf.mxu0  ;;  %v1004_v42 = vpop.f32.mrf.mxu1  ;;  %v4976_v16 = vld [vmem:[#allocation5 + $0x698] sm:$0xf0] }
 0x144   :  { %1990 = vmatpush.bf16.msra.mxu0 %v4703_v26  ;;  %1999 = vmatpush.bf16.msra.mxu1 %v4895_v27  ;;  %v992_v49 = vadd.f32 %v991_v41, %v232_v37  ;;  %v5023_v26 = vor.u32 %v6403_v22, %v5022_v21  ;;  %v6329_v27 = vld [vmem:[#allocation5 + $0x4ac] sm:$0xf]  ;;  %v4926_v22 = vld [vmem:[#allocation5 + $0x628] sm:$0xf] }
 0x145   :  { %v4739_v37 = vor.u32 %v6329_v27, %v4736_v28  ;;  %v6325_v41 = vld [vmem:[#allocation5 + $0x48c] sm:$0xf] }
 0x146   :  { %v1005_v61 = vadd.f32 %v1004_v42, %v992_v49  ;;  %1980 = vmatpush.bf16.msrb.mxu3 %v5035_v54  ;;  %v4720_v42 = vld [vmem:[#allocation5 + $0x498] sm:$0xf0]  ;;  %v6321_v49 = vld [vmem:[#allocation5 + $0x46c] sm:$0xf] }
 0x147   :  { %v4723_v46 = vor.u32 %v6325_v41, %v4720_v42  ;;  %v4707_v60 = vor.u32 %v6321_v49, %v4704_v51  ;;  %v6309_v54 = vld [vmem:[#allocation5 + $0x40c] sm:$0xf]  ;;  %v4832_v42 = vld [vmem:[#allocation5 + $0x578] sm:$0xf0] }
 0x148   :  { %1991 = vmatpush.bf16.msra.mxu0 %v4687_v43  ;;  %2000 = vmatpush.bf16.msra.mxu1 %v4879_v44  ;;  %v4990_v43 = vld [vmem:[#allocation5 + $0x6a8] sm:$0xf]  ;;  %v6395_v44 = vld [vmem:[#allocation5 + $0x6b4] sm:$0xf0]  ;;  %v6353_v41 = vld [vmem:[#allocation5 + $0x56c] sm:$0xf] }
 0x149   :  { %v4991_v50 = vor.u32 %v6395_v44, %v4990_v43  ;;  %v6401_v43 = vld [vmem:[#allocation5 + $0x6ec] sm:$0xf]  ;;  %v4835_v49 = vor.u32 %v6353_v41, %v4832_v42  ;;  %v5152_v42 = vld [vmem:[#allocation5 + $0x7f8] sm:$0xf0] }
 0x14a   :  { %v6433_v41 = vld [vmem:[#allocation5 + $0x7ec] sm:$0xf] }
 0x14b   :  { %v993_v9 = vpop.f32.mrf.mxu0  ;;  %v1006_v10 = vpop.f32.mrf.mxu1 }
 0x14c   :  { %v1017_v5 = vpop.f32.mrf.mxu2  ;;  %v1030_v6 = vpop.f32.mrf.mxu3  ;;  %1992 = vmatpush.bf16.msra.mxu0 %v4671_v53  ;;  %2001 = vmatpush.bf16.msra.mxu1 %v4863_v58  ;;  %v4896_v53 = vld [vmem:[#allocation5 + $0x5f8] sm:$0xf0]  ;;  %v4974_v58 = vld [vmem:[#allocation5 + $0x688] sm:$0xf]  ;;  %v4691_v10 = vor.u32 %v6317_v63, %v4688_v4 }
 0x14d   :  { %v1018_v8 = vadd.f32 %v1017_v5, %v1005_v61  ;;  %v4899_v3 = vor.u32 %v6369_v52, %v4896_v53  ;;  %v4975_v61 = vor.u32 %v6391_v1, %v4974_v58  ;;  %v6387_v5 = vld [vmem:[#allocation5 + $0x674] sm:$0xf0]  ;;  %v5118_v63 = vld [vmem:[#allocation5 + $0x7a8] sm:$0xf] }
 0x14e   :  { %v6431_v1 = vld [vmem:[#allocation5 + $0x7d4] sm:$0xf0] }
 0x14f   :  { %v1031_v17 = vadd.f32 %v1030_v6, %v1018_v8  ;;  %v6365_v6 = vld [vmem:[#allocation5 + $0x5cc] sm:$0xf] }
 0x150   :  { %1993 = vmatpush.bf16.msra.mxu0 %v4655_v11  ;;  %2002 = vmatpush.bf16.msra.mxu1 %v4847_v12  ;;  %v4959_v11 = vor.u32 %v6387_v5, %v4958_v62  ;;  %v4883_v12 = vor.u32 %v6365_v6, %v4880_v7  ;;  %v6427_v5 = vld [vmem:[#allocation5 + $0x7b4] sm:$0xf0]  ;;  %v6345_v6 = vld [vmem:[#allocation5 + $0x52c] sm:$0xf]  ;;  %v4800_v7 = vld [vmem:[#allocation5 + $0x538] sm:$0xf0] }
 0x151   :  { %vm1088_vm6 = vcmp.ge.f32.partialorder %v1031_v17, 0.0  ;;  %v1092_v23 = vmul.f32 0.2, %v1031_v17 }
 0x153   :  { %v1096_v57 = vsel %vm1088_vm6, %v1031_v17, %v1092_v23  ;;  %1955 = vmatmul.bf16.vlgmr.msrb.gmra.mxu1 %v6903_v30  ;;  %1994 = vmatmul.bf16.vlgmr.msra.gmra.mxu0 %v6900_v36  ;;  %v6361_v17 = vld [vmem:[#allocation5 + $0x5ac] sm:$0xf]  ;;  %v4656_v23 = vld [vmem:[#allocation5 + $0x418] sm:$0xf0] }
 0x154   :  { %2038 = vmatpush.bf16.msrb.mxu0 %v4771_v13  ;;  %v6908_v29 = vpack.c.bf16 %v1096_v57, %v1096_v57  ;;  %v1019_v31 = vpop.f32.mrf.mxu2  ;;  %v1032_v32 = vpop.f32.mrf.mxu3  ;;  %2003 = vmatpush.bf16.msra.mxu1 %v4831_v55  ;;  %v6313_v13 = vld [vmem:[#allocation5 + $0x42c] sm:$0xf]  ;;  %v4867_v21 = vor.u32 %v6361_v17, %v4864_v18 }
 0x155   :  { %v4675_v19 = vor.u32 %v6313_v13, %v4672_v14  ;;  %v4659_v32 = vor.u32 %v6309_v54, %v4656_v23  ;;  %v6341_v13 = vld [vmem:[#allocation5 + $0x50c] sm:$0xf]  ;;  %v4784_v14 = vld [vmem:[#allocation5 + $0x518] sm:$0xf0] }
 0x156   :  { %1916 = vmatmul.bf16.vlgmr.msra.gmra.mxu2 %v6908_v29  ;;  %v4787_v18 = vor.u32 %v6341_v13, %v4784_v14  ;;  %v4960_v54 = vld [vmem:[#allocation5 + $0x678] sm:$0xf0]  ;;  %v5222_v14 = vld [vmem:[#allocation5 + $0x880] sm:$0xf] }
 0x157   :  { %2012 = vmatpush.bf16.msra.mxu2 %v5023_v26 }
 0x158   :  { %2039 = vmatpush.bf16.msrb.mxu0 %v4755_v24  ;;  %2004 = vmatpush.bf16.msra.mxu1 %v4815_v35  ;;  %v6379_v24 = vld [vmem:[#allocation5 + $0x634] sm:$0xf0]  ;;  %v4910_v35 = vld [vmem:[#allocation5 + $0x608] sm:$0xf] }
 0x159   :  { %v4927_v33 = vor.u32 %v6379_v24, %v4926_v22  ;;  %v6385_v22 = vld [vmem:[#allocation5 + $0x66c] sm:$0xf]  ;;  %v5070_v24 = vld [vmem:[#allocation5 + $0x748] sm:$0xf] }
 0x15b   :  { %2013 = vmatpush.bf16.msra.mxu2 %v5007_v40  ;;  %v6435_v40 = vld [vmem:[#allocation5 + $0x7f4] sm:$0xf0] }
 0x15c   :  { %2040 = vmatpush.bf16.msrb.mxu0 %v4739_v37  ;;  %2005 = vmatpush.bf16.msra.mxu1 %v4799_v45  ;;  %v5024_v45 = vld [vmem:[#allocation5 + $0x6f8] sm:$0xf0]  ;;  %v5151_v48 = vor.u32 %v6435_v40, %v5150_v39  ;;  %v6373_v39 = vld [vmem:[#allocation5 + $0x60c] sm:$0xf] }
 0x15d   :  { %v5027_v58 = vor.u32 %v6401_v43, %v5024_v45  ;;  %v4912_v40 = vld [vmem:[#allocation5 + $0x618] sm:$0xf0]  ;;  %v6429_v45 = vld [vmem:[#allocation5 + $0x7cc] sm:$0xf] }
 0x15e   :  { %v4915_v43 = vor.u32 %v6373_v39, %v4912_v40  ;;  %v6464_v39 = vld [vmem:[#allocation5 + $0x8e4] sm:$0xf] }
 0x15f   :  { %2014 = vmatpush.bf16.msra.mxu2 %v4991_v50  ;;  %v5134_v50 = vld [vmem:[#allocation5 + $0x7c8] sm:$0xf] }
 0x160   :  { %2041 = vmatpush.bf16.msrb.mxu0 %v4723_v46  ;;  %2006 = vmatpush.bf16.msra.mxu1 %v4783_v59  ;;  %v4911_v46 = vor.u32 %v6375_v38, %v4910_v35  ;;  %v6349_v59 = vld [vmem:[#allocation5 + $0x54c] sm:$0xf]  ;;  %v6407_v38 = vld [vmem:[#allocation5 + $0x714] sm:$0xf0] }
 0x163   :  { %v1043_v8 = vpop.f32.mrf.mxu0  ;;  %v1056_v9 = vpop.f32.mrf.mxu1  ;;  %2015 = vmatpush.bf16.msra.mxu2 %v4975_v61  ;;  %2007 = vmatmul.bf16.vlgmr.msra.gmra.mxu1 %v6903_v30  ;;  %v5135_v61 = vor.u32 %v6431_v1, %v5134_v50  ;;  %v6417_v1 = vld [vmem:[#allocation5 + $0x76c] sm:$0xf] }
 0x164   :  { %2042 = vmatpush.bf16.msrb.mxu0 %v4707_v60  ;;  %2051 = vmatpush.bf16.msrb.mxu1 %v4899_v3  ;;  %v1044_v15 = vadd.f32 %v1043_v8, %v233_v2  ;;  %v4816_v2 = vld [vmem:[#allocation5 + $0x558] sm:$0xf0]  ;;  %v6397_v60 = vld [vmem:[#allocation5 + $0x6cc] sm:$0xf] }
 0x165   :  { %v5008_v3 = vld [vmem:[#allocation5 + $0x6d8] sm:$0xf0]  ;;  %v4819_v62 = vor.u32 %v6349_v59, %v4816_v2 }
 0x166   :  { %1968 = vmatmul.bf16.vlgmr.msrb.gmra.mxu2 %v6908_v29  ;;  %v1057_v55 = vadd.f32 %v1056_v9, %v1044_v15  ;;  %v5011_v4 = vor.u32 %v6397_v60, %v5008_v3  ;;  %v4992_v8 = vld [vmem:[#allocation5 + $0x6b8] sm:$0xf0]  ;;  %v5119_v9 = vor.u32 %v6427_v5, %v5118_v63  ;;  %v6389_v15 = vld [vmem:[#allocation5 + $0x68c] sm:$0xf]  ;;  %v6466_v5 = vld [vmem:[#allocation5 + $0x8ec] sm:$0xf0] }
 0x167   :  { %2016 = vmatpush.bf16.msra.mxu2 %v4959_v11  ;;  %v5102_v11 = vld [vmem:[#allocation5 + $0x788] sm:$0xf]  ;;  %v5088_v59 = vld [vmem:[#allocation5 + $0x778] sm:$0xf0]  ;;  %v6413_v60 = vld [vmem:[#allocation5 + $0x74c] sm:$0xf] }
 0x168   :  { %2043 = vmatpush.bf16.msrb.mxu0 %v4691_v10  ;;  %2052 = vmatpush.bf16.msrb.mxu1 %v4883_v12  ;;  %v4803_v10 = vor.u32 %v6345_v6, %v4800_v7  ;;  %v5103_v17 = vor.u32 %v6423_v0, %v5102_v11  ;;  %v5091_v2 = vor.u32 %v6417_v1, %v5088_v59  ;;  %v5072_v3 = vld [vmem:[#allocation5 + $0x758] sm:$0xf0]  ;;  %v6462_v7 = vld [vmem:[#allocation5 + $0x8cc] sm:$0xf0]  ;;  %v5318_v1 = vld [vmem:[#allocation5 + $0x940] sm:$0xf] }
 0x169   :  { %v5056_v63 = vld [vmem:[#allocation5 + $0x738] sm:$0xf0]  ;;  %v6458_v0 = vld [vmem:[#allocation5 + $0x8ac] sm:$0xf0] }
 0x16a   :  { %v6478_v59 = vld [vmem:[#allocation5 + $0x94c] sm:$0xf0] }
 0x16b   :  { %v1069_v57 = vpop.f32.mrf.mxu2  ;;  %v1082_v26 = vpop.f32.mrf.mxu3  ;;  %2017 = vmatpush.bf16.msra.mxu2 %v4943_v20  ;;  %v5086_v20 = vld [vmem:[#allocation5 + $0x768] sm:$0xf] }
 0x16c   :  { %v1070_v27 = vadd.f32 %v1069_v57, %v1057_v55  ;;  %v1045_v28 = vpop.f32.mrf.mxu0  ;;  %v1058_v31 = vpop.f32.mrf.mxu1  ;;  %2044 = vmatpush.bf16.msrb.mxu0 %v4675_v19  ;;  %2053 = vmatpush.bf16.msrb.mxu1 %v4867_v21  ;;  %v4979_v19 = vor.u32 %v6389_v15, %v4976_v16  ;;  %v6419_v21 = vld [vmem:[#allocation5 + $0x774] sm:$0xf0]  ;;  %v4963_v55 = vor.u32 %v6385_v22, %v4960_v54  ;;  %v4944_v57 = vld [vmem:[#allocation5 + $0x658] sm:$0xf0]  ;;  %v6454_v15 = vld [vmem:[#allocation5 + $0x88c] sm:$0xf0] }
 0x16d   :  { %v5087_v23 = vor.u32 %v6419_v21, %v5086_v20  ;;  %v5054_v28 = vld [vmem:[#allocation5 + $0x728] sm:$0xf]  ;;  %v6411_v31 = vld [vmem:[#allocation5 + $0x734] sm:$0xf0]  ;;  %v5223_v16 = vor.u32 %v6454_v15, %v5222_v14  ;;  %v5398_v21 = vld [vmem:[#allocation5 + $0x9e0] sm:$0xf] }
 0x16e   :  { %v1083_v37 = vadd.f32 %v1082_v26, %v1070_v27  ;;  %v5071_v26 = vor.u32 %v6415_v25, %v5070_v24  ;;  %v4947_v27 = vor.u32 %v6381_v56, %v4944_v57  ;;  %v6498_v22 = vld [vmem:[#allocation5 + $0x9ec] sm:$0xf0]  ;;  %v5190_v54 = vld [vmem:[#allocation5 + $0x840] sm:$0xf] }
 0x16f   :  { %2018 = vmatpush.bf16.msra.mxu2 %v4927_v33  ;;  %v4928_v33 = vld [vmem:[#allocation5 + $0x638] sm:$0xf0]  ;;  %v5382_v24 = vld [vmem:[#allocation5 + $0x9c0] sm:$0xf]  ;;  %v6494_v25 = vld [vmem:[#allocation5 + $0x9cc] sm:$0xf0] }
 0x170   :  { %vm1089_vm7 = vcmp.ge.f32.partialorder %v1083_v37, 0.0  ;;  %v1093_v44 = vmul.f32 0.2, %v1083_v37  ;;  %2045 = vmatpush.bf16.msrb.mxu0 %v4659_v32  ;;  %2054 = vmatpush.bf16.msrb.mxu1 %v4851_v34  ;;  %v6377_v32 = vld [vmem:[#allocation5 + $0x62c] sm:$0xf]  ;;  %v5055_v34 = vor.u32 %v6411_v31, %v5054_v28  ;;  %v5383_v57 = vor.u32 %v6494_v25, %v5382_v24 }
 0x171   :  { %v4931_v35 = vor.u32 %v6377_v32, %v4928_v33  ;;  %v5366_v28 = vld [vmem:[#allocation5 + $0x9a0] sm:$0xf]  ;;  %v6490_v32 = vld [vmem:[#allocation5 + $0x9ac] sm:$0xf0] }
 0x172   :  { %v1097_v47 = vsel %vm1089_vm7, %v1083_v37, %v1093_v44  ;;  %v5038_v37 = vld [vmem:[#allocation5 + $0x708] sm:$0xf]  ;;  %v5155_v44 = vor.u32 %v6433_v41, %v5152_v42  ;;  %v5158_v33 = vld [vmem:[#allocation5 + $0x800] sm:$0xf]  ;;  %v5272_v41 = vld [vmem:[#allocation5 + $0x8f0] sm:$0xf0] }
 0x173   :  { %v6916_v51 = vpack.c.bf16 %v1097_v47, %v1097_v47  ;;  %v1071_v52 = vpop.f32.mrf.mxu2  ;;  %v1084_v53 = vpop.f32.mrf.mxu3  ;;  %2046 = vmatmul.bf16.vlgmr.msrb.gmra.mxu0 %v6900_v36  ;;  %2019 = vmatpush.bf16.msra.mxu2 %v4911_v46  ;;  %v6393_v36 = vld [vmem:[#allocation5 + $0x6ac] sm:$0xf]  ;;  %v5136_v46 = vld [vmem:[#allocation5 + $0x7d8] sm:$0xf0]  ;;  %v6470_v14 = vld [vmem:[#allocation5 + $0x90c] sm:$0xf0] }
 0x174   :  { %2055 = vmatpush.bf16.msrb.mxu1 %v4835_v49  ;;  %v4995_v12 = vor.u32 %v6393_v36, %v4992_v8  ;;  %v5139_v47 = vor.u32 %v6429_v45, %v5136_v46  ;;  %v5120_v49 = vld [vmem:[#allocation5 + $0x7b8] sm:$0xf0]  ;;  %v6421_v52 = vld [vmem:[#allocation5 + $0x78c] sm:$0xf]  ;;  %v5334_v45 = vld [vmem:[#allocation5 + $0x960] sm:$0xf] }
 0x175   :  { %1929 = vmatmul.bf16.vlgmr.msra.gmra.mxu3 %v6916_v51  ;;  %v5104_v53 = vld [vmem:[#allocation5 + $0x798] sm:$0xf0]  ;;  %v6482_v46 = vld [vmem:[#allocation5 + $0x96c] sm:$0xf0]  ;;  %v5478_v15 = vld [vmem:[#allocation5 + $0xa80] sm:$0xf] }
 0x176   :  { %2025 = vmatpush.bf16.msra.mxu3 %v5151_v48  ;;  %2020 = vmatmul.bf16.vlgmr.msra.gmra.mxu2 %v6908_v29  ;;  %v6425_v48 = vld [vmem:[#allocation5 + $0x7ac] sm:$0xf] }
 0x177   :  { %2064 = vmatpush.bf16.msrb.mxu2 %v5027_v58  ;;  %v5123_v50 = vor.u32 %v6425_v48, %v5120_v49  ;;  %v5107_v58 = vor.u32 %v6421_v52, %v5104_v53  ;;  %v5335_v48 = vor.u32 %v6482_v46, %v5334_v45  ;;  %v6530_v49 = vld [vmem:[#allocation5 + $0xaec] sm:$0xf0]  ;;  %v5256_v52 = vld [vmem:[#allocation5 + $0x8d0] sm:$0xf0] }
 0x178   :  { %2056 = vmatpush.bf16.msrb.mxu1 %v4819_v62  ;;  %v6409_v62 = vld [vmem:[#allocation5 + $0x72c] sm:$0xf] }
 0x179   :  { %v5059_v36 = vor.u32 %v6409_v62, %v5056_v63  ;;  %v5319_v62 = vor.u32 %v6478_v59, %v5318_v1  ;;  %v5352_v59 = vld [vmem:[#allocation5 + $0x990] sm:$0xf0] }
 0x17a   :  { %2026 = vmatpush.bf16.msra.mxu3 %v5135_v61  ;;  %v5075_v61 = vor.u32 %v6413_v60, %v5072_v3  ;;  %v6526_v60 = vld [vmem:[#allocation5 + $0xacc] sm:$0xf0]  ;;  %v6456_v3 = vld [vmem:[#allocation5 + $0x8a4] sm:$0xf] }
 0x17b   :  { %2065 = vmatpush.bf16.msrb.mxu2 %v5011_v4  ;;  %v5270_v4 = vld [vmem:[#allocation5 + $0x8e0] sm:$0xf] }
 0x17c   :  { %2057 = vmatpush.bf16.msrb.mxu1 %v4803_v10  ;;  %v5271_v6 = vor.u32 %v6466_v5, %v5270_v4  ;;  %v5040_v10 = vld [vmem:[#allocation5 + $0x718] sm:$0xf0] }
 0x17e   :  { %2027 = vmatpush.bf16.msra.mxu3 %v5119_v9  ;;  %2886 = vmatpush.bf16.msra.mxu0 %v5271_v6  ;;  %v6405_v9 = vld [vmem:[#allocation5 + $0x70c] sm:$0xf] }
 0x17f   :  { %2066 = vmatpush.bf16.msrb.mxu2 %v4995_v12  ;;  %v5043_v11 = vor.u32 %v6405_v9, %v5040_v10  ;;  %v5238_v12 = vld [vmem:[#allocation5 + $0x8a0] sm:$0xf]  ;;  %v6522_v9 = vld [vmem:[#allocation5 + $0xaac] sm:$0xf0]  ;;  %v6452_v10 = vld [vmem:[#allocation5 + $0x884] sm:$0xf] }
 0x180   :  { %2058 = vmatpush.bf16.msrb.mxu1 %v4787_v18  ;;  %v5239_v13 = vor.u32 %v6458_v0, %v5238_v12  ;;  %v5206_v18 = vld [vmem:[#allocation5 + $0x860] sm:$0xf] }
 0x182   :  { %2028 = vmatpush.bf16.msra.mxu3 %v5103_v17 }
 0x183   :  { %2067 = vmatpush.bf16.msrb.mxu2 %v4979_v19  ;;  %2059 = vmatmul.bf16.vlgmr.msrb.gmra.mxu1 %v6903_v30  ;;  %v5039_v30 = vor.u32 %v6407_v38, %v5038_v37  ;;  %v6450_v19 = vld [vmem:[#allocation5 + $0x86c] sm:$0xf0]  ;;  %v5350_v37 = vld [vmem:[#allocation5 + $0x980] sm:$0xf] }
 0x184   :  { %v5207_v20 = vor.u32 %v6450_v19, %v5206_v18  ;;  %v6486_v38 = vld [vmem:[#allocation5 + $0x98c] sm:$0xf0]  ;;  %v6448_v19 = vld [vmem:[#allocation5 + $0x864] sm:$0xf] }
 0x185   :  { %1981 = vmatmul.bf16.vlgmr.msrb.gmra.mxu3 %v6916_v51  ;;  %v5351_v42 = vor.u32 %v6486_v38, %v5350_v37  ;;  %v6518_v18 = vld [vmem:[#allocation5 + $0xa8c] sm:$0xf0]  ;;  %v6440_v38 = vld [vmem:[#allocation5 + $0x824] sm:$0xf] }
 0x186   :  { %2029 = vmatpush.bf16.msra.mxu3 %v5087_v23  ;;  %v5399_v23 = vor.u32 %v6498_v22, %v5398_v21  ;;  %v5479_v21 = vor.u32 %v6518_v18, %v5478_v15  ;;  %v6524_v15 = vld [vmem:[#allocation5 + $0xac4] sm:$0xf]  ;;  %v5512_v18 = vld [vmem:[#allocation5 + $0xad0] sm:$0xf0] }
 0x187   :  { %2068 = vmatpush.bf16.msrb.mxu2 %v4963_v55  ;;  %v6446_v55 = vld [vmem:[#allocation5 + $0x84c] sm:$0xf0] }
 0x188   :  { %v5191_v56 = vor.u32 %v6446_v55, %v5190_v54  ;;  %2899 = vmatpush.bf16.msra.mxu1 %v5399_v23  ;;  %v6496_v54 = vld [vmem:[#allocation5 + $0x9e4] sm:$0xf]  ;;  %v5400_v23 = vld [vmem:[#allocation5 + $0x9f0] sm:$0xf0] }
 0x189   :  { %v5403_v25 = vor.u32 %v6496_v54, %v5400_v23  ;;  %v6472_v54 = vld [vmem:[#allocation5 + $0x924] sm:$0xf]  ;;  %v5304_v23 = vld [vmem:[#allocation5 + $0x930] sm:$0xf0] }
 0x18a   :  { %2030 = vmatpush.bf16.msra.mxu3 %v5071_v26 }
 0x18b   :  { %2069 = vmatpush.bf16.msrb.mxu2 %v4947_v27  ;;  %v6442_v27 = vld [vmem:[#allocation5 + $0x82c] sm:$0xf0] }
 0x18c   :  { %2900 = vmatpush.bf16.msra.mxu1 %v5383_v57  ;;  %v6514_v57 = vld [vmem:[#allocation5 + $0xa6c] sm:$0xf0] }
 0x18e   :  { %2031 = vmatpush.bf16.msra.mxu3 %v5055_v34  ;;  %v6438_v34 = vld [vmem:[#allocation5 + $0x80c] sm:$0xf0] }
 0x18f   :  { %2070 = vmatpush.bf16.msrb.mxu2 %v4931_v35  ;;  %v5367_v35 = vor.u32 %v6490_v32, %v5366_v28  ;;  %v5159_v40 = vor.u32 %v6438_v34, %v5158_v33  ;;  %v6492_v28 = vld [vmem:[#allocation5 + $0x9c4] sm:$0xf]  ;;  %v5446_v34 = vld [vmem:[#allocation5 + $0xa40] sm:$0xf] }
 0x191   :  { %2901 = vmatpush.bf16.msra.mxu1 %v5367_v35  ;;  %v6510_v35 = vld [vmem:[#allocation5 + $0xa4c] sm:$0xf0] }
 0x192   :  { %2032 = vmatpush.bf16.msra.mxu3 %v5039_v30  ;;  %v5275_v30 = vor.u32 %v6464_v39, %v5272_v41  ;;  %v5447_v37 = vor.u32 %v6510_v35, %v5446_v34  ;;  %v5176_v39 = vld [vmem:[#allocation5 + $0x830] sm:$0xf0]  ;;  %v6468_v34 = vld [vmem:[#allocation5 + $0x904] sm:$0xf] }
 0x193   :  { %2071 = vmatpush.bf16.msrb.mxu2 %v4915_v43  ;;  %v5179_v41 = vor.u32 %v6440_v38, %v5176_v39  ;;  %v5288_v35 = vld [vmem:[#allocation5 + $0x910] sm:$0xf0] }
 0x194   :  { %v5291_v38 = vor.u32 %v6468_v34, %v5288_v35  ;;  %v5480_v39 = vld [vmem:[#allocation5 + $0xa90] sm:$0xf0] }
 0x195   :  { %2033 = vmatmul.bf16.vlgmr.msra.gmra.mxu3 %v6916_v51  ;;  %2902 = vmatpush.bf16.msra.mxu1 %v5351_v42  ;;  %v5368_v42 = vld [vmem:[#allocation5 + $0x9b0] sm:$0xf0] }
 0x196   :  { %2077 = vmatpush.bf16.msrb.mxu3 %v5155_v44  ;;  %2072 = vmatmul.bf16.vlgmr.msrb.gmra.mxu2 %v6908_v29  ;;  %v5254_v29 = vld [vmem:[#allocation5 + $0x8c0] sm:$0xf]  ;;  %v5640_v34 = vld [vmem:[#allocation5 + $0xbd0] sm:$0xf0] }
 0x197   :  { %v5255_v8 = vor.u32 %v6462_v7, %v5254_v29  ;;  %v5302_v29 = vld [vmem:[#allocation5 + $0x920] sm:$0xf]  ;;  %v6474_v7 = vld [vmem:[#allocation5 + $0x92c] sm:$0xf0] }
 0x199   :  { %2887 = vmatpush.bf16.msra.mxu0 %v5255_v8  ;;  %2903 = vmatpush.bf16.msra.mxu1 %v5335_v48  ;;  %v5303_v8 = vor.u32 %v6474_v7, %v5302_v29  ;;  %v5430_v48 = vld [vmem:[#allocation5 + $0xa20] sm:$0xf]  ;;  %v6528_v7 = vld [vmem:[#allocation5 + $0xae4] sm:$0xf] }
 0x19a   :  { %2078 = vmatpush.bf16.msrb.mxu3 %v5139_v47  ;;  %v5526_v47 = vld [vmem:[#allocation5 + $0xae0] sm:$0xf] }
 0x19b   :  { %v5527_v53 = vor.u32 %v6530_v49, %v5526_v47  ;;  %v6506_v49 = vld [vmem:[#allocation5 + $0xa2c] sm:$0xf0] }
 0x19d   :  { %2888 = vmatpush.bf16.msra.mxu0 %v5239_v13  ;;  %2912 = vmatpush.bf16.msra.mxu2 %v5527_v53  ;;  %v5286_v13 = vld [vmem:[#allocation5 + $0x900] sm:$0xf]  ;;  %v5160_v53 = vld [vmem:[#allocation5 + $0x810] sm:$0xf0] }
 0x19e   :  { %2079 = vmatpush.bf16.msrb.mxu3 %v5123_v50  ;;  %v6460_v50 = vld [vmem:[#allocation5 + $0x8c4] sm:$0xf]  ;;  %2904 = vmatpush.bf16.msra.mxu1 %v5319_v62 }
 0x1a1   :  { %2889 = vmatpush.bf16.msra.mxu0 %v5223_v16  ;;  %v5287_v16 = vor.u32 %v6470_v14, %v5286_v13  ;;  %v6476_v13 = vld [vmem:[#allocation5 + $0x944] sm:$0xf]  ;;  %v5320_v14 = vld [vmem:[#allocation5 + $0x950] sm:$0xf0] }
 0x1a2   :  { %2080 = vmatpush.bf16.msrb.mxu3 %v5107_v58  ;;  %v5259_v58 = vor.u32 %v6460_v50, %v5256_v52  ;;  %2905 = vmatpush.bf16.msra.mxu1 %v5303_v8  ;;  %v5431_v50 = vor.u32 %v6506_v49, %v5430_v48  ;;  %v6436_v52 = vld [vmem:[#allocation5 + $0x804] sm:$0xf]  ;;  %v5464_v49 = vld [vmem:[#allocation5 + $0xa70] sm:$0xf0] }
 0x1a3   :  { %v5163_v1 = vor.u32 %v6436_v52, %v5160_v53  ;;  %v6512_v48 = vld [vmem:[#allocation5 + $0xa64] sm:$0xf] }
 0x1a5   :  { %2890 = vmatpush.bf16.msra.mxu0 %v5207_v20  ;;  %v5208_v20 = vld [vmem:[#allocation5 + $0x870] sm:$0xf0] }
 0x1a6   :  { %2081 = vmatpush.bf16.msrb.mxu3 %v5091_v2  ;;  %v5510_v2 = vld [vmem:[#allocation5 + $0xac0] sm:$0xf]  ;;  %v5211_v22 = vor.u32 %v6448_v19, %v5208_v20  ;;  %2906 = vmatpush.bf16.msra.mxu1 %v5287_v16  ;;  %v5323_v16 = vor.u32 %v6476_v13, %v5320_v14  ;;  %v5515_v19 = vor.u32 %v6524_v15, %v5512_v18  ;;  %v6534_v15 = vld [vmem:[#allocation5 + $0xb0c] sm:$0xf0]  ;;  %v5416_v18 = vld [vmem:[#allocation5 + $0xa10] sm:$0xf0] }
 0x1a7   :  { %v5511_v63 = vor.u32 %v6526_v60, %v5510_v2  ;;  %v5414_v60 = vld [vmem:[#allocation5 + $0xa00] sm:$0xf] }
 0x1a8   :  { %v5622_v20 = vld [vmem:[#allocation5 + $0xba0] sm:$0xf] }
 0x1a9   :  { %2891 = vmatpush.bf16.msra.mxu0 %v5191_v56  ;;  %2913 = vmatpush.bf16.msra.mxu2 %v5511_v63  ;;  %v5462_v56 = vld [vmem:[#allocation5 + $0xa60] sm:$0xf]  ;;  %v6562_v63 = vld [vmem:[#allocation5 + $0xbec] sm:$0xf0] }
 0x1aa   :  { %2082 = vmatpush.bf16.msrb.mxu3 %v5075_v61  ;;  %v5240_v61 = vld [vmem:[#allocation5 + $0x8b0] sm:$0xf0]  ;;  %2951 = vmatpush.bf16.msrb.mxu1 %v5403_v25  ;;  %v6520_v25 = vld [vmem:[#allocation5 + $0xaa4] sm:$0xf] }
 0x1ab   :  { %v5243_v4 = vor.u32 %v6456_v3, %v5240_v61  ;;  %v6502_v3 = vld [vmem:[#allocation5 + $0xa0c] sm:$0xf0]  ;;  %v5654_v61 = vld [vmem:[#allocation5 + $0xbe0] sm:$0xf] }
 0x1ac   :  { %v5415_v62 = vor.u32 %v6502_v3, %v5414_v60  ;;  %v6508_v60 = vld [vmem:[#allocation5 + $0xa44] sm:$0xf]  ;;  %v5448_v3 = vld [vmem:[#allocation5 + $0xa50] sm:$0xf0] }
 0x1ae   :  { %2083 = vmatpush.bf16.msrb.mxu3 %v5059_v36  ;;  %v5494_v36 = vld [vmem:[#allocation5 + $0xaa0] sm:$0xf] }
 0x1af   :  { %v5495_v12 = vor.u32 %v6522_v9, %v5494_v36  ;;  %v5528_v36 = vld [vmem:[#allocation5 + $0xaf0] sm:$0xf0] }
 0x1b0   :  { %v6926_v17 = vpop.f32.mrf.mxu0 }
 0x1b1   :  { %2914 = vmatpush.bf16.msra.mxu2 %v5495_v12  ;;  %v6558_v12 = vld [vmem:[#allocation5 + $0xbcc] sm:$0xf0] }
 0x1b2   :  { %2084 = vmatpush.bf16.msrb.mxu3 %v5043_v11  ;;  %v5224_v11 = vld [vmem:[#allocation5 + $0x890] sm:$0xf0] }
 0x1b3   :  { %v5227_v0 = vor.u32 %v6452_v10, %v5224_v11  ;;  %v5531_v10 = vor.u32 %v6528_v7, %v5528_v36  ;;  %v5638_v11 = vld [vmem:[#allocation5 + $0xbc0] sm:$0xf]  ;;  %v6504_v7 = vld [vmem:[#allocation5 + $0xa24] sm:$0xf]  ;;  %v5432_v36 = vld [vmem:[#allocation5 + $0xa30] sm:$0xf0] }
 0x1b5   :  { %2085 = vmatmul.bf16.vlgmr.msrb.gmra.mxu3 %v6916_v51  ;;  %v5174_v51 = vld [vmem:[#allocation5 + $0x820] sm:$0xf]  ;;  %2915 = vmatpush.bf16.msra.mxu2 %v5479_v21  ;;  %v6554_v21 = vld [vmem:[#allocation5 + $0xbac] sm:$0xf0] }
 0x1b6   :  { %v5175_v31 = vor.u32 %v6442_v27, %v5174_v51  ;;  %v5463_v51 = vor.u32 %v6514_v57, %v5462_v56  ;;  %v5192_v27 = vld [vmem:[#allocation5 + $0x850] sm:$0xf0]  ;;  %v5307_v56 = vor.u32 %v6472_v54, %v5304_v23  ;;  %v6560_v54 = vld [vmem:[#allocation5 + $0xbe4] sm:$0xf] }
 0x1b7   :  { %v5496_v57 = vld [vmem:[#allocation5 + $0xab0] sm:$0xf0] }
 0x1b8   :  { %v1893_v26 = vpop.f32.mrf.mxu0  ;;  %2892 = vmatpush.bf16.msra.mxu0 %v5175_v31  ;;  %v5384_v31 = vld [vmem:[#allocation5 + $0x9d0] sm:$0xf0] }
 0x1b9   :  { %v6444_v26 = vld [vmem:[#allocation5 + $0x844] sm:$0xf]  ;;  %v5387_v33 = vor.u32 %v6492_v28, %v5384_v31  ;;  %2916 = vmatpush.bf16.msra.mxu2 %v5463_v51  ;;  %v5606_v31 = vld [vmem:[#allocation5 + $0xb80] sm:$0xf]  ;;  %v5656_v23 = vld [vmem:[#allocation5 + $0xbf0] sm:$0xf0] }
 0x1ba   :  { %v5195_v32 = vor.u32 %v6444_v26, %v5192_v27  ;;  %v5499_v27 = vor.u32 %v6520_v25, %v5496_v57  ;;  %v6942_v28 = vld [vmem:[#allocation7 + $0x4] sm:$0xf] }
 0x1bb   :  { %2952 = vmatpush.bf16.msrb.mxu1 %v5387_v33  ;;  %v1235_v25 = vperm.slane %v6942_v28, 1 }
 0x1bc   :  { %2893 = vmatpush.bf16.msra.mxu0 %v5159_v40  ;;  %v6488_v40 = vld [vmem:[#allocation5 + $0x9a4] sm:$0xf] }
 0x1bd   :  { %v5371_v46 = vor.u32 %v6488_v40, %v5368_v42  ;;  %2917 = vmatpush.bf16.msra.mxu2 %v5447_v37  ;;  %v6516_v37 = vld [vmem:[#allocation5 + $0xa84] sm:$0xf]  ;;  %v1234_v40 = vperm.slane %v6942_v28, 0 }
 0x1bf   :  { %2953 = vmatpush.bf16.msrb.mxu1 %v5371_v46  ;;  %v6546_v46 = vld [vmem:[#allocation5 + $0xb6c] sm:$0xf0]  ;;  %v1892_v52 = vadd.f32 %v6926_v17, %v1234_v40 }
 0x1c0   :  { %v6928_v43 = vpop.f32.mrf.mxu1  ;;  %v6930_v44 = vpop.f32.mrf.mxu0  ;;  %2938 = vmatpush.bf16.msrb.mxu0 %v5275_v30 }
 0x1c1   :  { %2918 = vmatpush.bf16.msra.mxu2 %v5431_v50  ;;  %v5467_v50 = vor.u32 %v6512_v48, %v5464_v49  ;;  %v1944_v35 = vadd.f32 %v6930_v44, %v1235_v25  ;;  %v6451_v44 = vld [vmem:[#allocation5 + $0x874] sm:$0xf0]  ;;  %v5166_v25 = vld [vmem:[#allocation5 + $0x808] sm:$0xf] }
 0x1c4   :  { %2939 = vmatpush.bf16.msrb.mxu0 %v5259_v58  ;;  %v6484_v58 = vld [vmem:[#allocation5 + $0x984] sm:$0xf] }
 0x1c5   :  { %v5355_v2 = vor.u32 %v6484_v58, %v5352_v59  ;;  %2919 = vmatpush.bf16.msra.mxu2 %v5415_v62  ;;  %v5574_v58 = vld [vmem:[#allocation5 + $0xb40] sm:$0xf]  ;;  %v1905_v59 = vadd.f32 %v6928_v43, %v1892_v52  ;;  %v5435_v43 = vor.u32 %v6504_v7, %v5432_v36  ;;  %v6544_v7 = vld [vmem:[#allocation5 + $0xb64] sm:$0xf]  ;;  %v5592_v36 = vld [vmem:[#allocation5 + $0xb70] sm:$0xf0] }
 0x1c7   :  { %2954 = vmatpush.bf16.msrb.mxu1 %v5355_v2 }
 0x1c8   :  { %v1906_v5 = vpop.f32.mrf.mxu1  ;;  %v1945_v6 = vpop.f32.mrf.mxu0  ;;  %2940 = vmatpush.bf16.msrb.mxu0 %v5243_v4  ;;  %v6480_v4 = vld [vmem:[#allocation5 + $0x964] sm:$0xf] }
 0x1c9   :  { %v5336_v5 = vld [vmem:[#allocation5 + $0x970] sm:$0xf0]  ;;  %v5655_v6 = vor.u32 %v6562_v63, %v5654_v61  ;;  %2964 = vmatpush.bf16.msrb.mxu2 %v5531_v10  ;;  %v5451_v61 = vor.u32 %v6508_v60, %v5448_v3  ;;  %v6467_v10 = vld [vmem:[#allocation5 + $0x8f4] sm:$0xf0] }
 0x1ca   :  { %v5339_v29 = vor.u32 %v6480_v4, %v5336_v5  ;;  %v5558_v5 = vld [vmem:[#allocation5 + $0xb20] sm:$0xf]  ;;  %v5608_v60 = vld [vmem:[#allocation5 + $0xb90] sm:$0xf0] }
 0x1cb   :  { %2925 = vmatpush.bf16.msra.mxu3 %v5655_v6  ;;  %v6538_v6 = vld [vmem:[#allocation5 + $0xb2c] sm:$0xf0] }
 0x1cc   :  { %2941 = vmatpush.bf16.msrb.mxu0 %v5227_v0  ;;  %2955 = vmatpush.bf16.msrb.mxu1 %v5339_v29  ;;  %v5639_v0 = vor.u32 %v6558_v12, %v5638_v11  ;;  %v5559_v17 = vor.u32 %v6538_v6, %v5558_v5  ;;  %v6447_v5 = vld [vmem:[#allocation5 + $0x854] sm:$0xf0]  ;;  %v5390_v6 = vld [vmem:[#allocation5 + $0x9c8] sm:$0xf] }
 0x1cd   :  { %2965 = vmatpush.bf16.msrb.mxu2 %v5515_v19 }
 0x1cf   :  { %2926 = vmatpush.bf16.msra.mxu3 %v5639_v0  ;;  %v5262_v0 = vld [vmem:[#allocation5 + $0x8c8] sm:$0xf] }
 0x1d0   :  { %v6932_v55 = vpop.f32.mrf.mxu1  ;;  %v6934_v24 = vpop.f32.mrf.mxu0  ;;  %2942 = vmatpush.bf16.msrb.mxu0 %v5211_v22  ;;  %2956 = vmatpush.bf16.msrb.mxu1 %v5323_v16  ;;  %v5623_v22 = vor.u32 %v6554_v21, %v5622_v20  ;;  %v6500_v16 = vld [vmem:[#allocation5 + $0xa04] sm:$0xf]  ;;  %v6463_v20 = vld [vmem:[#allocation5 + $0x8d4] sm:$0xf0] }
 0x1d1   :  { %2966 = vmatpush.bf16.msrb.mxu2 %v5499_v27  ;;  %v5246_v27 = vld [vmem:[#allocation5 + $0x8a8] sm:$0xf] }
 0x1d3   :  { %2927 = vmatpush.bf16.msra.mxu3 %v5623_v22  ;;  %v5419_v22 = vor.u32 %v6500_v16, %v5416_v18  ;;  %v6540_v16 = vld [vmem:[#allocation5 + $0xb44] sm:$0xf]  ;;  %v5576_v18 = vld [vmem:[#allocation5 + $0xb50] sm:$0xf0] }
 0x1d4   :  { %2943 = vmatpush.bf16.msrb.mxu0 %v5195_v32  ;;  %v6550_v32 = vld [vmem:[#allocation5 + $0xb8c] sm:$0xf0]  ;;  %2957 = vmatpush.bf16.msrb.mxu1 %v5307_v56  ;;  %v5659_v56 = vor.u32 %v6560_v54, %v5656_v23 }
 0x1d5   :  { %v5607_v33 = vor.u32 %v6550_v32, %v5606_v31  ;;  %v6459_v32 = vld [vmem:[#allocation5 + $0x8b4] sm:$0xf0] }
 0x1d6   :  { %v5247_v40 = vor.u32 %v6459_v32, %v5246_v27  ;;  %v6536_v27 = vld [vmem:[#allocation5 + $0xb24] sm:$0xf]  ;;  %v5560_v32 = vld [vmem:[#allocation5 + $0xb30] sm:$0xf0] }
 0x1d7   :  { %2928 = vmatpush.bf16.msra.mxu3 %v5607_v33  ;;  %v6556_v33 = vld [vmem:[#allocation5 + $0xbc4] sm:$0xf] }
 0x1d8   :  { %v1958_v45 = vpop.f32.mrf.mxu1  ;;  %v1997_v47 = vpop.f32.mrf.mxu0  ;;  %2944 = vmatpush.bf16.msrb.mxu0 %v5179_v41  ;;  %v5483_v41 = vor.u32 %v6516_v37, %v5480_v39  ;;  %2958 = vmatpush.bf16.msrb.mxu1 %v5291_v38  ;;  %v5643_v38 = vor.u32 %v6556_v33, %v5640_v34  ;;  %v1957_v39 = vadd.f32 %v6932_v55, %v1944_v35  ;;  %v6548_v55 = vld [vmem:[#allocation5 + $0xb84] sm:$0xf]  ;;  %v6465_v34 = vld [vmem:[#allocation5 + $0x8ec] sm:$0xf]  ;;  %v5280_v35 = vld [vmem:[#allocation5 + $0x8f8] sm:$0xf0] }
 0x1d9   :  { %v6936_v30 = vpop.f32.mrf.mxu2  ;;  %v5590_v45 = vld [vmem:[#allocation5 + $0xb60] sm:$0xf] }
 0x1da   :  { %2967 = vmatpush.bf16.msrb.mxu2 %v5483_v41  ;;  %v5591_v47 = vor.u32 %v6546_v46, %v5590_v45  ;;  %v1918_v62 = vadd.f32 %v6936_v30, %v1905_v59  ;;  %v5542_v30 = vld [vmem:[#allocation5 + $0xb00] sm:$0xf]  ;;  %v5230_v41 = vld [vmem:[#allocation5 + $0x888] sm:$0xf]  ;;  %v6455_v45 = vld [vmem:[#allocation5 + $0x894] sm:$0xf0] }
 0x1db   :  { %v5543_v21 = vor.u32 %v6534_v15, %v5542_v30  ;;  %v6552_v46 = vld [vmem:[#allocation5 + $0xba4] sm:$0xf]  ;;  %v5182_v30 = vld [vmem:[#allocation5 + $0x828] sm:$0xf]  ;;  %v6491_v15 = vld [vmem:[#allocation5 + $0x9b4] sm:$0xf0] }
 0x1dc   :  { %2945 = vmatpush.bf16.msrb.mxu0 %v5163_v1  ;;  %2929 = vmatpush.bf16.msra.mxu3 %v5591_v47  ;;  %v6542_v1 = vld [vmem:[#allocation5 + $0xb4c] sm:$0xf0]  ;;  %v5624_v47 = vld [vmem:[#allocation5 + $0xbb0] sm:$0xf0] }
 0x1dd   :  { %v5575_v2 = vor.u32 %v6542_v1, %v5574_v58  ;;  %v5627_v49 = vor.u32 %v6552_v46, %v5624_v47  ;;  %v5214_v58 = vld [vmem:[#allocation5 + $0x868] sm:$0xf]  ;;  %v6531_v47 = vld [vmem:[#allocation5 + $0xaf4] sm:$0xf0] }
 0x1de   :  { %2968 = vmatpush.bf16.msrb.mxu2 %v5467_v50  ;;  %v5406_v1 = vld [vmem:[#allocation5 + $0x9e8] sm:$0xf] }
 0x1df   :  { %v5534_v46 = vld [vmem:[#allocation5 + $0xae8] sm:$0xf] }
 0x1e0   :  { %v6938_v9 = vpop.f32.mrf.mxu1  ;;  %2930 = vmatpush.bf16.msra.mxu3 %v5575_v2  ;;  %v6499_v2 = vld [vmem:[#allocation5 + $0x9f4] sm:$0xf0] }
 0x1e1   :  { %v1919_v8 = vpop.f32.mrf.mxu2 }
 0x1e2   :  { %2969 = vmatpush.bf16.msrb.mxu2 %v5451_v61  ;;  %v5278_v8 = vld [vmem:[#allocation5 + $0x8e8] sm:$0xf]  ;;  %v5611_v61 = vor.u32 %v6548_v55, %v5608_v60 }
 0x1e3   :  { %v5279_v14 = vor.u32 %v6467_v10, %v5278_v8  ;;  %v1236_v8 = vperm.slane %v6942_v28, 2  ;;  %v5595_v10 = vor.u32 %v6544_v7, %v5592_v36  ;;  %v5326_v60 = vld [vmem:[#allocation5 + $0x948] sm:$0xf] }
 0x1e4   :  { %2931 = vmatpush.bf16.msra.mxu3 %v5559_v17  ;;  %v6495_v17 = vld [vmem:[#allocation5 + $0x9d4] sm:$0xf0]  ;;  %v5310_v36 = vld [vmem:[#allocation5 + $0x928] sm:$0xf] }
 0x1e6   :  { %2970 = vmatpush.bf16.msrb.mxu2 %v5435_v43 }
 0x1e8   :  { %v2010_v51 = vpop.f32.mrf.mxu1  ;;  %2932 = vmatpush.bf16.msra.mxu3 %v5543_v21  ;;  %v5579_v21 = vor.u32 %v6540_v16, %v5576_v18  ;;  %v6471_v16 = vld [vmem:[#allocation5 + $0x914] sm:$0xf0]  ;;  %v5486_v18 = vld [vmem:[#allocation5 + $0xa88] sm:$0xf] }
 0x1e9   :  { %v6940_v26 = vpop.f32.mrf.mxu2  ;;  %v5263_v51 = vor.u32 %v6463_v20, %v5262_v0  ;;  %v5391_v0 = vor.u32 %v6495_v17, %v5390_v6  ;;  %v1996_v20 = vadd.f32 %v6934_v24, %v1236_v8  ;;  %v6475_v8 = vld [vmem:[#allocation5 + $0x934] sm:$0xf0] }
 0x1ea   :  { %2971 = vmatpush.bf16.msrb.mxu2 %v5419_v22  ;;  %v1970_v48 = vadd.f32 %v6940_v26, %v1957_v39  ;;  %v5407_v26 = vor.u32 %v6499_v2, %v5406_v1  ;;  %v5535_v2 = vor.u32 %v6531_v47, %v5534_v46  ;;  %v6441_v46 = vld [vmem:[#allocation5 + $0x82c] sm:$0xf]  ;;  %v5184_v47 = vld [vmem:[#allocation5 + $0x838] sm:$0xf0] }
 0x1eb   :  { %v2009_v22 = vadd.f32 %v6938_v9, %v1996_v20  ;;  %v6519_v20 = vld [vmem:[#allocation5 + $0xa94] sm:$0xf0] }
 0x1ec   :  { %2977 = vmatpush.bf16.msrb.mxu3 %v5659_v56  ;;  %v6439_v56 = vld [vmem:[#allocation5 + $0x814] sm:$0xf0] }
 0x1f0   :  { %v6945_v42 = vpop.f32.mrf.mxu0  ;;  %2978 = vmatpush.bf16.msrb.mxu3 %v5643_v38  ;;  %v5342_v38 = vld [vmem:[#allocation5 + $0x968] sm:$0xf] }
 0x1f1   :  { %v1971_v53 = vpop.f32.mrf.mxu2 }
 0x1f2   :  { %v5231_v53 = vor.u32 %v6455_v45, %v5230_v41  ;;  %v6483_v45 = vld [vmem:[#allocation5 + $0x974] sm:$0xf0] }
 0x1f3   :  { %v5343_v1 = vor.u32 %v6483_v45, %v5342_v38  ;;  %v6511_v45 = vld [vmem:[#allocation5 + $0xa54] sm:$0xf0] }
 0x1f4   :  { %2979 = vmatpush.bf16.msrb.mxu3 %v5627_v49  ;;  %v6461_v49 = vld [vmem:[#allocation5 + $0x8cc] sm:$0xf] }
 0x1f8   :  { %v1930_v63 = vpop.f32.mrf.mxu3  ;;  %v2049_v4 = vpop.f32.mrf.mxu0  ;;  %2980 = vmatpush.bf16.msrb.mxu3 %v5611_v61  ;;  %v5518_v61 = vld [vmem:[#allocation5 + $0xac8] sm:$0xf] }
 0x1f9   :  { %v1931_v29 = vadd.f32 %v1930_v63, %v1918_v62  ;;  %v6950_v12 = vpop.f32.mrf.mxu2  ;;  %v5215_v63 = vor.u32 %v6451_v44, %v5214_v58  ;;  %v5198_v4 = vld [vmem:[#allocation5 + $0x848] sm:$0xf] }
 0x1fa   :  { %v2022_v33 = vadd.f32 %v6950_v12, %v2009_v22  ;;  %v5544_v12 = vld [vmem:[#allocation5 + $0xb10] sm:$0xf0]  ;;  %v5216_v22 = vld [vmem:[#allocation5 + $0x878] sm:$0xf0] }
 0x1fb   :  { %vm2090_vm8 = vcmp.ge.f32.partialorder %v1931_v29, 0.0  ;;  %v2094_v11 = vmul.f32 0.2, %v1931_v29 }
 0x1fc   :  { %2981 = vmatpush.bf16.msrb.mxu3 %v5595_v10  ;;  %v5502_v10 = vld [vmem:[#allocation5 + $0xaa8] sm:$0xf] }
 0x1fd   :  { %v2098_v13 = vsel %vm2090_vm8, %v1931_v29, %v2094_v11  ;;  %v5199_v11 = vor.u32 %v6447_v5, %v5198_v4 }
 0x1fe   :  { %v6952_v19 = vpack.c.bf16 %v2098_v13, %v2098_v13  ;;  %v6443_v13 = vld [vmem:[#allocation5 + $0x834] sm:$0xf0] }
 0x1ff   :  { %v5183_v54 = vor.u32 %v6443_v13, %v5182_v30  ;;  %v5311_v30 = vor.u32 %v6475_v8, %v5310_v36  ;;  %v6529_v36 = vld [vmem:[#allocation5 + $0xaec] sm:$0xf] }
 0x200   :  { %v1932_v57 = vpop.f32.mrf.mxu3  ;;  %2894 = vmatmul.bf16.vlgmr.msra.gmra.mxu0 %v6952_v19  ;;  %v6956_v31 = vpop.f32.mrf.mxu1  ;;  %2982 = vmatpush.bf16.msrb.mxu3 %v5579_v21  ;;  %v6449_v21 = vld [vmem:[#allocation5 + $0x86c] sm:$0xf] }
 0x201   :  { %2990 = vmatpush.bf16.msra.mxu0 %v5279_v14  ;;  %v2023_v37 = vpop.f32.mrf.mxu2  ;;  %v5374_v14 = vld [vmem:[#allocation5 + $0x9a8] sm:$0xf] }
 0x202   :  { %v5375_v23 = vor.u32 %v6491_v15, %v5374_v14  ;;  %v5358_v57 = vld [vmem:[#allocation5 + $0x988] sm:$0xf]  ;;  %v5563_v37 = vor.u32 %v6536_v27, %v5560_v32  ;;  %v6515_v32 = vld [vmem:[#allocation5 + $0xa74] sm:$0xf0] }
 0x203   :  { %v5294_v15 = vld [vmem:[#allocation5 + $0x908] sm:$0xf] }
 0x204   :  { %2983 = vmatpush.bf16.msrb.mxu3 %v5563_v37  ;;  %v6493_v37 = vld [vmem:[#allocation5 + $0x9cc] sm:$0xf] }
 0x205   :  { %2991 = vmatpush.bf16.msra.mxu0 %v5263_v51  ;;  %v6487_v51 = vld [vmem:[#allocation5 + $0x994] sm:$0xf0] }
 0x206   :  { %v5359_v41 = vor.u32 %v6487_v51, %v5358_v57  ;;  %v5219_v57 = vor.u32 %v6449_v21, %v5216_v22  ;;  %v5470_v51 = vld [vmem:[#allocation5 + $0xa68] sm:$0xf]  ;;  %v5520_v21 = vld [vmem:[#allocation5 + $0xad8] sm:$0xf0] }
 0x207   :  { %v5471_v38 = vor.u32 %v6515_v32, %v5470_v51  ;;  %v6473_v51 = vld [vmem:[#allocation5 + $0x92c] sm:$0xf] }
 0x208   :  { %v1982_v50 = vpop.f32.mrf.mxu3  ;;  %v2062_v59 = vpop.f32.mrf.mxu1  ;;  %v6521_v32 = vld [vmem:[#allocation5 + $0xaac] sm:$0xf] }
 0x209   :  { %v1983_v52 = vadd.f32 %v1982_v50, %v1970_v48  ;;  %2992 = vmatpush.bf16.msra.mxu0 %v5247_v40  ;;  %v5167_v40 = vor.u32 %v6439_v56, %v5166_v25  ;;  %v5283_v48 = vor.u32 %v6465_v34, %v5280_v35  ;;  %v6532_v50 = vld [vmem:[#allocation5 + $0xb04] sm:$0xf]  ;;  %v5295_v25 = vor.u32 %v6471_v16, %v5294_v15  ;;  %v5200_v34 = vld [vmem:[#allocation5 + $0x858] sm:$0xf0]  ;;  %v6559_v15 = vld [vmem:[#allocation5 + $0xbd4] sm:$0xf0] }
 0x20a   :  { %v5547_v58 = vor.u32 %v6532_v50, %v5544_v12  ;;  %v5487_v56 = vor.u32 %v6519_v20, %v5486_v18  ;;  %v1237_v35 = vperm.slane %v6942_v28, 3  ;;  %v6489_v28 = vld [vmem:[#allocation5 + $0x9ac] sm:$0xf]  ;;  %v5328_v18 = vld [vmem:[#allocation5 + $0x958] sm:$0xf0] }
 0x20b   :  { %vm2091_vm9 = vcmp.ge.f32.partialorder %v1983_v52, 0.0  ;;  %v2095_v3 = vmul.f32 0.2, %v1983_v52  ;;  %v6477_v16 = vld [vmem:[#allocation5 + $0x94c] sm:$0xf] }
 0x20c   :  { %2984 = vmatpush.bf16.msrb.mxu3 %v5547_v58  ;;  %v6525_v20 = vld [vmem:[#allocation5 + $0xacc] sm:$0xf] }
 0x20d   :  { %v2099_v62 = vsel %vm2091_vm9, %v1983_v52, %v2095_v3  ;;  %2993 = vmatpush.bf16.msra.mxu0 %v5231_v53  ;;  %v5264_v53 = vld [vmem:[#allocation5 + $0x8d8] sm:$0xf0]  ;;  %v6479_v3 = vld [vmem:[#allocation5 + $0x954] sm:$0xf0] }
 0x20e   :  { %v6961_v29 = vpack.c.bf16 %v2099_v62, %v2099_v62  ;;  %v5267_v55 = vor.u32 %v6461_v49, %v5264_v53  ;;  %v6527_v62 = vld [vmem:[#allocation5 + $0xad4] sm:$0xf0]  ;;  %v5327_v6 = vor.u32 %v6479_v3, %v5326_v60  ;;  %v5376_v49 = vld [vmem:[#allocation5 + $0x9b8] sm:$0xf0]  ;;  %v5438_v53 = vld [vmem:[#allocation5 + $0xa28] sm:$0xf] }
 0x20f   :  { %v5519_v17 = vor.u32 %v6527_v62, %v5518_v61  ;;  %v5379_v58 = vor.u32 %v6489_v28, %v5376_v49  ;;  %v5360_v60 = vld [vmem:[#allocation5 + $0x998] sm:$0xf0]  ;;  %v5422_v61 = vld [vmem:[#allocation5 + $0xa08] sm:$0xf]  ;;  %v6547_v28 = vld [vmem:[#allocation5 + $0xb74] sm:$0xf0] }
 0x210   :  { %v1984_v43 = vpop.f32.mrf.mxu3  ;;  %2907 = vmatmul.bf16.vlgmr.msra.gmra.mxu1 %v6961_v29  ;;  %2946 = vmatmul.bf16.vlgmr.msrb.gmra.mxu0 %v6952_v19  ;;  %v6513_v49 = vld [vmem:[#allocation5 + $0xa6c] sm:$0xf] }
 0x211   :  { %2994 = vmatpush.bf16.msra.mxu0 %v5215_v63  ;;  %3003 = vmatpush.bf16.msra.mxu1 %v5407_v26  ;;  %v6457_v63 = vld [vmem:[#allocation5 + $0x8ac] sm:$0xf]  ;;  %v5248_v26 = vld [vmem:[#allocation5 + $0x8b8] sm:$0xf0]  ;;  %v6523_v43 = vld [vmem:[#allocation5 + $0xab4] sm:$0xf0] }
 0x212   :  { %v5251_v7 = vor.u32 %v6457_v63, %v5248_v26  ;;  %v5503_v13 = vor.u32 %v6523_v43, %v5502_v10  ;;  %v6503_v26 = vld [vmem:[#allocation5 + $0xa14] sm:$0xf0] }
 0x213   :  { %v5423_v43 = vor.u32 %v6503_v26, %v5422_v61  ;;  %v5440_v61 = vld [vmem:[#allocation5 + $0xa38] sm:$0xf0]  ;;  %v6535_v26 = vld [vmem:[#allocation5 + $0xb14] sm:$0xf0] }
 0x215   :  { %2995 = vmatpush.bf16.msra.mxu0 %v5199_v11  ;;  %3004 = vmatpush.bf16.msra.mxu1 %v5391_v0  ;;  %v6453_v11 = vld [vmem:[#allocation5 + $0x88c] sm:$0xf]  ;;  %v5232_v0 = vld [vmem:[#allocation5 + $0x898] sm:$0xf0] }
 0x216   :  { %v5235_v14 = vor.u32 %v6453_v11, %v5232_v0 }
 0x218   :  { %v2034_v24 = vpop.f32.mrf.mxu3 }
 0x219   :  { %v2035_v39 = vadd.f32 %v2034_v24, %v2022_v33  ;;  %v6969_v9 = vpop.f32.mrf.mxu2  ;;  %2996 = vmatpush.bf16.msra.mxu0 %v5183_v54  ;;  %3005 = vmatpush.bf16.msra.mxu1 %v5375_v23  ;;  %v6497_v54 = vld [vmem:[#allocation5 + $0x9ec] sm:$0xf]  ;;  %v5408_v23 = vld [vmem:[#allocation5 + $0x9f8] sm:$0xf0] }
 0x21a   :  { %v5411_v27 = vor.u32 %v6497_v54, %v5408_v23  ;;  %v6445_v33 = vld [vmem:[#allocation5 + $0x84c] sm:$0xf]  ;;  %v5392_v24 = vld [vmem:[#allocation5 + $0x9d8] sm:$0xf0]  ;;  %v5331_v23 = vor.u32 %v6477_v16, %v5328_v18 }
 0x21b   :  { %vm2092_vm10 = vcmp.ge.f32.partialorder %v2035_v39, 0.0  ;;  %v2096_v52 = vmul.f32 0.2, %v2035_v39  ;;  %v6545_v16 = vld [vmem:[#allocation5 + $0xb6c] sm:$0xf] }
 0x21c   :  { %v5600_v18 = vld [vmem:[#allocation5 + $0xb78] sm:$0xf0] }
 0x21d   :  { %v2100_v44 = vsel %vm2092_vm10, %v2035_v39, %v2096_v52  ;;  %2997 = vmatpush.bf16.msra.mxu0 %v5167_v40  ;;  %3006 = vmatpush.bf16.msra.mxu1 %v5359_v41  ;;  %v5203_v39 = vor.u32 %v6445_v33, %v5200_v34  ;;  %v5454_v40 = vld [vmem:[#allocation5 + $0xa48] sm:$0xf]  ;;  %v5395_v41 = vor.u32 %v6493_v37, %v5392_v24  ;;  %v5504_v33 = vld [vmem:[#allocation5 + $0xab8] sm:$0xf0]  ;;  %v6551_v24 = vld [vmem:[#allocation5 + $0xb94] sm:$0xf0] }
 0x21e   :  { %v6971_v59 = vpack.c.bf16 %v2100_v44, %v2100_v44  ;;  %v5455_v12 = vor.u32 %v6511_v45, %v5454_v40  ;;  %v5187_v52 = vor.u32 %v6441_v46, %v5184_v47  ;;  %v6507_v44 = vld [vmem:[#allocation5 + $0xa34] sm:$0xf0]  ;;  %v5614_v37 = vld [vmem:[#allocation5 + $0xb88] sm:$0xf]  ;;  %v6517_v40 = vld [vmem:[#allocation5 + $0xa8c] sm:$0xf] }
 0x21f   :  { %v5615_v45 = vor.u32 %v6551_v24, %v5614_v37  ;;  %v5750_v37 = vld [vmem:[#allocation5 + $0xca0] sm:$0xf]  ;;  %v6586_v24 = vld [vmem:[#allocation5 + $0xcac] sm:$0xf0] }
 0x220   :  { %v2036_v4 = vpop.f32.mrf.mxu3  ;;  %2920 = vmatmul.bf16.vlgmr.msra.gmra.mxu2 %v6971_v59  ;;  %2959 = vmatmul.bf16.vlgmr.msrb.gmra.mxu1 %v6961_v29 }
 0x221   :  { %3042 = vmatpush.bf16.msrb.mxu0 %v5283_v48  ;;  %v2075_v5 = vpop.f32.mrf.mxu2  ;;  %3007 = vmatpush.bf16.msra.mxu1 %v5343_v1  ;;  %v2048_v48 = vadd.f32 %v6945_v42, %v1237_v35  ;;  %v6437_v1 = vld [vmem:[#allocation5 + $0x80c] sm:$0xf]  ;;  %v5662_v4 = vld [vmem:[#allocation5 + $0xbe8] sm:$0xf]  ;;  %v5507_v35 = vor.u32 %v6521_v32, %v5504_v33 }
 0x222   :  { %2998 = vmatmul.bf16.vlgmr.msra.gmra.mxu0 %v6952_v19  ;;  %3016 = vmatpush.bf16.msra.mxu2 %v5535_v2  ;;  %v5168_v2 = vld [vmem:[#allocation5 + $0x818] sm:$0xf0]  ;;  %v6563_v5 = vld [vmem:[#allocation5 + $0xbf4] sm:$0xf0] }
 0x223   :  { %v2061_v50 = vadd.f32 %v6956_v31, %v2048_v48  ;;  %v5439_v31 = vor.u32 %v6507_v44, %v5438_v53  ;;  %v5171_v63 = vor.u32 %v6437_v1, %v5168_v2  ;;  %v5663_v11 = vor.u32 %v6563_v5, %v5662_v4  ;;  %v5598_v48 = vld [vmem:[#allocation5 + $0xb68] sm:$0xf]  ;;  %v6509_v44 = vld [vmem:[#allocation5 + $0xa4c] sm:$0xf]  ;;  %v5456_v1 = vld [vmem:[#allocation5 + $0xa58] sm:$0xf0] }
 0x224   :  { %v5582_v53 = vld [vmem:[#allocation5 + $0xb48] sm:$0xf]  ;;  %v6501_v4 = vld [vmem:[#allocation5 + $0xa0c] sm:$0xf]  ;;  %v5424_v5 = vld [vmem:[#allocation5 + $0xa18] sm:$0xf0] }
 0x225   :  { %3043 = vmatpush.bf16.msrb.mxu0 %v5267_v55  ;;  %3008 = vmatpush.bf16.msra.mxu1 %v5327_v6  ;;  %v2074_v42 = vadd.f32 %v6969_v9, %v2061_v50  ;;  %v6485_v55 = vld [vmem:[#allocation5 + $0x98c] sm:$0xf]  ;;  %v5536_v9 = vld [vmem:[#allocation5 + $0xaf8] sm:$0xf0] }
 0x226   :  { %3017 = vmatpush.bf16.msra.mxu2 %v5519_v17  ;;  %v5363_v6 = vor.u32 %v6485_v55, %v5360_v60  ;;  %v6481_v17 = vld [vmem:[#allocation5 + $0x96c] sm:$0xf]  ;;  %v5472_v50 = vld [vmem:[#allocation5 + $0xa78] sm:$0xf0]  ;;  %v5566_v55 = vld [vmem:[#allocation5 + $0xb28] sm:$0xf] }
 0x227   :  { %v6539_v60 = vld [vmem:[#allocation5 + $0xb34] sm:$0xf0] }
 0x229   :  { %3044 = vmatpush.bf16.msrb.mxu0 %v5251_v7  ;;  %3009 = vmatpush.bf16.msra.mxu1 %v5311_v30  ;;  %v5344_v7 = vld [vmem:[#allocation5 + $0x978] sm:$0xf0] }
 0x22a   :  { %3018 = vmatpush.bf16.msra.mxu2 %v5503_v13  ;;  %v5347_v30 = vor.u32 %v6481_v17, %v5344_v7  ;;  %v5539_v13 = vor.u32 %v6529_v36, %v5536_v9  ;;  %v5664_v17 = vld [vmem:[#allocation5 + $0xbf8] sm:$0xf0] }
 0x22b   :  { %v5648_v9 = vld [vmem:[#allocation5 + $0xbd8] sm:$0xf0] }
 0x22d   :  { %3045 = vmatpush.bf16.msrb.mxu0 %v5235_v14  ;;  %3010 = vmatpush.bf16.msra.mxu1 %v5295_v25  ;;  %v5646_v14 = vld [vmem:[#allocation5 + $0xbc8] sm:$0xf]  ;;  %v5523_v25 = vor.u32 %v6525_v20, %v5520_v21  ;;  %v5603_v20 = vor.u32 %v6545_v16, %v5600_v18  ;;  %v6541_v21 = vld [vmem:[#allocation5 + $0xb4c] sm:$0xf]  ;;  %v5830_v16 = vld [vmem:[#allocation5 + $0xd40] sm:$0xf] }
 0x22e   :  { %3019 = vmatpush.bf16.msra.mxu2 %v5487_v56  ;;  %v5647_v54 = vor.u32 %v6559_v15, %v5646_v14  ;;  %v5630_v56 = vld [vmem:[#allocation5 + $0xba8] sm:$0xf]  ;;  %v5616_v14 = vld [vmem:[#allocation5 + $0xb98] sm:$0xf0]  ;;  %v6606_v18 = vld [vmem:[#allocation5 + $0xd4c] sm:$0xf0] }
 0x230   :  { %2972 = vmatmul.bf16.vlgmr.msrb.gmra.mxu2 %v6971_v59  ;;  %3011 = vmatmul.bf16.vlgmr.msra.gmra.mxu1 %v6961_v29 }
 0x231   :  { %3046 = vmatpush.bf16.msrb.mxu0 %v5219_v57  ;;  %3055 = vmatpush.bf16.msrb.mxu1 %v5411_v27  ;;  %v6555_v57 = vld [vmem:[#allocation5 + $0xbb4] sm:$0xf0]  ;;  %v5312_v27 = vld [vmem:[#allocation5 + $0x938] sm:$0xf0] }
 0x232   :  { %3020 = vmatpush.bf16.msra.mxu2 %v5471_v38  ;;  %v5631_v34 = vor.u32 %v6555_v57, %v5630_v56  ;;  %v6469_v38 = vld [vmem:[#allocation5 + $0x90c] sm:$0xf]  ;;  %v5782_v56 = vld [vmem:[#allocation5 + $0xce0] sm:$0xf]  ;;  %v6594_v57 = vld [vmem:[#allocation5 + $0xcec] sm:$0xf0] }
 0x235   :  { %3047 = vmatpush.bf16.msrb.mxu0 %v5203_v39  ;;  %3056 = vmatpush.bf16.msrb.mxu1 %v5395_v41  ;;  %v5296_v39 = vld [vmem:[#allocation5 + $0x918] sm:$0xf0] }
 0x236   :  { %3021 = vmatpush.bf16.msra.mxu2 %v5455_v12  ;;  %v5488_v41 = vld [vmem:[#allocation5 + $0xa98] sm:$0xf0]  ;;  %v5299_v46 = vor.u32 %v6469_v38, %v5296_v39  ;;  %v5599_v12 = vor.u32 %v6547_v28, %v5598_v48  ;;  %v5751_v38 = vor.u32 %v6586_v24, %v5750_v37  ;;  %v5734_v39 = vld [vmem:[#allocation5 + $0xc80] sm:$0xf] }
 0x237   :  { %v5491_v47 = vor.u32 %v6517_v40, %v5488_v41  ;;  %v6582_v40 = vld [vmem:[#allocation5 + $0xc8c] sm:$0xf0] }
 0x238   :  { %v2086_v3 = vpop.f32.mrf.mxu3  ;;  %v5735_v41 = vor.u32 %v6582_v40, %v5734_v39  ;;  %v6598_v39 = vld [vmem:[#allocation5 + $0xd0c] sm:$0xf0]  ;;  %v5990_v40 = vld [vmem:[#allocation5 + $0xe80] sm:$0xf] }
 0x239   :  { %v2087_v62 = vadd.f32 %v2086_v3, %v2074_v42  ;;  %3048 = vmatpush.bf16.msrb.mxu0 %v5187_v52  ;;  %3057 = vmatpush.bf16.msrb.mxu1 %v5379_v58  ;;  %v5475_v52 = vor.u32 %v6513_v49, %v5472_v50  ;;  %v6543_v58 = vld [vmem:[#allocation5 + $0xb54] sm:$0xf0]  ;;  %v5459_v42 = vor.u32 %v6509_v44, %v5456_v1  ;;  %v6505_v3 = vld [vmem:[#allocation5 + $0xa2c] sm:$0xf]  ;;  %v6626_v49 = vld [vmem:[#allocation5 + $0xdec] sm:$0xf0] }
 0x23a   :  { %3022 = vmatpush.bf16.msra.mxu2 %v5439_v31  ;;  %v5583_v2 = vor.u32 %v6543_v58, %v5582_v53  ;;  %v5443_v31 = vor.u32 %v6505_v3, %v5440_v61  ;;  %v5894_v53 = vld [vmem:[#allocation5 + $0xdc0] sm:$0xf]  ;;  %v6622_v44 = vld [vmem:[#allocation5 + $0xdcc] sm:$0xf0] }
 0x23b   :  { %vm2093_vm11 = vcmp.ge.f32.partialorder %v2087_v62, 0.0  ;;  %v2097_v8 = vmul.f32 0.2, %v2087_v62  ;;  %v5895_v1 = vor.u32 %v6622_v44, %v5894_v53  ;;  %v6618_v3 = vld [vmem:[#allocation5 + $0xdac] sm:$0xf0] }
 0x23c   :  { %v5974_v53 = vld [vmem:[#allocation5 + $0xe60] sm:$0xf]  ;;  %v6572_v44 = vld [vmem:[#allocation5 + $0xc44] sm:$0xf] }
 0x23d   :  { %v2101_v10 = vsel %vm2093_vm11, %v2087_v62, %v2097_v8  ;;  %3049 = vmatpush.bf16.msrb.mxu0 %v5171_v63  ;;  %3058 = vmatpush.bf16.msrb.mxu1 %v5363_v6  ;;  %v5567_v62 = vor.u32 %v6539_v60, %v5566_v55  ;;  %v5550_v63 = vld [vmem:[#allocation5 + $0xb08] sm:$0xf]  ;;  %v6561_v6 = vld [vmem:[#allocation5 + $0xbec] sm:$0xf] }
 0x23e   :  { %v6982_v0 = vpack.c.bf16 %v2101_v10, %v2101_v10  ;;  %3023 = vmatpush.bf16.msra.mxu2 %v5423_v43  ;;  %v5551_v7 = vor.u32 %v6535_v26, %v5550_v63  ;;  %v5667_v36 = vor.u32 %v6561_v6, %v5664_v17  ;;  %v6557_v8 = vld [vmem:[#allocation5 + $0xbcc] sm:$0xf]  ;;  %v5862_v63 = vld [vmem:[#allocation5 + $0xd80] sm:$0xf]  ;;  %v5784_v6 = vld [vmem:[#allocation5 + $0xcf0] sm:$0xf0] }
 0x23f   :  { %v5651_v10 = vor.u32 %v6557_v8, %v5648_v9  ;;  %v6553_v43 = vld [vmem:[#allocation5 + $0xbac] sm:$0xf]  ;;  %v6038_v8 = vld [vmem:[#allocation5 + $0xee0] sm:$0xf] }
 0x240   :  { %v2088_v22 = vpop.f32.mrf.mxu3  ;;  %2933 = vmatmul.bf16.vlgmr.msra.gmra.mxu3 %v6982_v0  ;;  %3050 = vmatmul.bf16.vlgmr.msrb.gmra.mxu0 %v6952_v19  ;;  %v5315_v19 = vor.u32 %v6473_v51, %v5312_v27  ;;  %v5783_v51 = vor.u32 %v6594_v57, %v5782_v56  ;;  %v6590_v27 = vld [vmem:[#allocation5 + $0xccc] sm:$0xf0]  ;;  %v5814_v57 = vld [vmem:[#allocation5 + $0xd20] sm:$0xf] }
 0x241   :  { %3029 = vmatpush.bf16.msra.mxu3 %v5663_v11  ;;  %3059 = vmatpush.bf16.msrb.mxu1 %v5347_v30  ;;  %v5632_v11 = vld [vmem:[#allocation5 + $0xbb8] sm:$0xf0] }
 0x242   :  { %3068 = vmatpush.bf16.msrb.mxu2 %v5539_v13  ;;  %v5635_v30 = vor.u32 %v6553_v43, %v5632_v11  ;;  %v6549_v13 = vld [vmem:[#allocation5 + $0xb8c] sm:$0xf]  ;;  %v5584_v22 = vld [vmem:[#allocation5 + $0xb58] sm:$0xf0]  ;;  %3890 = vmatpush.bf16.msra.mxu0 %v5783_v51  ;;  %v6658_v11 = vld [vmem:[#allocation5 + $0xeec] sm:$0xf0] }
 0x243   :  { %3024 = vmatmul.bf16.vlgmr.msra.gmra.mxu2 %v6971_v59  ;;  %v5619_v15 = vor.u32 %v6549_v13, %v5616_v14  ;;  %v5768_v13 = vld [vmem:[#allocation5 + $0xcd0] sm:$0xf0]  ;;  %v6039_v14 = vor.u32 %v6658_v11, %v6038_v8  ;;  %v6602_v51 = vld [vmem:[#allocation5 + $0xd2c] sm:$0xf0] }
 0x244   :  { %v6634_v8 = vld [vmem:[#allocation5 + $0xe2c] sm:$0xf0] }
 0x245   :  { %3030 = vmatpush.bf16.msra.mxu3 %v5647_v54  ;;  %3060 = vmatpush.bf16.msrb.mxu1 %v5331_v23  ;;  %v5587_v54 = vor.u32 %v6541_v21, %v5584_v22  ;;  %v6537_v23 = vld [vmem:[#allocation5 + $0xb2c] sm:$0xf]  ;;  %v6654_v21 = vld [vmem:[#allocation5 + $0xecc] sm:$0xf0]  ;;  %v6584_v22 = vld [vmem:[#allocation5 + $0xca4] sm:$0xf] }
 0x246   :  { %3069 = vmatpush.bf16.msrb.mxu2 %v5523_v25  ;;  %v5568_v25 = vld [vmem:[#allocation5 + $0xb38] sm:$0xf0] }
 0x247   :  { %v5571_v32 = vor.u32 %v6537_v23, %v5568_v25  ;;  %v5831_v23 = vor.u32 %v6606_v18, %v5830_v16  ;;  %v5864_v18 = vld [vmem:[#allocation5 + $0xd90] sm:$0xf0] }
 0x249   :  { %3031 = vmatpush.bf16.msra.mxu3 %v5631_v34  ;;  %3061 = vmatpush.bf16.msrb.mxu1 %v5315_v19  ;;  %v6533_v34 = vld [vmem:[#allocation5 + $0xb0c] sm:$0xf]  ;;  %v5552_v19 = vld [vmem:[#allocation5 + $0xb18] sm:$0xf0] }
 0x24a   :  { %3070 = vmatpush.bf16.msrb.mxu2 %v5507_v35  ;;  %v5555_v35 = vor.u32 %v6533_v34, %v5552_v19  ;;  %v6650_v34 = vld [vmem:[#allocation5 + $0xeac] sm:$0xf0]  ;;  %v6580_v19 = vld [vmem:[#allocation5 + $0xc84] sm:$0xf] }
 0x24d   :  { %3032 = vmatpush.bf16.msra.mxu3 %v5615_v45  ;;  %3062 = vmatpush.bf16.msrb.mxu1 %v5299_v46  ;;  %v5718_v45 = vld [vmem:[#allocation5 + $0xc60] sm:$0xf]  ;;  %v6578_v46 = vld [vmem:[#allocation5 + $0xc6c] sm:$0xf0] }
 0x24e   :  { %3071 = vmatpush.bf16.msrb.mxu2 %v5491_v47  ;;  %v5910_v47 = vld [vmem:[#allocation5 + $0xde0] sm:$0xf]  ;;  %v5719_v28 = vor.u32 %v6578_v46, %v5718_v45  ;;  %v6646_v45 = vld [vmem:[#allocation5 + $0xe8c] sm:$0xf0]  ;;  %v6576_v46 = vld [vmem:[#allocation5 + $0xc64] sm:$0xf] }
 0x24f   :  { %v5911_v50 = vor.u32 %v6626_v49, %v5910_v47  ;;  %v5720_v47 = vld [vmem:[#allocation5 + $0xc70] sm:$0xf0] }
 0x250   :  { %2985 = vmatmul.bf16.vlgmr.msrb.gmra.mxu3 %v6982_v0  ;;  %3063 = vmatmul.bf16.vlgmr.msrb.gmra.mxu1 %v6961_v29  ;;  %v5427_v29 = vor.u32 %v6501_v4, %v5424_v5  ;;  %v6614_v4 = vld [vmem:[#allocation5 + $0xd8c] sm:$0xf0]  ;;  %v6592_v5 = vld [vmem:[#allocation5 + $0xce4] sm:$0xf]  ;;  %v5723_v49 = vor.u32 %v6576_v46, %v5720_v47  ;;  %v6134_v47 = vld [vmem:[#allocation5 + $0xfa0] sm:$0xf] }
 0x251   :  { %3033 = vmatpush.bf16.msra.mxu3 %v5599_v12  ;;  %v5702_v12 = vld [vmem:[#allocation5 + $0xc40] sm:$0xf]  ;;  %3903 = vmatpush.bf16.msra.mxu1 %v5911_v50  ;;  %v5863_v17 = vor.u32 %v6614_v4, %v5862_v63  ;;  %v6624_v50 = vld [vmem:[#allocation5 + $0xde4] sm:$0xf]  ;;  %v5688_v4 = vld [vmem:[#allocation5 + $0xc30] sm:$0xf0] }
 0x252   :  { %3072 = vmatpush.bf16.msrb.mxu2 %v5475_v52  ;;  %v6574_v52 = vld [vmem:[#allocation5 + $0xc4c] sm:$0xf0] }
 0x253   :  { %v5703_v58 = vor.u32 %v6574_v52, %v5702_v12  ;;  %v5912_v12 = vld [vmem:[#allocation5 + $0xdf0] sm:$0xf0] }
 0x254   :  { %v5915_v52 = vor.u32 %v6624_v50, %v5912_v12  ;;  %v6600_v50 = vld [vmem:[#allocation5 + $0xd24] sm:$0xf]  ;;  %v5816_v12 = vld [vmem:[#allocation5 + $0xd30] sm:$0xf0] }
 0x255   :  { %3034 = vmatpush.bf16.msra.mxu3 %v5583_v2  ;;  %3904 = vmatpush.bf16.msra.mxu1 %v5895_v1  ;;  %v6570_v2 = vld [vmem:[#allocation5 + $0xc2c] sm:$0xf0] }
 0x256   :  { %3073 = vmatpush.bf16.msrb.mxu2 %v5459_v42  ;;  %v5878_v42 = vld [vmem:[#allocation5 + $0xda0] sm:$0xf] }
 0x257   :  { %v5879_v61 = vor.u32 %v6618_v3, %v5878_v42  ;;  %v5896_v42 = vld [vmem:[#allocation5 + $0xdd0] sm:$0xf0] }
 0x259   :  { %3035 = vmatpush.bf16.msra.mxu3 %v5567_v62  ;;  %v5670_v62 = vld [vmem:[#allocation5 + $0xc00] sm:$0xf]  ;;  %3905 = vmatpush.bf16.msra.mxu1 %v5879_v61 }
 0x25a   :  { %3074 = vmatpush.bf16.msrb.mxu2 %v5443_v31  ;;  %v6566_v31 = vld [vmem:[#allocation5 + $0xc0c] sm:$0xf0] }
 0x25b   :  { %v5671_v26 = vor.u32 %v6566_v31, %v5670_v62  ;;  %v5958_v62 = vld [vmem:[#allocation5 + $0xe40] sm:$0xf]  ;;  %v6638_v31 = vld [vmem:[#allocation5 + $0xe4c] sm:$0xf0] }
 0x25c   :  { %v5959_v63 = vor.u32 %v6638_v31, %v5958_v62  ;;  %v6596_v62 = vld [vmem:[#allocation5 + $0xd04] sm:$0xf]  ;;  %v5800_v31 = vld [vmem:[#allocation5 + $0xd10] sm:$0xf0] }
 0x25d   :  { %3036 = vmatpush.bf16.msra.mxu3 %v5551_v7  ;;  %v5787_v7 = vor.u32 %v6592_v5, %v5784_v6  ;;  %3906 = vmatpush.bf16.msra.mxu1 %v5863_v17  ;;  %v6616_v5 = vld [vmem:[#allocation5 + $0xda4] sm:$0xf]  ;;  %v5880_v17 = vld [vmem:[#allocation5 + $0xdb0] sm:$0xf0] }
 0x25e   :  { %3075 = vmatpush.bf16.msrb.mxu2 %v5427_v29  ;;  %v5846_v29 = vld [vmem:[#allocation5 + $0xd60] sm:$0xf] }
 0x260   :  { %3037 = vmatmul.bf16.vlgmr.msra.gmra.mxu3 %v6982_v0 }
 0x261   :  { %3081 = vmatpush.bf16.msrb.mxu3 %v5667_v36  ;;  %3076 = vmatmul.bf16.vlgmr.msrb.gmra.mxu2 %v6971_v59  ;;  %v5766_v59 = vld [vmem:[#allocation5 + $0xcc0] sm:$0xf]  ;;  %v6610_v36 = vld [vmem:[#allocation5 + $0xd6c] sm:$0xf0] }
 0x262   :  { %v5767_v33 = vor.u32 %v6590_v27, %v5766_v59  ;;  %v5847_v43 = vor.u32 %v6610_v36, %v5846_v29  ;;  %3916 = vmatpush.bf16.msra.mxu2 %v6039_v14  ;;  %v6006_v59 = vld [vmem:[#allocation5 + $0xea0] sm:$0xf]  ;;  %v5883_v29 = vor.u32 %v6616_v5, %v5880_v17  ;;  %v6612_v14 = vld [vmem:[#allocation5 + $0xd84] sm:$0xf] }
 0x263   :  { %v6007_v37 = vor.u32 %v6650_v34, %v6006_v59  ;;  %v5942_v36 = vld [vmem:[#allocation5 + $0xe20] sm:$0xf] }
 0x264   :  { %3891 = vmatpush.bf16.msra.mxu0 %v5767_v33  ;;  %3907 = vmatpush.bf16.msra.mxu1 %v5847_v43  ;;  %v5815_v33 = vor.u32 %v6602_v51, %v5814_v57  ;;  %v5943_v11 = vor.u32 %v6634_v8, %v5942_v36  ;;  %v5848_v57 = vld [vmem:[#allocation5 + $0xd70] sm:$0xf0]  ;;  %v6102_v17 = vld [vmem:[#allocation5 + $0xf60] sm:$0xf]  ;;  %v6640_v8 = vld [vmem:[#allocation5 + $0xe64] sm:$0xf] }
 0x265   :  { %3082 = vmatpush.bf16.msrb.mxu3 %v5651_v10 }
 0x268   :  { %3892 = vmatpush.bf16.msra.mxu0 %v5751_v38  ;;  %3908 = vmatpush.bf16.msra.mxu1 %v5831_v23  ;;  %v5798_v38 = vld [vmem:[#allocation5 + $0xd00] sm:$0xf] }
 0x269   :  { %3083 = vmatpush.bf16.msrb.mxu3 %v5635_v30  ;;  %v6588_v30 = vld [vmem:[#allocation5 + $0xcc4] sm:$0xf] }
 0x26c   :  { %3893 = vmatpush.bf16.msra.mxu0 %v5735_v41  ;;  %3909 = vmatpush.bf16.msra.mxu1 %v5815_v33  ;;  %v5799_v41 = vor.u32 %v6598_v39, %v5798_v38  ;;  %v6604_v38 = vld [vmem:[#allocation5 + $0xd44] sm:$0xf]  ;;  %v5832_v39 = vld [vmem:[#allocation5 + $0xd50] sm:$0xf0] }
 0x26d   :  { %3084 = vmatpush.bf16.msrb.mxu3 %v5619_v15  ;;  %v5771_v15 = vor.u32 %v6588_v30, %v5768_v13  ;;  %v6564_v30 = vld [vmem:[#allocation5 + $0xc04] sm:$0xf]  ;;  %v5672_v13 = vld [vmem:[#allocation5 + $0xc10] sm:$0xf0] }
 0x26e   :  { %v5675_v16 = vor.u32 %v6564_v30, %v5672_v13 }
 0x270   :  { %3894 = vmatpush.bf16.msra.mxu0 %v5719_v28  ;;  %v5991_v28 = vor.u32 %v6646_v45, %v5990_v40  ;;  %3910 = vmatpush.bf16.msra.mxu1 %v5799_v41  ;;  %v6652_v40 = vld [vmem:[#allocation5 + $0xec4] sm:$0xf]  ;;  %v5835_v41 = vor.u32 %v6604_v38, %v5832_v39  ;;  %v6024_v45 = vld [vmem:[#allocation5 + $0xed0] sm:$0xf0] }
 0x271   :  { %3085 = vmatpush.bf16.msrb.mxu3 %v5603_v20  ;;  %v6022_v20 = vld [vmem:[#allocation5 + $0xec0] sm:$0xf]  ;;  %v6027_v46 = vor.u32 %v6652_v40, %v6024_v45  ;;  %v6662_v40 = vld [vmem:[#allocation5 + $0xf0c] sm:$0xf0]  ;;  %v5928_v45 = vld [vmem:[#allocation5 + $0xe10] sm:$0xf0] }
 0x272   :  { %v6023_v25 = vor.u32 %v6654_v21, %v6022_v20  ;;  %v5867_v20 = vor.u32 %v6612_v14, %v5864_v18  ;;  %v5926_v21 = vld [vmem:[#allocation5 + $0xe00] sm:$0xf] }
 0x274   :  { %3895 = vmatpush.bf16.msra.mxu0 %v5703_v58  ;;  %3917 = vmatpush.bf16.msra.mxu2 %v6023_v25  ;;  %v6642_v58 = vld [vmem:[#allocation5 + $0xe6c] sm:$0xf0] }
 0x275   :  { %3086 = vmatpush.bf16.msrb.mxu3 %v5587_v54  ;;  %v5752_v54 = vld [vmem:[#allocation5 + $0xcb0] sm:$0xf0]  ;;  %v5975_v1 = vor.u32 %v6642_v58, %v5974_v53  ;;  %3955 = vmatpush.bf16.msrb.mxu1 %v5915_v52  ;;  %v6690_v25 = vld [vmem:[#allocation5 + $0xfec] sm:$0xf0]  ;;  %v6648_v52 = vld [vmem:[#allocation5 + $0xea4] sm:$0xf]  ;;  %v5819_v53 = vor.u32 %v6600_v50, %v5816_v12 }
 0x276   :  { %v5755_v56 = vor.u32 %v6584_v22, %v5752_v54  ;;  %v6630_v22 = vld [vmem:[#allocation5 + $0xe0c] sm:$0xf0]  ;;  %v6166_v54 = vld [vmem:[#allocation5 + $0xfe0] sm:$0xf]  ;;  %v6008_v58 = vld [vmem:[#allocation5 + $0xeb0] sm:$0xf0] }
 0x277   :  { %v5927_v23 = vor.u32 %v6630_v22, %v5926_v21  ;;  %v6167_v51 = vor.u32 %v6690_v25, %v6166_v54  ;;  %v6636_v21 = vld [vmem:[#allocation5 + $0xe44] sm:$0xf]  ;;  %v5960_v22 = vld [vmem:[#allocation5 + $0xe50] sm:$0xf0] }
 0x278   :  { %3918 = vmatpush.bf16.msra.mxu2 %v6007_v37  ;;  %v5963_v54 = vor.u32 %v6636_v21, %v5960_v22  ;;  %v6688_v50 = vld [vmem:[#allocation5 + $0xfe4] sm:$0xf]  ;;  %v6168_v12 = vld [vmem:[#allocation5 + $0xff0] sm:$0xf0] }
 0x279   :  { %3087 = vmatpush.bf16.msrb.mxu3 %v5571_v32 }
 0x27c   :  { %3919 = vmatpush.bf16.msra.mxu2 %v5991_v28  ;;  %v6682_v28 = vld [vmem:[#allocation5 + $0xfac] sm:$0xf0] }
 0x27d   :  { %3088 = vmatpush.bf16.msrb.mxu3 %v5555_v35  ;;  %v6992_v48 = vpop.f32.mrf.mxu0  ;;  %v5736_v35 = vld [vmem:[#allocation5 + $0xc90] sm:$0xf0] }
 0x27e   :  { %v5739_v24 = vor.u32 %v6580_v19, %v5736_v35  ;;  %v6150_v19 = vld [vmem:[#allocation5 + $0xfc0] sm:$0xf]  ;;  %v6686_v35 = vld [vmem:[#allocation5 + $0xfcc] sm:$0xf0] }
 0x280   :  { %3089 = vmatmul.bf16.vlgmr.msrb.gmra.mxu3 %v6982_v0  ;;  %v5686_v0 = vld [vmem:[#allocation5 + $0xc20] sm:$0xf]  ;;  %3920 = vmatpush.bf16.msra.mxu2 %v5975_v1  ;;  %v6011_v1 = vor.u32 %v6648_v52, %v6008_v58 }
 0x281   :  { %v5687_v60 = vor.u32 %v6570_v2, %v5686_v0  ;;  %v5704_v0 = vld [vmem:[#allocation5 + $0xc50] sm:$0xf0]  ;;  %v6620_v2 = vld [vmem:[#allocation5 + $0xdc4] sm:$0xf]  ;;  %3929 = vmatpush.bf16.msra.mxu3 %v6167_v51 }
 0x282   :  { %v5899_v3 = vor.u32 %v6620_v2, %v5896_v42  ;;  %v6118_v2 = vld [vmem:[#allocation5 + $0xf80] sm:$0xf]  ;;  %v6678_v42 = vld [vmem:[#allocation5 + $0xf8c] sm:$0xf0] }
 0x283   :  { %3896 = vmatpush.bf16.msra.mxu0 %v5687_v60  ;;  %v5707_v60 = vor.u32 %v6572_v44, %v5704_v0  ;;  %v7008_v0 = vld [vmem:[#allocation7 + $0x8] sm:$0xf] }
 0x284   :  { %3956 = vmatpush.bf16.msrb.mxu1 %v5899_v3  ;;  %3921 = vmatpush.bf16.msra.mxu2 %v5959_v63  ;;  %v6119_v3 = vor.u32 %v6678_v42, %v6118_v2  ;;  %v6644_v63 = vld [vmem:[#allocation5 + $0xe84] sm:$0xf]  ;;  %v2238_v5 = vperm.slane %v7008_v0, 0  ;;  %v2239_v52 = vperm.slane %v7008_v0, 1  ;;  %v5758_v2 = vld [vmem:[#allocation5 + $0xca8] sm:$0xf] }
 0x285   :  { %v2897_v55 = vpop.f32.mrf.mxu0  ;;  %v6587_v42 = vld [vmem:[#allocation5 + $0xcb4] sm:$0xf0] }
 0x286   :  { %v2896_v13 = vadd.f32 %v6992_v48, %v2238_v5  ;;  %v5759_v5 = vor.u32 %v6587_v42, %v5758_v2  ;;  %v6664_v2 = vld [vmem:[#allocation5 + $0xf24] sm:$0xf]  ;;  %v6072_v42 = vld [vmem:[#allocation5 + $0xf30] sm:$0xf0] }
 0x287   :  { %3897 = vmatpush.bf16.msra.mxu0 %v5671_v26  ;;  %v6568_v26 = vld [vmem:[#allocation5 + $0xc24] sm:$0xf] }
 0x288   :  { %v5691_v6 = vor.u32 %v6568_v26, %v5688_v4  ;;  %3957 = vmatpush.bf16.msrb.mxu1 %v5883_v29  ;;  %3922 = vmatpush.bf16.msra.mxu2 %v5943_v11  ;;  %v5803_v26 = vor.u32 %v6596_v62, %v5800_v31  ;;  %v5992_v4 = vld [vmem:[#allocation5 + $0xe90] sm:$0xf0]  ;;  %v6674_v29 = vld [vmem:[#allocation5 + $0xf6c] sm:$0xf0] }
 0x289   :  { %v6103_v36 = vor.u32 %v6674_v29, %v6102_v17  ;;  %v6583_v17 = vld [vmem:[#allocation5 + $0xc94] sm:$0xf0]  ;;  %v6680_v29 = vld [vmem:[#allocation5 + $0xfa4] sm:$0xf] }
 0x28b   :  { %3942 = vmatpush.bf16.msrb.mxu0 %v5787_v7 }
 0x28c   :  { %3958 = vmatpush.bf16.msrb.mxu1 %v5867_v20  ;;  %3923 = vmatpush.bf16.msra.mxu2 %v5927_v23 }
 0x28d   :  { %v6994_v9 = vpop.f32.mrf.mxu1  ;;  %v6996_v10 = vpop.f32.mrf.mxu0 }
 0x28e   :  { %v2909_v18 = vadd.f32 %v6994_v9, %v2896_v13  ;;  %v2948_v62 = vadd.f32 %v6996_v10, %v2239_v52  ;;  %v5678_v52 = vld [vmem:[#allocation5 + $0xc08] sm:$0xf] }
 0x28f   :  { %3943 = vmatpush.bf16.msrb.mxu0 %v5771_v15 }
 0x293   :  { %3944 = vmatpush.bf16.msrb.mxu0 %v5755_v56  ;;  %v6608_v56 = vld [vmem:[#allocation5 + $0xd64] sm:$0xf] }
 0x294   :  { %v5851_v59 = vor.u32 %v6608_v56, %v5848_v57  ;;  %v6070_v56 = vld [vmem:[#allocation5 + $0xf20] sm:$0xf]  ;;  %v6666_v57 = vld [vmem:[#allocation5 + $0xf2c] sm:$0xf0] }
 0x295   :  { %v2910_v27 = vpop.f32.mrf.mxu1  ;;  %v2949_v32 = vpop.f32.mrf.mxu0  ;;  %v6071_v48 = vor.u32 %v6666_v57, %v6070_v56  ;;  %v5710_v56 = vld [vmem:[#allocation5 + $0xc48] sm:$0xf]  ;;  %v6575_v57 = vld [vmem:[#allocation5 + $0xc54] sm:$0xf0] }
 0x296   :  { %v6656_v27 = vld [vmem:[#allocation5 + $0xee4] sm:$0xf]  ;;  %v6040_v32 = vld [vmem:[#allocation5 + $0xef0] sm:$0xf0]  ;;  %3959 = vmatpush.bf16.msrb.mxu1 %v5851_v59 }
 0x297   :  { %3945 = vmatpush.bf16.msrb.mxu0 %v5739_v24  ;;  %v6043_v34 = vor.u32 %v6656_v27, %v6040_v32  ;;  %v6151_v24 = vor.u32 %v6686_v35, %v6150_v19  ;;  %v6632_v59 = vld [vmem:[#allocation5 + $0xe24] sm:$0xf]  ;;  %v5944_v27 = vld [vmem:[#allocation5 + $0xe30] sm:$0xf0] }
 0x298   :  { %v5947_v9 = vor.u32 %v6632_v59, %v5944_v27  ;;  %v6623_v59 = vld [vmem:[#allocation5 + $0xdd4] sm:$0xf0]  ;;  %v6672_v27 = vld [vmem:[#allocation5 + $0xf64] sm:$0xf] }
 0x299   :  { %3968 = vmatpush.bf16.msrb.mxu2 %v6043_v34  ;;  %3930 = vmatpush.bf16.msra.mxu3 %v6151_v24  ;;  %v6595_v34 = vld [vmem:[#allocation5 + $0xcf4] sm:$0xf0]  ;;  %v5774_v24 = vld [vmem:[#allocation5 + $0xcc8] sm:$0xf] }
 0x29a   :  { %3960 = vmatpush.bf16.msrb.mxu1 %v5835_v41  ;;  %v6628_v41 = vld [vmem:[#allocation5 + $0xe04] sm:$0xf] }
 0x29b   :  { %3946 = vmatpush.bf16.msrb.mxu0 %v5723_v49  ;;  %v6135_v49 = vor.u32 %v6682_v28, %v6134_v47  ;;  %v6591_v47 = vld [vmem:[#allocation5 + $0xcd4] sm:$0xf0] }
 0x29d   :  { %v6998_v55 = vpop.f32.mrf.mxu1  ;;  %3969 = vmatpush.bf16.msrb.mxu2 %v6027_v46  ;;  %3931 = vmatpush.bf16.msra.mxu3 %v6135_v49  ;;  %v5931_v49 = vor.u32 %v6628_v41, %v5928_v45  ;;  %v6668_v41 = vld [vmem:[#allocation5 + $0xf44] sm:$0xf]  ;;  %v6088_v45 = vld [vmem:[#allocation5 + $0xf50] sm:$0xf0] }
 0x29e   :  { %3961 = vmatpush.bf16.msrb.mxu1 %v5819_v53  ;;  %v6171_v53 = vor.u32 %v6688_v50, %v6168_v12 }
 0x29f   :  { %v7000_v61 = vpop.f32.mrf.mxu0  ;;  %3947 = vmatpush.bf16.msrb.mxu0 %v5707_v60 }
 0x2a1   :  { %3970 = vmatpush.bf16.msrb.mxu2 %v6011_v1  ;;  %3932 = vmatpush.bf16.msra.mxu3 %v6119_v3  ;;  %v5775_v1 = vor.u32 %v6591_v47, %v5774_v24  ;;  %v6152_v3 = vld [vmem:[#allocation5 + $0xfd0] sm:$0xf0] }
 0x2a2   :  { %3962 = vmatpush.bf16.msrb.mxu1 %v5803_v26 }
 0x2a3   :  { %v7002_v7 = vpop.f32.mrf.mxu2  ;;  %3948 = vmatpush.bf16.msrb.mxu0 %v5691_v6  ;;  %v5995_v6 = vor.u32 %v6644_v63, %v5992_v4  ;;  %v2961_v4 = vadd.f32 %v6998_v55, %v2948_v62  ;;  %v6676_v55 = vld [vmem:[#allocation5 + $0xf84] sm:$0xf]  ;;  %v5792_v62 = vld [vmem:[#allocation5 + $0xcf8] sm:$0xf0] }
 0x2a4   :  { %v2922_v23 = vadd.f32 %v7002_v7, %v2909_v18  ;;  %v6054_v7 = vld [vmem:[#allocation5 + $0xf00] sm:$0xf]  ;;  %v6627_v18 = vld [vmem:[#allocation5 + $0xdf4] sm:$0xf0] }
 0x2a5   :  { %v2962_v43 = vpop.f32.mrf.mxu1  ;;  %3971 = vmatpush.bf16.msrb.mxu2 %v5995_v6  ;;  %3933 = vmatpush.bf16.msra.mxu3 %v6103_v36  ;;  %v6055_v28 = vor.u32 %v6662_v40, %v6054_v7  ;;  %v5742_v6 = vld [vmem:[#allocation5 + $0xc88] sm:$0xf]  ;;  %v6136_v36 = vld [vmem:[#allocation5 + $0xfb0] sm:$0xf0]  ;;  %v6619_v40 = vld [vmem:[#allocation5 + $0xdb4] sm:$0xf0] }
 0x2a6   :  { %v5976_v43 = vld [vmem:[#allocation5 + $0xe70] sm:$0xf0]  ;;  %v5743_v10 = vor.u32 %v6583_v17, %v5742_v6  ;;  %v5694_v7 = vld [vmem:[#allocation5 + $0xc28] sm:$0xf]  ;;  %v6611_v17 = vld [vmem:[#allocation5 + $0xd74] sm:$0xf0] }
 0x2a7   :  { %v3001_v15 = vpop.f32.mrf.mxu0  ;;  %3949 = vmatpush.bf16.msrb.mxu0 %v5675_v16  ;;  %v5979_v30 = vor.u32 %v6640_v8, %v5976_v43  ;;  %v6670_v16 = vld [vmem:[#allocation5 + $0xf4c] sm:$0xf0]  ;;  %v6139_v43 = vor.u32 %v6680_v29, %v6136_v36  ;;  %v6046_v29 = vld [vmem:[#allocation5 + $0xee8] sm:$0xf]  ;;  %v6659_v36 = vld [vmem:[#allocation5 + $0xef4] sm:$0xf0] }
 0x2a8   :  { %v6086_v15 = vld [vmem:[#allocation5 + $0xf40] sm:$0xf] }
 0x2a9   :  { %3972 = vmatpush.bf16.msrb.mxu2 %v5979_v30  ;;  %v6087_v20 = vor.u32 %v6670_v16, %v6086_v15  ;;  %v6579_v15 = vld [vmem:[#allocation5 + $0xc74] sm:$0xf0]  ;;  %v5918_v16 = vld [vmem:[#allocation5 + $0xde8] sm:$0xf] }
 0x2ab   :  { %v2923_v33 = vpop.f32.mrf.mxu2  ;;  %3934 = vmatpush.bf16.msra.mxu3 %v6087_v20  ;;  %v6120_v20 = vld [vmem:[#allocation5 + $0xf90] sm:$0xf0] }
 0x2ac   :  { %v5790_v33 = vld [vmem:[#allocation5 + $0xce8] sm:$0xf] }
 0x2ad   :  { %v7004_v37 = vpop.f32.mrf.mxu1  ;;  %3973 = vmatpush.bf16.msrb.mxu2 %v5963_v54  ;;  %v5791_v39 = vor.u32 %v6595_v34, %v5790_v33  ;;  %v6123_v54 = vor.u32 %v6676_v55, %v6120_v20  ;;  %v2240_v33 = vperm.slane %v7008_v0, 2  ;;  %v6047_v55 = vor.u32 %v6659_v36, %v6046_v29  ;;  %v6569_v29 = vld [vmem:[#allocation5 + $0xc2c] sm:$0xf]  ;;  %v5696_v36 = vld [vmem:[#allocation5 + $0xc38] sm:$0xf0] }
 0x2af   :  { %3935 = vmatpush.bf16.msra.mxu3 %v6071_v48  ;;  %v3000_v47 = vadd.f32 %v7000_v61, %v2240_v33  ;;  %v6603_v33 = vld [vmem:[#allocation5 + $0xd34] sm:$0xf0] }
 0x2b1   :  { %3974 = vmatpush.bf16.msrb.mxu2 %v5947_v9 }
 0x2b3   :  { %v7006_v44 = vpop.f32.mrf.mxu2  ;;  %3936 = vmatpush.bf16.msra.mxu3 %v6055_v28  ;;  %v6091_v28 = vor.u32 %v6668_v41, %v6088_v45  ;;  %v6599_v41 = vld [vmem:[#allocation5 + $0xd14] sm:$0xf0]  ;;  %v5998_v45 = vld [vmem:[#allocation5 + $0xe88] sm:$0xf] }
 0x2b4   :  { %v2974_v8 = vadd.f32 %v7006_v44, %v2961_v4  ;;  %v5919_v44 = vor.u32 %v6627_v18, %v5918_v16 }
 0x2b5   :  { %v3014_v60 = vpop.f32.mrf.mxu1  ;;  %3975 = vmatpush.bf16.msrb.mxu2 %v5931_v49  ;;  %v3013_v49 = vadd.f32 %v7004_v37, %v3000_v47  ;;  %v6647_v47 = vld [vmem:[#allocation5 + $0xe94] sm:$0xf0] }
 0x2b6   :  { %v6684_v60 = vld [vmem:[#allocation5 + $0xfc4] sm:$0xf] }
 0x2b7   :  { %3981 = vmatpush.bf16.msrb.mxu3 %v6171_v53  ;;  %v6155_v63 = vor.u32 %v6684_v60, %v6152_v3  ;;  %v6567_v53 = vld [vmem:[#allocation5 + $0xc14] sm:$0xf0]  ;;  %v6593_v3 = vld [vmem:[#allocation5 + $0xcec] sm:$0xf] }
 0x2bb   :  { %v2975_v14 = vpop.f32.mrf.mxu2  ;;  %3982 = vmatpush.bf16.msrb.mxu3 %v6155_v63  ;;  %v6075_v63 = vor.u32 %v6664_v2, %v6072_v42  ;;  %v6643_v42 = vld [vmem:[#allocation5 + $0xe74] sm:$0xf0] }
 0x2bc   :  { %v5726_v14 = vld [vmem:[#allocation5 + $0xc68] sm:$0xf] }
 0x2bd   :  { %v7011_v11 = vpop.f32.mrf.mxu0 }
 0x2bf   :  { %3983 = vmatpush.bf16.msrb.mxu3 %v6139_v43  ;;  %v6589_v43 = vld [vmem:[#allocation5 + $0xccc] sm:$0xf] }
 0x2c3   :  { %v2934_v25 = vpop.f32.mrf.mxu3  ;;  %3984 = vmatpush.bf16.msrb.mxu3 %v6123_v54  ;;  %v6030_v54 = vld [vmem:[#allocation5 + $0xec8] sm:$0xf] }
 0x2c4   :  { %v2935_v51 = vadd.f32 %v2934_v25, %v2922_v23  ;;  %v5727_v25 = vor.u32 %v6579_v15, %v5726_v14 }
 0x2c5   :  { %v3053_v32 = vpop.f32.mrf.mxu0 }
 0x2c6   :  { %vm3094_vm12 = vcmp.ge.f32.partialorder %v2935_v51, 0.0  ;;  %v3098_v19 = vmul.f32 0.2, %v2935_v51  ;;  %v7016_v35 = vpop.f32.mrf.mxu2  ;;  %v6104_v32 = vld [vmem:[#allocation5 + $0xf70] sm:$0xf0] }
 0x2c7   :  { %v6107_v34 = vor.u32 %v6672_v27, %v6104_v32  ;;  %v3026_v60 = vadd.f32 %v7016_v35, %v3013_v49  ;;  %v6056_v35 = vld [vmem:[#allocation5 + $0xf10] sm:$0xf0]  ;;  %v5822_v32 = vld [vmem:[#allocation5 + $0xd28] sm:$0xf]  ;;  %v5728_v49 = vld [vmem:[#allocation5 + $0xc78] sm:$0xf0] }
 0x2c8   :  { %v3102_v38 = vsel %vm3094_vm12, %v2935_v51, %v3098_v19  ;;  %v5902_v51 = vld [vmem:[#allocation5 + $0xdc8] sm:$0xf]  ;;  %v5711_v19 = vor.u32 %v6575_v57, %v5710_v56 }
 0x2c9   :  { %v7018_v46 = vpack.c.bf16 %v3102_v38, %v3102_v38  ;;  %v5903_v24 = vor.u32 %v6623_v59, %v5902_v51  ;;  %v6571_v38 = vld [vmem:[#allocation5 + $0xc34] sm:$0xf0]  ;;  %3985 = vmatpush.bf16.msrb.mxu3 %v6107_v34  ;;  %v6014_v34 = vld [vmem:[#allocation5 + $0xea8] sm:$0xf] }
 0x2ca   :  { %v5695_v50 = vor.u32 %v6571_v38, %v5694_v7  ;;  %v5823_v7 = vor.u32 %v6603_v33, %v5822_v32  ;;  %v6657_v32 = vld [vmem:[#allocation5 + $0xeec] sm:$0xf] }
 0x2cb   :  { %v2936_v58 = vpop.f32.mrf.mxu3  ;;  %3898 = vmatmul.bf16.vlgmr.msra.gmra.mxu0 %v7018_v46 }
 0x2cc   :  { %3994 = vmatpush.bf16.msra.mxu0 %v5791_v39  ;;  %v5886_v39 = vld [vmem:[#allocation5 + $0xda8] sm:$0xf] }
 0x2cd   :  { %v7023_v31 = vpop.f32.mrf.mxu1  ;;  %v5887_v12 = vor.u32 %v6619_v40, %v5886_v39  ;;  %v5870_v58 = vld [vmem:[#allocation5 + $0xd88] sm:$0xf]  ;;  %3986 = vmatpush.bf16.msrb.mxu3 %v6091_v28  ;;  %v6577_v28 = vld [vmem:[#allocation5 + $0xc6c] sm:$0xf] }
 0x2ce   :  { %v3027_v26 = vpop.f32.mrf.mxu2  ;;  %v5806_v40 = vld [vmem:[#allocation5 + $0xd08] sm:$0xf] }
 0x2cf   :  { %v5854_v26 = vld [vmem:[#allocation5 + $0xd68] sm:$0xf] }
 0x2d0   :  { %3995 = vmatpush.bf16.msra.mxu0 %v5775_v1  ;;  %v6615_v1 = vld [vmem:[#allocation5 + $0xd94] sm:$0xf0]  ;;  %v5855_v16 = vor.u32 %v6611_v17, %v5854_v26 }
 0x2d1   :  { %v5871_v6 = vor.u32 %v6615_v1, %v5870_v58  ;;  %3987 = vmatpush.bf16.msrb.mxu3 %v6075_v63  ;;  %v5731_v58 = vor.u32 %v6577_v28, %v5728_v49  ;;  %v5982_v1 = vld [vmem:[#allocation5 + $0xe68] sm:$0xf]  ;;  %v6621_v63 = vld [vmem:[#allocation5 + $0xdcc] sm:$0xf]  ;;  %v6639_v17 = vld [vmem:[#allocation5 + $0xe54] sm:$0xf0] }
 0x2d2   :  { %v5983_v26 = vor.u32 %v6643_v42, %v5982_v1  ;;  %v6032_v28 = vld [vmem:[#allocation5 + $0xed8] sm:$0xf0]  ;;  %v6601_v1 = vld [vmem:[#allocation5 + $0xd2c] sm:$0xf] }
 0x2d3   :  { %v2986_v30 = vpop.f32.mrf.mxu3  ;;  %v6649_v42 = vld [vmem:[#allocation5 + $0xeac] sm:$0xf] }
 0x2d4   :  { %v2987_v13 = vadd.f32 %v2986_v30, %v2974_v8  ;;  %3996 = vmatpush.bf16.msra.mxu0 %v5759_v5  ;;  %v5679_v5 = vor.u32 %v6567_v53, %v5678_v52  ;;  %v5795_v8 = vor.u32 %v6593_v3, %v5792_v62  ;;  %v6660_v30 = vld [vmem:[#allocation5 + $0xf04] sm:$0xf]  ;;  %v5807_v52 = vor.u32 %v6599_v41, %v5806_v40  ;;  %v5712_v3 = vld [vmem:[#allocation5 + $0xc58] sm:$0xf0]  ;;  %v6687_v40 = vld [vmem:[#allocation5 + $0xfd4] sm:$0xf0] }
 0x2d5   :  { %v3066_v22 = vpop.f32.mrf.mxu1  ;;  %v6059_v14 = vor.u32 %v6660_v30, %v6056_v35  ;;  %v5999_v53 = vor.u32 %v6647_v47, %v5998_v45  ;;  %v2241_v62 = vperm.slane %v7008_v0, 3  ;;  %v6617_v0 = vld [vmem:[#allocation5 + $0xdac] sm:$0xf]  ;;  %v5840_v45 = vld [vmem:[#allocation5 + $0xd58] sm:$0xf0] }
 0x2d6   :  { %vm3095_vm13 = vcmp.ge.f32.partialorder %v2987_v13, 0.0  ;;  %v3099_v21 = vmul.f32 0.2, %v2987_v13  ;;  %v6607_v22 = vld [vmem:[#allocation5 + $0xd54] sm:$0xf0] }
 0x2d7   :  { %3988 = vmatpush.bf16.msrb.mxu3 %v6059_v14  ;;  %v6605_v41 = vld [vmem:[#allocation5 + $0xd4c] sm:$0xf] }
 0x2d8   :  { %v3103_v23 = vsel %vm3095_vm13, %v2987_v13, %v3099_v21  ;;  %3997 = vmatpush.bf16.msra.mxu0 %v5743_v10  ;;  %v5776_v10 = vld [vmem:[#allocation5 + $0xcd8] sm:$0xf0]  ;;  %v5838_v21 = vld [vmem:[#allocation5 + $0xd48] sm:$0xf]  ;;  %v6653_v47 = vld [vmem:[#allocation5 + $0xecc] sm:$0xf] }
 0x2d9   :  { %v7027_v48 = vpack.c.bf16 %v3103_v23, %v3103_v23  ;;  %v5779_v20 = vor.u32 %v6589_v43, %v5776_v10  ;;  %v6655_v23 = vld [vmem:[#allocation5 + $0xed4] sm:$0xf0]  ;;  %v5839_v51 = vor.u32 %v6607_v22, %v5838_v21  ;;  %v5888_v43 = vld [vmem:[#allocation5 + $0xdb8] sm:$0xf0]  ;;  %v5950_v10 = vld [vmem:[#allocation5 + $0xe28] sm:$0xf] }
 0x2da   :  { %v6031_v59 = vor.u32 %v6655_v23, %v6030_v54  ;;  %v5891_v14 = vor.u32 %v6617_v0, %v5888_v43  ;;  %v5872_v21 = vld [vmem:[#allocation5 + $0xd98] sm:$0xf0]  ;;  %v5934_v54 = vld [vmem:[#allocation5 + $0xe08] sm:$0xf]  ;;  %v6675_v0 = vld [vmem:[#allocation5 + $0xf74] sm:$0xf0] }
 0x2db   :  { %v2988_v9 = vpop.f32.mrf.mxu3  ;;  %3911 = vmatmul.bf16.vlgmr.msra.gmra.mxu1 %v7027_v48  ;;  %3950 = vmatmul.bf16.vlgmr.msrb.gmra.mxu0 %v7018_v46  ;;  %v6641_v43 = vld [vmem:[#allocation5 + $0xe6c] sm:$0xf] }
 0x2dc   :  { %3998 = vmatpush.bf16.msra.mxu0 %v5727_v25  ;;  %4007 = vmatpush.bf16.msra.mxu1 %v5919_v44  ;;  %v6585_v25 = vld [vmem:[#allocation5 + $0xcac] sm:$0xf]  ;;  %v5760_v44 = vld [vmem:[#allocation5 + $0xcb8] sm:$0xf0]  ;;  %v6651_v9 = vld [vmem:[#allocation5 + $0xeb4] sm:$0xf0] }
 0x2dd   :  { %v5763_v27 = vor.u32 %v6585_v25, %v5760_v44  ;;  %v6015_v38 = vor.u32 %v6651_v9, %v6014_v34  ;;  %v6631_v44 = vld [vmem:[#allocation5 + $0xe14] sm:$0xf0] }
 0x2de   :  { %v5935_v9 = vor.u32 %v6631_v44, %v5934_v54  ;;  %v5952_v54 = vld [vmem:[#allocation5 + $0xe38] sm:$0xf0]  ;;  %v6663_v44 = vld [vmem:[#allocation5 + $0xf14] sm:$0xf0] }
 0x2e0   :  { %3999 = vmatpush.bf16.msra.mxu0 %v5711_v19  ;;  %4008 = vmatpush.bf16.msra.mxu1 %v5903_v24  ;;  %v6581_v19 = vld [vmem:[#allocation5 + $0xc8c] sm:$0xf]  ;;  %v5744_v24 = vld [vmem:[#allocation5 + $0xc98] sm:$0xf0] }
 0x2e1   :  { %v5747_v39 = vor.u32 %v6581_v19, %v5744_v24 }
 0x2e3   :  { %v3038_v61 = vpop.f32.mrf.mxu3 }
 0x2e4   :  { %v3039_v4 = vadd.f32 %v3038_v61, %v3026_v60  ;;  %v7035_v37 = vpop.f32.mrf.mxu2  ;;  %4000 = vmatpush.bf16.msra.mxu0 %v5695_v50  ;;  %4009 = vmatpush.bf16.msra.mxu1 %v5887_v12  ;;  %v6625_v50 = vld [vmem:[#allocation5 + $0xdec] sm:$0xf]  ;;  %v5920_v12 = vld [vmem:[#allocation5 + $0xdf8] sm:$0xf0] }
 0x2e5   :  { %v5923_v2 = vor.u32 %v6625_v50, %v5920_v12  ;;  %v6573_v60 = vld [vmem:[#allocation5 + $0xc4c] sm:$0xf]  ;;  %v5904_v61 = vld [vmem:[#allocation5 + $0xdd8] sm:$0xf0]  ;;  %v5843_v12 = vor.u32 %v6605_v41, %v5840_v45 }
 0x2e6   :  { %vm3096_vm14 = vcmp.ge.f32.partialorder %v3039_v4, 0.0  ;;  %v3100_v13 = vmul.f32 0.2, %v3039_v4  ;;  %v6673_v41 = vld [vmem:[#allocation5 + $0xf6c] sm:$0xf] }
 0x2e7   :  { %v6112_v45 = vld [vmem:[#allocation5 + $0xf78] sm:$0xf0] }
 0x2e8   :  { %v3104_v15 = vsel %vm3096_vm14, %v3039_v4, %v3100_v13  ;;  %4001 = vmatpush.bf16.msra.mxu0 %v5679_v5  ;;  %4010 = vmatpush.bf16.msra.mxu1 %v5871_v6  ;;  %v5715_v4 = vor.u32 %v6573_v60, %v5712_v3  ;;  %v5966_v5 = vld [vmem:[#allocation5 + $0xe48] sm:$0xf]  ;;  %v5907_v6 = vor.u32 %v6621_v63, %v5904_v61  ;;  %v6016_v60 = vld [vmem:[#allocation5 + $0xeb8] sm:$0xf0]  ;;  %v6679_v61 = vld [vmem:[#allocation5 + $0xf94] sm:$0xf0] }
 0x2e9   :  { %v7037_v18 = vpack.c.bf16 %v3104_v15, %v3104_v15  ;;  %v5967_v35 = vor.u32 %v6639_v17, %v5966_v5  ;;  %v5699_v13 = vor.u32 %v6569_v29, %v5696_v36  ;;  %v6635_v15 = vld [vmem:[#allocation5 + $0xe34] sm:$0xf0]  ;;  %v6126_v63 = vld [vmem:[#allocation5 + $0xf88] sm:$0xf]  ;;  %v6645_v5 = vld [vmem:[#allocation5 + $0xe8c] sm:$0xf] }
 0x2ea   :  { %v6127_v17 = vor.u32 %v6679_v61, %v6126_v63 }
 0x2eb   :  { %v3040_v56 = vpop.f32.mrf.mxu3  ;;  %3924 = vmatmul.bf16.vlgmr.msra.gmra.mxu2 %v7037_v18  ;;  %3963 = vmatmul.bf16.vlgmr.msrb.gmra.mxu1 %v7027_v48 }
 0x2ec   :  { %4046 = vmatpush.bf16.msrb.mxu0 %v5795_v8  ;;  %v3079_v57 = vpop.f32.mrf.mxu2  ;;  %4011 = vmatpush.bf16.msra.mxu1 %v5855_v16  ;;  %v3052_v8 = vadd.f32 %v7011_v11, %v2241_v62  ;;  %v6565_v16 = vld [vmem:[#allocation5 + $0xc0c] sm:$0xf]  ;;  %v6174_v56 = vld [vmem:[#allocation5 + $0xfe8] sm:$0xf]  ;;  %v6019_v62 = vor.u32 %v6649_v42, %v6016_v60 }
 0x2ed   :  { %4002 = vmatmul.bf16.vlgmr.msra.gmra.mxu0 %v7018_v46  ;;  %4020 = vmatpush.bf16.msra.mxu2 %v6047_v55  ;;  %v5680_v55 = vld [vmem:[#allocation5 + $0xc18] sm:$0xf0]  ;;  %v6691_v57 = vld [vmem:[#allocation5 + $0xff4] sm:$0xf0] }
 0x2ee   :  { %v3065_v30 = vadd.f32 %v7023_v31, %v3052_v8  ;;  %v5951_v31 = vor.u32 %v6635_v15, %v5950_v10  ;;  %v5683_v25 = vor.u32 %v6565_v16, %v5680_v55  ;;  %v6175_v19 = vor.u32 %v6691_v57, %v6174_v56  ;;  %v6110_v8 = vld [vmem:[#allocation5 + $0xf68] sm:$0xf]  ;;  %v6637_v15 = vld [vmem:[#allocation5 + $0xe4c] sm:$0xf]  ;;  %v5968_v16 = vld [vmem:[#allocation5 + $0xe58] sm:$0xf0] }
 0x2ef   :  { %v6094_v10 = vld [vmem:[#allocation5 + $0xf48] sm:$0xf]  ;;  %v6629_v56 = vld [vmem:[#allocation5 + $0xe0c] sm:$0xf]  ;;  %v5936_v57 = vld [vmem:[#allocation5 + $0xe18] sm:$0xf0] }
 0x2f0   :  { %4047 = vmatpush.bf16.msrb.mxu0 %v5779_v20  ;;  %4012 = vmatpush.bf16.msra.mxu1 %v5839_v51  ;;  %v3078_v11 = vadd.f32 %v7035_v37, %v3065_v30  ;;  %v6613_v20 = vld [vmem:[#allocation5 + $0xd8c] sm:$0xf]  ;;  %v6048_v37 = vld [vmem:[#allocation5 + $0xef8] sm:$0xf0] }
 0x2f1   :  { %4021 = vmatpush.bf16.msra.mxu2 %v6031_v59  ;;  %v5875_v51 = vor.u32 %v6613_v20, %v5872_v21  ;;  %v6609_v59 = vld [vmem:[#allocation5 + $0xd6c] sm:$0xf]  ;;  %v5984_v30 = vld [vmem:[#allocation5 + $0xe78] sm:$0xf0]  ;;  %v6078_v20 = vld [vmem:[#allocation5 + $0xf28] sm:$0xf] }
 0x2f2   :  { %v6667_v21 = vld [vmem:[#allocation5 + $0xf34] sm:$0xf0] }
 0x2f4   :  { %4048 = vmatpush.bf16.msrb.mxu0 %v5763_v27  ;;  %4013 = vmatpush.bf16.msra.mxu1 %v5823_v7  ;;  %v5856_v27 = vld [vmem:[#allocation5 + $0xd78] sm:$0xf0] }
 0x2f5   :  { %4022 = vmatpush.bf16.msra.mxu2 %v6015_v38  ;;  %v5859_v7 = vor.u32 %v6609_v59, %v5856_v27  ;;  %v6051_v38 = vor.u32 %v6657_v32, %v6048_v37  ;;  %v6176_v59 = vld [vmem:[#allocation5 + $0xff8] sm:$0xf0] }
 0x2f6   :  { %v6160_v37 = vld [vmem:[#allocation5 + $0xfd8] sm:$0xf0] }
 0x2f8   :  { %4049 = vmatpush.bf16.msrb.mxu0 %v5747_v39  ;;  %4014 = vmatpush.bf16.msra.mxu1 %v5807_v52  ;;  %v6158_v39 = vld [vmem:[#allocation5 + $0xfc8] sm:$0xf]  ;;  %v6035_v52 = vor.u32 %v6653_v47, %v6032_v28  ;;  %v6115_v47 = vor.u32 %v6673_v41, %v6112_v45  ;;  %v6669_v28 = vld [vmem:[#allocation5 + $0xf4c] sm:$0xf] }
 0x2f9   :  { %4023 = vmatpush.bf16.msra.mxu2 %v5999_v53  ;;  %v6159_v50 = vor.u32 %v6687_v40, %v6158_v39  ;;  %v6142_v53 = vld [vmem:[#allocation5 + $0xfa8] sm:$0xf]  ;;  %v6128_v39 = vld [vmem:[#allocation5 + $0xf98] sm:$0xf0] }
 0x2fb   :  { %3976 = vmatmul.bf16.vlgmr.msrb.gmra.mxu2 %v7037_v18  ;;  %4015 = vmatmul.bf16.vlgmr.msra.gmra.mxu1 %v7027_v48 }
 0x2fc   :  { %4050 = vmatpush.bf16.msrb.mxu0 %v5731_v58  ;;  %4059 = vmatpush.bf16.msrb.mxu1 %v5923_v2  ;;  %v6683_v58 = vld [vmem:[#allocation5 + $0xfb4] sm:$0xf0]  ;;  %v5824_v2 = vld [vmem:[#allocation5 + $0xd38] sm:$0xf0] }
 0x2fd   :  { %4024 = vmatpush.bf16.msra.mxu2 %v5983_v26  ;;  %v6143_v3 = vor.u32 %v6683_v58, %v6142_v53  ;;  %v6597_v26 = vld [vmem:[#allocation5 + $0xd0c] sm:$0xf] }
 0x2fe   :  { %v6661_v58 = vld [vmem:[#allocation5 + $0xf0c] sm:$0xf] }
 0x300   :  { %4051 = vmatpush.bf16.msrb.mxu0 %v5715_v4  ;;  %4060 = vmatpush.bf16.msrb.mxu1 %v5907_v6  ;;  %v5808_v4 = vld [vmem:[#allocation5 + $0xd18] sm:$0xf0] }
 0x301   :  { %4025 = vmatpush.bf16.msra.mxu2 %v5967_v35  ;;  %v6000_v6 = vld [vmem:[#allocation5 + $0xe98] sm:$0xf0]  ;;  %v5811_v29 = vor.u32 %v6597_v26, %v5808_v4  ;;  %v6111_v35 = vor.u32 %v6675_v0, %v6110_v8 }
 0x302   :  { %v6003_v36 = vor.u32 %v6645_v5, %v6000_v6 }
 0x303   :  { %v3090_v22 = vpop.f32.mrf.mxu3 }
 0x304   :  { %v3091_v23 = vadd.f32 %v3090_v22, %v3078_v11  ;;  %4052 = vmatpush.bf16.msrb.mxu0 %v5699_v13  ;;  %4061 = vmatpush.bf16.msrb.mxu1 %v5891_v14  ;;  %v5987_v13 = vor.u32 %v6641_v43, %v5984_v30  ;;  %v6671_v14 = vld [vmem:[#allocation5 + $0xf54] sm:$0xf0]  ;;  %v5971_v11 = vor.u32 %v6637_v15, %v5968_v16  ;;  %v6633_v22 = vld [vmem:[#allocation5 + $0xe2c] sm:$0xf] }
 0x305   :  { %4026 = vmatpush.bf16.msra.mxu2 %v5951_v31  ;;  %v6095_v55 = vor.u32 %v6671_v14, %v6094_v10  ;;  %v5955_v31 = vor.u32 %v6633_v22, %v5952_v54 }
 0x306   :  { %vm3097_vm15 = vcmp.ge.f32.partialorder %v3091_v23, 0.0  ;;  %v3101_v33 = vmul.f32 0.2, %v3091_v23 }
 0x308   :  { %v3105_v34 = vsel %vm3097_vm15, %v3091_v23, %v3101_v33  ;;  %4053 = vmatpush.bf16.msrb.mxu0 %v5683_v25  ;;  %4062 = vmatpush.bf16.msrb.mxu1 %v5875_v51  ;;  %v6079_v23 = vor.u32 %v6667_v21, %v6078_v20  ;;  %v6062_v25 = vld [vmem:[#allocation5 + $0xf08] sm:$0xf]  ;;  %v6689_v51 = vld [vmem:[#allocation5 + $0xfec] sm:$0xf] }
 0x309   :  { %v7048_v24 = vpack.c.bf16 %v3105_v34, %v3105_v34  ;;  %4027 = vmatpush.bf16.msra.mxu2 %v5935_v9  ;;  %v6063_v27 = vor.u32 %v6663_v44, %v6062_v25  ;;  %v6179_v32 = vor.u32 %v6689_v51, %v6176_v59  ;;  %v6685_v33 = vld [vmem:[#allocation5 + $0xfcc] sm:$0xf] }
 0x30a   :  { %v6163_v34 = vor.u32 %v6685_v33, %v6160_v37  ;;  %v6681_v9 = vld [vmem:[#allocation5 + $0xfac] sm:$0xf] }
 0x30b   :  { %v3092_v49 = vpop.f32.mrf.mxu3  ;;  %3937 = vmatmul.bf16.vlgmr.msra.gmra.mxu3 %v7048_v24  ;;  %4054 = vmatmul.bf16.vlgmr.msrb.gmra.mxu0 %v7018_v46  ;;  %v5827_v46 = vor.u32 %v6601_v1, %v5824_v2 }
 0x30c   :  { %4033 = vmatpush.bf16.msra.mxu3 %v6175_v19  ;;  %4063 = vmatpush.bf16.msrb.mxu1 %v5859_v7  ;;  %v6144_v19 = vld [vmem:[#allocation5 + $0xfb8] sm:$0xf0] }
 0x30d   :  { %4072 = vmatpush.bf16.msrb.mxu2 %v6051_v38  ;;  %v6147_v7 = vor.u32 %v6681_v9, %v6144_v19  ;;  %v6677_v38 = vld [vmem:[#allocation5 + $0xf8c] sm:$0xf]  ;;  %v6096_v49 = vld [vmem:[#allocation5 + $0xf58] sm:$0xf0] }
 0x30e   :  { %4028 = vmatmul.bf16.vlgmr.msra.gmra.mxu2 %v7037_v18  ;;  %v6131_v40 = vor.u32 %v6677_v38, %v6128_v39 }
 0x310   :  { %4034 = vmatpush.bf16.msra.mxu3 %v6159_v50  ;;  %4064 = vmatpush.bf16.msrb.mxu1 %v5843_v12  ;;  %v6099_v50 = vor.u32 %v6669_v28, %v6096_v49  ;;  %v6665_v12 = vld [vmem:[#allocation5 + $0xf2c] sm:$0xf] }
 0x311   :  { %4073 = vmatpush.bf16.msrb.mxu2 %v6035_v52  ;;  %v6080_v52 = vld [vmem:[#allocation5 + $0xf38] sm:$0xf0] }
 0x312   :  { %v6083_v53 = vor.u32 %v6665_v12, %v6080_v52 }
 0x314   :  { %4035 = vmatpush.bf16.msra.mxu3 %v6143_v3  ;;  %4065 = vmatpush.bf16.msrb.mxu1 %v5827_v46 }
 0x315   :  { %4074 = vmatpush.bf16.msrb.mxu2 %v6019_v62 }
 0x318   :  { %4036 = vmatpush.bf16.msra.mxu3 %v6127_v17  ;;  %4066 = vmatpush.bf16.msrb.mxu1 %v5811_v29 }
 0x319   :  { %4075 = vmatpush.bf16.msrb.mxu2 %v6003_v36  ;;  %v3240_v36 = vld [vmem:[#allocation7 + $0xc] sm:$0xf] }
 0x31a   :  { %v3242_v0 = vperm.slane %v3240_v36, 0  ;;  %v3243_v20 = vperm.slane %v3240_v36, 1  ;;  %v3245_v41 = vperm.slane %v3240_v36, 3 }
 0x31b   :  { %3989 = vmatmul.bf16.vlgmr.msrb.gmra.mxu3 %v7048_v24  ;;  %4067 = vmatmul.bf16.vlgmr.msrb.gmra.mxu1 %v7027_v48  ;;  %v5939_v48 = vor.u32 %v6629_v56, %v5936_v57 }
 0x31c   :  { %4037 = vmatpush.bf16.msra.mxu3 %v6111_v35 }
 0x31d   :  { %4076 = vmatpush.bf16.msrb.mxu2 %v5987_v13 }
 0x320   :  { %4038 = vmatpush.bf16.msra.mxu3 %v6095_v55 }
 0x321   :  { %4077 = vmatpush.bf16.msrb.mxu2 %v5971_v11 }
 0x324   :  { %4039 = vmatpush.bf16.msra.mxu3 %v6079_v23 }
 0x325   :  { %4078 = vmatpush.bf16.msrb.mxu2 %v5955_v31 }
 0x328   :  { %4040 = vmatpush.bf16.msra.mxu3 %v6063_v27  ;;  %v3244_v27 = vperm.slane %v3240_v36, 2 }
 0x329   :  { %4079 = vmatpush.bf16.msrb.mxu2 %v5939_v48 }
 0x32b   :  { %4041 = vmatmul.bf16.vlgmr.msra.gmra.mxu3 %v7048_v24 }
 0x32c   :  { %4085 = vmatpush.bf16.msrb.mxu3 %v6179_v32  ;;  %4080 = vmatmul.bf16.vlgmr.msrb.gmra.mxu2 %v7037_v18  ;;  %v6064_v18 = vld [vmem:[#allocation5 + $0xf18] sm:$0xf0] }
 0x32d   :  { %v6067_v1 = vor.u32 %v6661_v58, %v6064_v18 }
 0x330   :  { %4086 = vmatpush.bf16.msrb.mxu3 %v6163_v34 }
 0x334   :  { %4087 = vmatpush.bf16.msrb.mxu3 %v6147_v7 }
 0x338   :  { %4088 = vmatpush.bf16.msrb.mxu3 %v6131_v40 }
 0x33c   :  { %4089 = vmatpush.bf16.msrb.mxu3 %v6115_v47 }
 0x340   :  { %4090 = vmatpush.bf16.msrb.mxu3 %v6099_v50 }
 0x344   :  { %4091 = vmatpush.bf16.msrb.mxu3 %v6083_v53 }
 0x348   :  { %4092 = vmatpush.bf16.msrb.mxu3 %v6067_v1  ;;  %v3899_v2 = vpop.f32.mrf.mxu0 }
 0x349   :  { %v3900_v30 = vadd.f32 %v3899_v2, %v3242_v0 }
 0x34b   :  { %4093 = vmatmul.bf16.vlgmr.msrb.gmra.mxu3 %v7048_v24 }
 0x350   :  { %v3901_v42 = vpop.f32.mrf.mxu0 }
 0x358   :  { %v3912_v60 = vpop.f32.mrf.mxu1  ;;  %v3951_v3 = vpop.f32.mrf.mxu0 }
 0x359   :  { %v3913_v35 = vadd.f32 %v3912_v60, %v3900_v30  ;;  %v3952_v22 = vadd.f32 %v3951_v3, %v3243_v20 }
 0x360   :  { %v3914_v46 = vpop.f32.mrf.mxu1  ;;  %v3953_v62 = vpop.f32.mrf.mxu0 }
 0x368   :  { %v3964_v63 = vpop.f32.mrf.mxu1 }
 0x369   :  { %v3965_v31 = vadd.f32 %v3964_v63, %v3952_v22 }
 0x36a   :  { %v4003_v61 = vpop.f32.mrf.mxu0 }
 0x36b   :  { %v4004_v32 = vadd.f32 %v4003_v61, %v3244_v27 }
 0x36e   :  { %v3925_v26 = vpop.f32.mrf.mxu2 }
 0x36f   :  { %v3926_v13 = vadd.f32 %v3925_v26, %v3913_v35 }
 0x370   :  { %v3966_v4 = vpop.f32.mrf.mxu1 }
 0x372   :  { %v4005_v5 = vpop.f32.mrf.mxu0 }
 0x376   :  { %v3927_v6 = vpop.f32.mrf.mxu2 }
 0x378   :  { %v4016_v17 = vpop.f32.mrf.mxu1 }
 0x379   :  { %v4017_v33 = vadd.f32 %v4016_v17, %v4004_v32 }
 0x37e   :  { %v3977_v29 = vpop.f32.mrf.mxu2 }
 0x37f   :  { %v3978_v25 = vadd.f32 %v3977_v29, %v3965_v31 }
 0x380   :  { %v4018_v8 = vpop.f32.mrf.mxu1 }
 0x386   :  { %v3979_v24 = vpop.f32.mrf.mxu2 }
 0x388   :  { %v4055_v43 = vpop.f32.mrf.mxu0 }
 0x389   :  { %v4056_v45 = vadd.f32 %v4055_v43, %v3245_v41 }
 0x38e   :  { %v3938_v10 = vpop.f32.mrf.mxu3 }
 0x38f   :  { %v3939_v14 = vadd.f32 %v3938_v10, %v3926_v13 }
 0x390   :  { %v4057_v15 = vpop.f32.mrf.mxu0 }
 0x391   :  { %vm4098_vm0 = vcmp.ge.f32.partialorder %v3939_v14, 0.0  ;;  %v4102_v16 = vmul.f32 0.2, %v3939_v14  ;;  %v4029_v55 = vpop.f32.mrf.mxu2 }
 0x392   :  { %v4030_v37 = vadd.f32 %v4029_v55, %v4017_v33 }
 0x393   :  { %v4106_v11 = vsel %vm4098_vm0, %v3939_v14, %v4102_v16 }
 0x394   :  { %4110 = vst [vmem:[#allocation8] sm:$0xff] %v4106_v11 }
 0x396   :  { %v3940_v21 = vpop.f32.mrf.mxu3 }
 0x398   :  { %v4068_v54 = vpop.f32.mrf.mxu1 }
 0x399   :  { %v4031_v23 = vpop.f32.mrf.mxu2  ;;  %v4069_v47 = vadd.f32 %v4068_v54, %v4056_v45 }
 0x39e   :  { %v3990_v44 = vpop.f32.mrf.mxu3 }
 0x39f   :  { %v3991_v56 = vadd.f32 %v3990_v44, %v3978_v25 }
 0x3a0   :  { %v4070_v51 = vpop.f32.mrf.mxu1 }
 0x3a1   :  { %vm4099_vm1 = vcmp.ge.f32.partialorder %v3991_v56, 0.0  ;;  %v4103_v57 = vmul.f32 0.2, %v3991_v56 }
 0x3a3   :  { %v4107_v59 = vsel %vm4099_vm1, %v3991_v56, %v4103_v57 }
 0x3a4   :  { %4111 = vst [vmem:[#allocation8 + $0x8] sm:$0xff] %v4107_v59 }
 0x3a6   :  { %v3992_v48 = vpop.f32.mrf.mxu3 }
 0x3ae   :  { %v4042_v34 = vpop.f32.mrf.mxu3 }
 0x3af   :  { %v4043_v9 = vadd.f32 %v4042_v34, %v4030_v37  ;;  %v4081_v19 = vpop.f32.mrf.mxu2 }
 0x3b0   :  { %v4082_v28 = vadd.f32 %v4081_v19, %v4069_v47 }
 0x3b1   :  { %vm4100_vm2 = vcmp.ge.f32.partialorder %v4043_v9, 0.0  ;;  %v4104_v7 = vmul.f32 0.2, %v4043_v9 }
 0x3b3   :  { %v4108_v38 = vsel %vm4100_vm2, %v4043_v9, %v4104_v7 }
 0x3b4   :  { %4112 = vst [vmem:[#allocation8 + $0x10] sm:$0xff] %v4108_v38 }
 0x3b6   :  { %v4044_v39 = vpop.f32.mrf.mxu3 }
 0x3b7   :  { %v4083_v40 = vpop.f32.mrf.mxu2 }
 0x3ce   :  { %v4094_v49 = vpop.f32.mrf.mxu3 }
 0x3cf   :  { %v4095_v50 = vadd.f32 %v4094_v49, %v4082_v28 }
 0x3d1   :  { %vm4101_vm3 = vcmp.ge.f32.partialorder %v4095_v50, 0.0  ;;  %v4105_v12 = vmul.f32 0.2, %v4095_v50 }
 0x3d3   :  { %v4109_v52 = vsel %vm4101_vm3, %v4095_v50, %v4105_v12 }
 0x3d4   :  { %4113 = vst [vmem:[#allocation8 + $0x18] sm:$0xff] %v4109_v52 }
 0x3d5   :  { %4124 = dma.vmem_to_hbm [thread:$0]  %s4120_s2, 512, %s4122_s5, [#allocation4]  }
 0x3d6   :  { %v4096_v53 = vpop.f32.mrf.mxu3 }
 0x3d7   :  { %6805 = dma.done.wait [#allocation4], 512  }
 0x3d8   :  { %6806 = vsyncadd [#allocation4], 4294966784 }
 0x3d9   :  { %4129 = vsyncpa [#allocation3], 1 }
 0x3da   :  { %4130 = vsyncpa [#allocation6], 1 }
 0x3db   :  { %4131 = vsyncpa [#allocation4], 1 }

</bundles_post_ra>
